<compile_context>
chip_gen: v5e
topology: v5e:2x2
jax: 0.10.0
libtpu: 0.0.40
codegen_flags: <defaults>
</compile_context>

<pallas_src>
import math

import jax
import jax.numpy as jnp
from jax.experimental import pallas as pl
from jax.experimental.pallas import tpu as pltpu


# ------------------------------ fused kernels -------------------------------

def _make_kernel(H, W, KH, KW, stride, padding, Ho, Wo, cin_g, cout_g, mxu_dtype):
    """Returns (kernel, scratch_spec_or_None) for one (group, image) grid step."""
    Hp, Wp = H + 2 * padding, W + 2 * padding
    fast_1x1 = (KH == 1 and KW == 1 and padding == 0 and stride == 1)

    def _bn_relu(x_ref, scale_ref, bias_ref):
        # BN (inference affine) + ReLU in f32, cast ONCE to the MXU dtype.
        y = jnp.maximum(x_ref[...] * scale_ref[...] + bias_ref[...], 0.0)
        return y.astype(mxu_dtype)

    if fast_1x1:
        # ---- 1x1 / pad 0 fast path: no padded scratch, a single MXU matmul.
        def kernel(x_ref, scale_ref, bias_ref, w_ref, o_ref):
            y = _bn_relu(x_ref, scale_ref, bias_ref)
            lhs = y.reshape(Ho * Wo, cin_g)   # Wo % 8 == 0 keeps this layout-preserving
            o_ref[...] = jnp.dot(lhs, w_ref[0, 0],
                                 preferred_element_type=jnp.float32)
        return kernel, None

    def kernel(x_ref, scale_ref, bias_ref, w_ref, o_ref, ypad_ref):
        y = _bn_relu(x_ref, scale_ref, bias_ref)

        # Zero ONLY the halo ring; the interior is fully overwritten every step.
        if padding > 0:
            zrow = jnp.zeros((padding, Wp, cin_g), mxu_dtype)
            ypad_ref[0:padding, :, :] = zrow
            ypad_ref[padding + H:Hp, :, :] = zrow
            zcol = jnp.zeros((H, padding, cin_g), mxu_dtype)
            ypad_ref[padding:padding + H, 0:padding, :] = zcol
            ypad_ref[padding:padding + H, padding + W:Wp, :] = zcol
        ypad_ref[padding:padding + H, padding:padding + W, :] = y

        # Direct convolution: KH*KW taps, each a matmul, accumulated into a local
        # f32 value so the MXU/compiler owns the accumulation chain; one store.
        acc = None
        for i in range(KH):                      # static unroll (<=9 for 3x3)
            for j in range(KW):
                if stride == 1:
                    tap = ypad_ref[i:i + Ho, j:j + Wo, :]
                else:
                    # TODO(synk): untested stride>1 path; replace with a once-per-step
                    # row/column-decimated (phase) scratch per the perf review.
                    tap = ypad_ref[pl.ds(i, Ho, stride=stride),
                                   pl.ds(j, Wo, stride=stride), :]
                lhs = tap.reshape(Ho * Wo, cin_g)   # already bf16; free when Wo%8==0
                d = jnp.dot(lhs, w_ref[i, j], preferred_element_type=jnp.float32)
                acc = d if acc is None else acc + d
        o_ref[...] = acc                          # single output-block store

    return kernel, pltpu.VMEM((Hp, Wp, cin_g), mxu_dtype)


# ------------------------------ wrapper --------------------------------------

def bn_act_conv2d_pallas(x_nchw, scale_g, bias_g, w_taps, *, stride, padding,
                         groups, mxu_dtype=jnp.bfloat16):
    """Fused BN->ReLU->Conv2d.  x_nchw: (N, Cin, H, W) f32.  Returns NCHW f32."""
    N, Cin, H, W = x_nchw.shape
    G = groups
    cin_g = Cin // G
    _, KH, KW, _, cout_g = w_taps.shape
    Ho = (H + 2 * padding - KH) // stride + 1
    Wo = (W + 2 * padding - KW) // stride + 1

    # 1x1 / pad 0 convs with stride>1 only ever read x[..., ::s, ::s]; BN+ReLU is
    # pointwise, so decimate once in HBM (plain XLA slice) and run the stride-1
    # fast path: no strided VMEM reads inside the kernel.
    stride_k = stride
    if KH == 1 and KW == 1 and padding == 0 and stride > 1:
        x_nchw = x_nchw[:, :, ::stride, ::stride]
        H, W = x_nchw.shape[2], x_nchw.shape[3]
        stride_k = 1

    # NCHW -> (G, N, H, W, cin_g): one transpose handles layout + group split.
    # TODO(synk): keep activations channels-last across layers to drop this HBM
    #             transpose (and the inverse one below).
    x5 = x_nchw.reshape(N, G, cin_g, H, W).transpose(1, 0, 3, 4, 2)

    kernel, scratch = _make_kernel(H, W, KH, KW, stride_k, padding, Ho, Wo,
                                   cin_g, cout_g, mxu_dtype)

    # VMEM cap derived from the actual working set (double-buffered blocks +
    # scratch) instead of a fixed large number.
    itemsize_w = jnp.dtype(mxu_dtype).itemsize
    need = 2 * (H * W * cin_g * 4                     # input block (f32)
                + Ho * Wo * cout_g * 4                # output block (f32)
                + KH * KW * cin_g * cout_g * itemsize_w
                + 2 * cin_g * 4)                      # BN scale + bias
    if scratch is not None:
        need += (H + 2 * padding) * (W + 2 * padding) * cin_g * itemsize_w
    vmem_limit = int(min(max(2 * need, 8 * 2**20), 64 * 2**20))

    out = pl.pallas_call(
        kernel,
        out_shape=jax.ShapeDtypeStruct((G, N, Ho * Wo, cout_g), jnp.float32),
        grid=(G, N),
        in_specs=[
            # raw input slice for (g, n): last two block dims == full array dims
            pl.BlockSpec((None, None, H, W, cin_g), lambda g, n: (g, n, 0, 0, 0)),
            pl.BlockSpec((None, 1, cin_g), lambda g, n: (g, 0, 0)),   # BN scale
            pl.BlockSpec((None, 1, cin_g), lambda g, n: (g, 0, 0)),   # BN bias
            # bf16 weight taps for group g (reused across the inner batch axis)
            pl.BlockSpec((None, KH, KW, cin_g, cout_g),
                         lambda g, n: (g, 0, 0, 0, 0)),
        ],
        out_specs=pl.BlockSpec((None, None, Ho * Wo, cout_g),
                               lambda g, n: (g, n, 0, 0)),
        scratch_shapes=[] if scratch is None else [scratch],
        compiler_params=pltpu.CompilerParams(
            dimension_semantics=("parallel", "parallel"),
            vmem_limit_bytes=vmem_limit,
        ),
    )(x5, scale_g, bias_g, w_taps)

    # (G, N, Ho*Wo, cout_g) -> NCHW (no lane padding to drop).
    out = out.reshape(G, N, Ho, Wo, cout_g).transpose(1, 0, 4, 2, 3)
    return out.reshape(N, G * cout_g, Ho, Wo)


# ------------------------------ module port ---------------------------------

class BnActConv2dPallas:
    """BnActConv2d: BatchNorm2d(eps=1e-3) -> ReLU -> Conv2d(bias=False)."""

    def __init__(self, in_chs, out_chs, kernel_size, stride, padding=0, groups=1,
                 key=jax.random.PRNGKey(0), mxu_dtype=jnp.bfloat16):
        self.in_chs, self.out_chs = in_chs, out_chs
        self.kernel_size, self.stride = kernel_size, stride
        self.padding, self.groups = padding, groups
        self.eps = 1e-3
        self.mxu_dtype = mxu_dtype

        k0, k1, k2, k3, k4 = jax.random.split(key, 5)
        # Deterministic synthetic parameters (shapes match nn.BatchNorm2d / nn.Conv2d).
        self.gamma = 1.0 + 0.1 * jax.random.normal(k0, (in_chs,), jnp.float32)
        self.beta = 0.1 * jax.random.normal(k1, (in_chs,), jnp.float32)
        self.running_mean = 0.1 * jax.random.normal(k2, (in_chs,), jnp.float32)
        self.running_var = 1.0 + 0.1 * jax.random.uniform(k3, (in_chs,), jnp.float32)
        fan_in = (in_chs // groups) * kernel_size * kernel_size
        bound = 1.0 / math.sqrt(fan_in)
        self.weight = jax.random.uniform(
            k4, (out_chs, in_chs // groups, kernel_size, kernel_size),
            jnp.float32, minval=-bound, maxval=bound)

        # ---- constants precomputed ONCE (not per forward call) ----
        cin_g = in_chs // groups
        cout_g = out_chs // groups
        scale = self.gamma * jax.lax.rsqrt(self.running_var + self.eps)
        bias = self.beta - self.running_mean * scale
        self.scale_g = scale.reshape(groups, 1, cin_g).astype(jnp.float32)
        self.bias_g = bias.reshape(groups, 1, cin_g).astype(jnp.float32)

        # (Cout, Cin_g, KH, KW) -> (G, KH, KW, cin_g, cout_g), bf16, UNPADDED.
        w = self.weight.reshape(groups, cout_g, cin_g, kernel_size, kernel_size)
        self.w_taps = jnp.transpose(w, (0, 3, 4, 2, 1)).astype(mxu_dtype)

    def __call__(self, x_nchw):
        return bn_act_conv2d_pallas(
            x_nchw, self.scale_g, self.bias_g, self.w_taps,
            stride=self.stride, padding=self.padding, groups=self.groups,
            mxu_dtype=self.mxu_dtype)


# ------------------------------ reference -----------------------------------

def _reference(x_nchw, mod):
    scale = mod.gamma * jax.lax.rsqrt(mod.running_var + mod.eps)
    bias = mod.beta - mod.running_mean * scale
    y = jnp.maximum(
        x_nchw * scale[None, :, None, None] + bias[None, :, None, None], 0.0)
    return jax.lax.conv_general_dilated(
        y, mod.weight,
        window_strides=(mod.stride, mod.stride),
        padding=[(mod.padding, mod.padding)] * 2,
        dimension_numbers=("NCHW", "OIHW", "NCHW"),
        feature_group_count=mod.groups)


if __name__ == "__main__":
    key = jax.random.PRNGKey(0)
    kx, kp1, kp2, kp3, kp4 = jax.random.split(key, 5)
    N, C_IN, C_OUT, H, W = 2, 16, 32, 16, 16
    x = jax.random.normal(kx, (N, C_IN, H, W), jnp.float32)

    configs = [
        dict(kernel_size=3, stride=1, padding=1, groups=1, key=kp1),  # main 3x3
        dict(kernel_size=3, stride=1, padding=1, groups=2, key=kp2),  # grouped 3x3
        dict(kernel_size=1, stride=1, padding=0, groups=1, key=kp3),  # 1x1 fast path
        dict(kernel_size=1, stride=2, padding=0, groups=1, key=kp4),  # 1x1 s2 proj
    ]
    for cfg in configs:
        mod = BnActConv2dPallas(C_IN, C_OUT, **cfg)
        out = jax.block_until_ready(mod(x))
        ref = _reference(x, mod)
        assert out.shape == ref.shape, (out.shape, ref.shape)
        # bf16 matmul operands with f32 accumulation: ~1e-2 rel tolerance vs f32 ref.
        assert jnp.allclose(out, ref, atol=2e-2, rtol=2e-2), (
            "mismatch vs JAX reference for config %r" % (cfg,))

    print("KERNEL_OK")
</pallas_src>

<mosaic_0001>
module attributes {stable_mosaic.version = 11 : i64} {
  func.func @kernel(%arg0: i32, %arg1: i32, %arg2: memref<1x1x16x16x16xf32, #tpu.memory_space<vmem>>, %arg3: memref<1x1x16xf32, #tpu.memory_space<vmem>>, %arg4: memref<1x1x16xf32, #tpu.memory_space<vmem>>, %arg5: memref<1x3x3x16x32xbf16, #tpu.memory_space<vmem>>, %arg6: memref<1x1x256x32xf32, #tpu.memory_space<vmem>>, %arg7: memref<18x18x16xbf16, #tpu.memory_space<vmem>>) attributes {dimension_semantics = [#tpu.dimension_semantics<parallel>, #tpu.dimension_semantics<parallel>], iteration_bounds = array<i64: 1, 2>, scalar_prefetch = 0 : i64, scratch_operands = 1 : i64, tpu.core_type = #tpu.core_type<tc>, window_params = [{transform_indices = @transform_0, window_bounds = array<i64: 1, 1, 16, 16, 16>}, {transform_indices = @transform_1, window_bounds = array<i64: 1, 1, 16>}, {transform_indices = @transform_2, window_bounds = array<i64: 1, 1, 16>}, {transform_indices = @transform_3, window_bounds = array<i64: 1, 3, 3, 16, 32>}, {transform_indices = @transform_4, window_bounds = array<i64: 1, 1, 256, 32>}]} {
    %c0 = arith.constant 0 : index
    %c0_0 = arith.constant 0 : index
    %c0_1 = arith.constant 0 : index
    %c0_2 = arith.constant 0 : index
    %c0_3 = arith.constant 0 : index
    %0 = vector.load %arg2[%c0, %c0_0, %c0_1, %c0_2, %c0_3] : memref<1x1x16x16x16xf32, #tpu.memory_space<vmem>>, vector<1x1x16x16x16xf32>
    %1 = vector.shape_cast %0 : vector<1x1x16x16x16xf32> to vector<16x16x16xf32>
    %c0_4 = arith.constant 0 : index
    %c0_5 = arith.constant 0 : index
    %c0_6 = arith.constant 0 : index
    %2 = vector.load %arg3[%c0_4, %c0_5, %c0_6] : memref<1x1x16xf32, #tpu.memory_space<vmem>>, vector<1x1x16xf32>
    %3 = vector.shape_cast %2 : vector<1x1x16xf32> to vector<1x16xf32>
    %4 = vector.shape_cast %3 : vector<1x16xf32> to vector<1x1x16xf32>
    %5 = vector.broadcast %4 : vector<1x1x16xf32> to vector<16x16x16xf32>
    %6 = arith.mulf %1, %5 : vector<16x16x16xf32>
    %c0_7 = arith.constant 0 : index
    %c0_8 = arith.constant 0 : index
    %c0_9 = arith.constant 0 : index
    %7 = vector.load %arg4[%c0_7, %c0_8, %c0_9] : memref<1x1x16xf32, #tpu.memory_space<vmem>>, vector<1x1x16xf32>
    %8 = vector.shape_cast %7 : vector<1x1x16xf32> to vector<1x16xf32>
    %9 = vector.shape_cast %8 : vector<1x16xf32> to vector<1x1x16xf32>
    %10 = vector.broadcast %9 : vector<1x1x16xf32> to vector<16x16x16xf32>
    %11 = arith.addf %6, %10 : vector<16x16x16xf32>
    %cst = arith.constant 0.000000e+00 : f32
    %12 = vector.broadcast %cst : f32 to vector<16x16x16xf32>
    %13 = arith.maximumf %11, %12 : vector<16x16x16xf32>
    %14 = arith.truncf %13 : vector<16x16x16xf32> to vector<16x16x16xbf16>
    %cst_10 = arith.constant 0.000000e+00 : bf16
    %15 = vector.broadcast %cst_10 : bf16 to vector<1x18x16xbf16>
    %c0_11 = arith.constant 0 : index
    %c0_12 = arith.constant 0 : index
    %c0_13 = arith.constant 0 : index
    %16 = vector.load %arg7[%c0_11, %c0_12, %c0_13] : memref<18x18x16xbf16, #tpu.memory_space<vmem>>, vector<1x18x16xbf16>
    tpu.vector_store %arg7[%c0_11, %c0_12, %c0_13], %15 {strides = array<i32>} : memref<18x18x16xbf16, #tpu.memory_space<vmem>>, vector<1x18x16xbf16>,
    %c17 = arith.constant 17 : index
    %c0_14 = arith.constant 0 : index
    %c0_15 = arith.constant 0 : index
    %17 = vector.load %arg7[%c17, %c0_14, %c0_15] : memref<18x18x16xbf16, #tpu.memory_space<vmem>>, vector<1x18x16xbf16>
    tpu.vector_store %arg7[%c17, %c0_14, %c0_15], %15 {strides = array<i32>} : memref<18x18x16xbf16, #tpu.memory_space<vmem>>, vector<1x18x16xbf16>,
    %cst_16 = arith.constant 0.000000e+00 : bf16
    %18 = vector.broadcast %cst_16 : bf16 to vector<16x1x16xbf16>
    %c1 = arith.constant 1 : index
    %c0_17 = arith.constant 0 : index
    %c0_18 = arith.constant 0 : index
    %19 = vector.load %arg7[%c1, %c0_17, %c0_18] : memref<18x18x16xbf16, #tpu.memory_space<vmem>>, vector<16x1x16xbf16>
    tpu.vector_store %arg7[%c1, %c0_17, %c0_18], %18 {strides = array<i32>} : memref<18x18x16xbf16, #tpu.memory_space<vmem>>, vector<16x1x16xbf16>,
    %c1_19 = arith.constant 1 : index
    %c17_20 = arith.constant 17 : index
    %c0_21 = arith.constant 0 : index
    %20 = vector.load %arg7[%c1_19, %c17_20, %c0_21] : memref<18x18x16xbf16, #tpu.memory_space<vmem>>, vector<16x1x16xbf16>
    tpu.vector_store %arg7[%c1_19, %c17_20, %c0_21], %18 {strides = array<i32>} : memref<18x18x16xbf16, #tpu.memory_space<vmem>>, vector<16x1x16xbf16>,
    %c1_22 = arith.constant 1 : index
    %c1_23 = arith.constant 1 : index
    %c0_24 = arith.constant 0 : index
    %21 = vector.load %arg7[%c1_22, %c1_23, %c0_24] : memref<18x18x16xbf16, #tpu.memory_space<vmem>>, vector<16x16x16xbf16>
    tpu.vector_store %arg7[%c1_22, %c1_23, %c0_24], %14 {strides = array<i32>} : memref<18x18x16xbf16, #tpu.memory_space<vmem>>, vector<16x16x16xbf16>,
    %c0_25 = arith.constant 0 : index
    %c0_26 = arith.constant 0 : index
    %c0_27 = arith.constant 0 : index
    %22 = vector.load %arg7[%c0_25, %c0_26, %c0_27] : memref<18x18x16xbf16, #tpu.memory_space<vmem>>, vector<16x16x16xbf16>
    %23 = vector.shape_cast %22 : vector<16x16x16xbf16> to vector<256x16xbf16>
    %c0_28 = arith.constant 0 : index
    %c0_29 = arith.constant 0 : index
    %c0_30 = arith.constant 0 : index
    %c0_31 = arith.constant 0 : index
    %c0_32 = arith.constant 0 : index
    %24 = vector.load %arg5[%c0_28, %c0_29, %c0_30, %c0_31, %c0_32] : memref<1x3x3x16x32xbf16, #tpu.memory_space<vmem>>, vector<1x1x1x16x32xbf16>
    %25 = vector.shape_cast %24 : vector<1x1x1x16x32xbf16> to vector<16x32xbf16>
    %cst_33 = arith.constant dense<0.000000e+00> : vector<256x32xf32>
    %26 = tpu.matmul %23, %25, %cst_33 {dimension_numbers = #tpu.dot_dimension_numbers<[1], [0], [0], [1], [0, 0, 1, 1], [], []>} : vector<256x16xbf16>, vector<16x32xbf16>, vector<256x32xf32> -> vector<256x32xf32>
    %c0_34 = arith.constant 0 : index
    %c1_35 = arith.constant 1 : index
    %c0_36 = arith.constant 0 : index
    %27 = vector.load %arg7[%c0_34, %c1_35, %c0_36] : memref<18x18x16xbf16, #tpu.memory_space<vmem>>, vector<16x16x16xbf16>
    %28 = vector.shape_cast %27 : vector<16x16x16xbf16> to vector<256x16xbf16>
    %c0_37 = arith.constant 0 : index
    %c0_38 = arith.constant 0 : index
    %c1_39 = arith.constant 1 : index
    %c0_40 = arith.constant 0 : index
    %c0_41 = arith.constant 0 : index
    %29 = vector.load %arg5[%c0_37, %c0_38, %c1_39, %c0_40, %c0_41] : memref<1x3x3x16x32xbf16, #tpu.memory_space<vmem>>, vector<1x1x1x16x32xbf16>
    %30 = vector.shape_cast %29 : vector<1x1x1x16x32xbf16> to vector<16x32xbf16>
    %cst_42 = arith.constant dense<0.000000e+00> : vector<256x32xf32>
    %31 = tpu.matmul %28, %30, %cst_42 {dimension_numbers = #tpu.dot_dimension_numbers<[1], [0], [0], [1], [0, 0, 1, 1], [], []>} : vector<256x16xbf16>, vector<16x32xbf16>, vector<256x32xf32> -> vector<256x32xf32>
    %32 = arith.addf %26, %31 : vector<256x32xf32>
    %c0_43 = arith.constant 0 : index
    %c2 = arith.constant 2 : index
    %c0_44 = arith.constant 0 : index
    %33 = vector.load %arg7[%c0_43, %c2, %c0_44] : memref<18x18x16xbf16, #tpu.memory_space<vmem>>, vector<16x16x16xbf16>
    %34 = vector.shape_cast %33 : vector<16x16x16xbf16> to vector<256x16xbf16>
    %c0_45 = arith.constant 0 : index
    %c0_46 = arith.constant 0 : index
    %c2_47 = arith.constant 2 : index
    %c0_48 = arith.constant 0 : index
    %c0_49 = arith.constant 0 : index
    %35 = vector.load %arg5[%c0_45, %c0_46, %c2_47, %c0_48, %c0_49] : memref<1x3x3x16x32xbf16, #tpu.memory_space<vmem>>, vector<1x1x1x16x32xbf16>
    %36 = vector.shape_cast %35 : vector<1x1x1x16x32xbf16> to vector<16x32xbf16>
    %cst_50 = arith.constant dense<0.000000e+00> : vector<256x32xf32>
    %37 = tpu.matmul %34, %36, %cst_50 {dimension_numbers = #tpu.dot_dimension_numbers<[1], [0], [0], [1], [0, 0, 1, 1], [], []>} : vector<256x16xbf16>, vector<16x32xbf16>, vector<256x32xf32> -> vector<256x32xf32>
    %38 = arith.addf %32, %37 : vector<256x32xf32>
    %c1_51 = arith.constant 1 : index
    %c0_52 = arith.constant 0 : index
    %c0_53 = arith.constant 0 : index
    %39 = vector.load %arg7[%c1_51, %c0_52, %c0_53] : memref<18x18x16xbf16, #tpu.memory_space<vmem>>, vector<16x16x16xbf16>
    %40 = vector.shape_cast %39 : vector<16x16x16xbf16> to vector<256x16xbf16>
    %c0_54 = arith.constant 0 : index
    %c1_55 = arith.constant 1 : index
    %c0_56 = arith.constant 0 : index
    %c0_57 = arith.constant 0 : index
    %c0_58 = arith.constant 0 : index
    %41 = vector.load %arg5[%c0_54, %c1_55, %c0_56, %c0_57, %c0_58] : memref<1x3x3x16x32xbf16, #tpu.memory_space<vmem>>, vector<1x1x1x16x32xbf16>
    %42 = vector.shape_cast %41 : vector<1x1x1x16x32xbf16> to vector<16x32xbf16>
    %cst_59 = arith.constant dense<0.000000e+00> : vector<256x32xf32>
    %43 = tpu.matmul %40, %42, %cst_59 {dimension_numbers = #tpu.dot_dimension_numbers<[1], [0], [0], [1], [0, 0, 1, 1], [], []>} : vector<256x16xbf16>, vector<16x32xbf16>, vector<256x32xf32> -> vector<256x32xf32>
    %44 = arith.addf %38, %43 : vector<256x32xf32>
    %c1_60 = arith.constant 1 : index
    %c1_61 = arith.constant 1 : index
    %c0_62 = arith.constant 0 : index
    %45 = vector.load %arg7[%c1_60, %c1_61, %c0_62] : memref<18x18x16xbf16, #tpu.memory_space<vmem>>, vector<16x16x16xbf16>
    %46 = vector.shape_cast %45 : vector<16x16x16xbf16> to vector<256x16xbf16>
    %c0_63 = arith.constant 0 : index
    %c1_64 = arith.constant 1 : index
    %c1_65 = arith.constant 1 : index
    %c0_66 = arith.constant 0 : index
    %c0_67 = arith.constant 0 : index
    %47 = vector.load %arg5[%c0_63, %c1_64, %c1_65, %c0_66, %c0_67] : memref<1x3x3x16x32xbf16, #tpu.memory_space<vmem>>, vector<1x1x1x16x32xbf16>
    %48 = vector.shape_cast %47 : vector<1x1x1x16x32xbf16> to vector<16x32xbf16>
    %cst_68 = arith.constant dense<0.000000e+00> : vector<256x32xf32>
    %49 = tpu.matmul %46, %48, %cst_68 {dimension_numbers = #tpu.dot_dimension_numbers<[1], [0], [0], [1], [0, 0, 1, 1], [], []>} : vector<256x16xbf16>, vector<16x32xbf16>, vector<256x32xf32> -> vector<256x32xf32>
    %50 = arith.addf %44, %49 : vector<256x32xf32>
    %c1_69 = arith.constant 1 : index
    %c2_70 = arith.constant 2 : index
    %c0_71 = arith.constant 0 : index
    %51 = vector.load %arg7[%c1_69, %c2_70, %c0_71] : memref<18x18x16xbf16, #tpu.memory_space<vmem>>, vector<16x16x16xbf16>
    %52 = vector.shape_cast %51 : vector<16x16x16xbf16> to vector<256x16xbf16>
    %c0_72 = arith.constant 0 : index
    %c1_73 = arith.constant 1 : index
    %c2_74 = arith.constant 2 : index
    %c0_75 = arith.constant 0 : index
    %c0_76 = arith.constant 0 : index
    %53 = vector.load %arg5[%c0_72, %c1_73, %c2_74, %c0_75, %c0_76] : memref<1x3x3x16x32xbf16, #tpu.memory_space<vmem>>, vector<1x1x1x16x32xbf16>
    %54 = vector.shape_cast %53 : vector<1x1x1x16x32xbf16> to vector<16x32xbf16>
    %cst_77 = arith.constant dense<0.000000e+00> : vector<256x32xf32>
    %55 = tpu.matmul %52, %54, %cst_77 {dimension_numbers = #tpu.dot_dimension_numbers<[1], [0], [0], [1], [0, 0, 1, 1], [], []>} : vector<256x16xbf16>, vector<16x32xbf16>, vector<256x32xf32> -> vector<256x32xf32>
    %56 = arith.addf %50, %55 : vector<256x32xf32>
    %c2_78 = arith.constant 2 : index
    %c0_79 = arith.constant 0 : index
    %c0_80 = arith.constant 0 : index
    %57 = vector.load %arg7[%c2_78, %c0_79, %c0_80] : memref<18x18x16xbf16, #tpu.memory_space<vmem>>, vector<16x16x16xbf16>
    %58 = vector.shape_cast %57 : vector<16x16x16xbf16> to vector<256x16xbf16>
    %c0_81 = arith.constant 0 : index
    %c2_82 = arith.constant 2 : index
    %c0_83 = arith.constant 0 : index
    %c0_84 = arith.constant 0 : index
    %c0_85 = arith.constant 0 : index
    %59 = vector.load %arg5[%c0_81, %c2_82, %c0_83, %c0_84, %c0_85] : memref<1x3x3x16x32xbf16, #tpu.memory_space<vmem>>, vector<1x1x1x16x32xbf16>
    %60 = vector.shape_cast %59 : vector<1x1x1x16x32xbf16> to vector<16x32xbf16>
    %cst_86 = arith.constant dense<0.000000e+00> : vector<256x32xf32>
    %61 = tpu.matmul %58, %60, %cst_86 {dimension_numbers = #tpu.dot_dimension_numbers<[1], [0], [0], [1], [0, 0, 1, 1], [], []>} : vector<256x16xbf16>, vector<16x32xbf16>, vector<256x32xf32> -> vector<256x32xf32>
    %62 = arith.addf %56, %61 : vector<256x32xf32>
    %c2_87 = arith.constant 2 : index
    %c1_88 = arith.constant 1 : index
    %c0_89 = arith.constant 0 : index
    %63 = vector.load %arg7[%c2_87, %c1_88, %c0_89] : memref<18x18x16xbf16, #tpu.memory_space<vmem>>, vector<16x16x16xbf16>
    %64 = vector.shape_cast %63 : vector<16x16x16xbf16> to vector<256x16xbf16>
    %c0_90 = arith.constant 0 : index
    %c2_91 = arith.constant 2 : index
    %c1_92 = arith.constant 1 : index
    %c0_93 = arith.constant 0 : index
    %c0_94 = arith.constant 0 : index
    %65 = vector.load %arg5[%c0_90, %c2_91, %c1_92, %c0_93, %c0_94] : memref<1x3x3x16x32xbf16, #tpu.memory_space<vmem>>, vector<1x1x1x16x32xbf16>
    %66 = vector.shape_cast %65 : vector<1x1x1x16x32xbf16> to vector<16x32xbf16>
    %cst_95 = arith.constant dense<0.000000e+00> : vector<256x32xf32>
    %67 = tpu.matmul %64, %66, %cst_95 {dimension_numbers = #tpu.dot_dimension_numbers<[1], [0], [0], [1], [0, 0, 1, 1], [], []>} : vector<256x16xbf16>, vector<16x32xbf16>, vector<256x32xf32> -> vector<256x32xf32>
    %68 = arith.addf %62, %67 : vector<256x32xf32>
    %c2_96 = arith.constant 2 : index
    %c2_97 = arith.constant 2 : index
    %c0_98 = arith.constant 0 : index
    %69 = vector.load %arg7[%c2_96, %c2_97, %c0_98] : memref<18x18x16xbf16, #tpu.memory_space<vmem>>, vector<16x16x16xbf16>
    %70 = vector.shape_cast %69 : vector<16x16x16xbf16> to vector<256x16xbf16>
    %c0_99 = arith.constant 0 : index
    %c2_100 = arith.constant 2 : index
    %c2_101 = arith.constant 2 : index
    %c0_102 = arith.constant 0 : index
    %c0_103 = arith.constant 0 : index
    %71 = vector.load %arg5[%c0_99, %c2_100, %c2_101, %c0_102, %c0_103] : memref<1x3x3x16x32xbf16, #tpu.memory_space<vmem>>, vector<1x1x1x16x32xbf16>
    %72 = vector.shape_cast %71 : vector<1x1x1x16x32xbf16> to vector<16x32xbf16>
    %cst_104 = arith.constant dense<0.000000e+00> : vector<256x32xf32>
    %73 = tpu.matmul %70, %72, %cst_104 {dimension_numbers = #tpu.dot_dimension_numbers<[1], [0], [0], [1], [0, 0, 1, 1], [], []>} : vector<256x16xbf16>, vector<16x32xbf16>, vector<256x32xf32> -> vector<256x32xf32>
    %74 = arith.addf %68, %73 : vector<256x32xf32>
    %c0_105 = arith.constant 0 : index
    %c0_106 = arith.constant 0 : index
    %c0_107 = arith.constant 0 : index
    %c0_108 = arith.constant 0 : index
    %75 = vector.load %arg6[%c0_105, %c0_106, %c0_107, %c0_108] : memref<1x1x256x32xf32, #tpu.memory_space<vmem>>, vector<1x1x256x32xf32>
    %76 = vector.shape_cast %75 : vector<1x1x256x32xf32> to vector<256x32xf32>
    %77 = vector.shape_cast %74 : vector<256x32xf32> to vector<1x1x256x32xf32>
    tpu.vector_store %arg6[%c0_105, %c0_106, %c0_107, %c0_108], %77 {strides = array<i32>} : memref<1x1x256x32xf32, #tpu.memory_space<vmem>>, vector<1x1x256x32xf32>,
    return
  }
  func.func @transform_0(%arg0: i32, %arg1: i32) -> (i32, i32, i32, i32, i32) {
    %c0_i32 = arith.constant 0 : i32
    %c0_i32_0 = arith.constant 0 : i32
    %c0_i32_1 = arith.constant 0 : i32
    %c0_i32_2 = arith.constant 0 : i32
    return %arg0, %arg1, %c0_i32, %c0_i32_0, %c0_i32_1 : i32, i32, i32, i32, i32
  }
  func.func @transform_1(%arg0: i32, %arg1: i32) -> (i32, i32, i32) {
    %c0_i32 = arith.constant 0 : i32
    %c0_i32_0 = arith.constant 0 : i32
    %c0_i32_1 = arith.constant 0 : i32
    return %arg0, %c0_i32, %c0_i32_0 : i32, i32, i32
  }
  func.func @transform_2(%arg0: i32, %arg1: i32) -> (i32, i32, i32) {
    %c0_i32 = arith.constant 0 : i32
    %c0_i32_0 = arith.constant 0 : i32
    %c0_i32_1 = arith.constant 0 : i32
    return %arg0, %c0_i32, %c0_i32_0 : i32, i32, i32
  }
  func.func @transform_3(%arg0: i32, %arg1: i32) -> (i32, i32, i32, i32, i32) {
    %c0_i32 = arith.constant 0 : i32
    %c0_i32_0 = arith.constant 0 : i32
    %c0_i32_1 = arith.constant 0 : i32
    %c0_i32_2 = arith.constant 0 : i32
    %c0_i32_3 = arith.constant 0 : i32
    return %arg0, %c0_i32, %c0_i32_0, %c0_i32_1, %c0_i32_2 : i32, i32, i32, i32, i32
  }
  func.func @transform_4(%arg0: i32, %arg1: i32) -> (i32, i32, i32, i32) {
    %c0_i32 = arith.constant 0 : i32
    %c0_i32_0 = arith.constant 0 : i32
    %c0_i32_1 = arith.constant 0 : i32
    return %arg0, %arg1, %c0_i32, %c0_i32_0 : i32, i32, i32, i32
  }
}

</mosaic_0001>

<bundles_post_ra>
// kernel: tpu_custom_call.1
= control target key start
LH: loop header
LB: loop body
LE: loop exit
PB: predicated region body
PF: predicated region fallthrough
CT: control target
= control target key end

     0   :  { %9 = vsyncpa [#allocation4], 0  ;;  %s7573_s0 = inlined_call_operand.hbm [shape: f32[1,2,16,16,16], index: 0, kind: input, shape index: {}]   ;;  %s7574_s1 = inlined_call_operand.hbm [shape: f32[1,1,16], index: 1, kind: input, shape index: {}]   ;;  %s7575_s2 = inlined_call_operand.vmem [shape: f32[1,1,16], index: 2, kind: input, shape index: {}]   ;;  %s7576_s3 = inlined_call_operand.hbm [shape: bf16[1,3,3,16,32], index: 3, kind: input, shape index: {}]   ;;  %s7577_s4 = inlined_call_operand.vmem [shape: f32[1,2,256,32], index: 4, kind: output, shape index: {}]  }
   0x1   :  { %11 = vsyncpa [#allocation4 + $0x1], 0 }
   0x2   :  { %12 = vsyncpa [#allocation6], 0  ;;  %s5952_s15 = smov 0   ;;  %s5954_s16 = smov 0  }
   0x3   :  { %s5956_s17 = smov 0   ;;  %s5958_s18 = smov 0  }
   0x4   :  { %s5960_s19 = smov 0   ;;  %s5962_s20 = smov 0  }
   0x5 LB: > { %s5131_s21 = sadd.s32 4294967295, %s5918_s20   ;;  %s39_s22 = sadd.s32 1, %s5906_s17  ;;  %s5918_s20 = sphi %s5962_s20, %s18_s20   ;;  %s5914_s19 = sphi %s5960_s19, %s7616_s19   ;;  %s5910_s18 = sphi %s5958_s18, %s7615_s18   ;;  %s5906_s17 = sphi %s5956_s17, %s7614_s17   ;;  %s5902_s16 = sphi %s5954_s16, %s7613_s16   ;;  %s5898_s15 = sphi %s5952_s15, %s7612_s15  }
   0x6   : > { %p46_p0 = scmp.ne.s32.totalorder %s5906_s17, %s5902_s16  ;;  %p47_p1 = scmp.eq.s32.totalorder %s5918_s20, 0 }
   0x7   : > { %p52_p2 = scmp.ne.s32.totalorder %s5902_s16, %s5898_s15  ;;  %p5986_p3 = scmp.eq.s32.totalorder %s5131_s21, 0 }
   0x8   : > { %p5990_p4 = por %p47_p1, %p46_p0  ;;  %p5133_p5 = scmp.ge.s32.totalorder %s5918_s20, 1 }
   0x9   : > { %p5997_p6 = por %p5986_p3, %p52_p2  ;;  %p169_p7 = scmp.lt.s32.totalorder %s5918_s20, 3 }
   0xa   : > { %s182_s28 = sshll.u32 %s7574_s1, 4  ;;  %s5920_s30 = smov [#allocation5]   ;;  %s183_s28 = int_to_ptr.hbm [resolvable:$true] %s182_s28 }
   0xb   : > { %p6005_p8 = pnand %p5133_p5, %p169_p7  ;;  %s184_s5 = sshll.u32 %s5920_s30, 4  ;;  %s185_s5 = int_to_ptr.vmem [resolvable:$true] %s184_s5 }
   0xc   : > { %p5654_p10 = scmp.lt.s32.totalorder %s5918_s20, 2  ;;  %s202_s8 = sshll.u32 %s7576_s3, 4  ;;  %s203_s8 = int_to_ptr.hbm [resolvable:$true] %s202_s8 }
   0xd   : > { %p5641_p9 = pneg %p6005_p8  ;;  %s5921_s10 = smov [#allocation7]  }
   0xe   : > { %p6019_p12 = pnand %p5654_p10, %p5990_p4  ;;  %s204_s11 = sshll.u32 %s5921_s10, 4  ;;  %s205_s11 = int_to_ptr.vmem [resolvable:$true] %s204_s11 }
   0xf   : > { %p5642_p11 = pnand %p5641_p9, %p5986_p3  ;;  %s5922_s12 = smov 64  }
  0x10   : > { %s5923_s13 = smov 4   ;;  %s218_s14 = sand.u32 1, %s5906_s17  }
  0x11   : > { %5644 = dma.hbm_to_vmem [thread:$0]  (!%p5642_p11), %s183_s28, 16, %s185_s5, [#allocation6]  }
  0x12   : > { %5647 = dma.hbm_to_vmem [thread:$0]  (!%p5642_p11), %s203_s8, 1152, %s205_s11, [#allocation6], %s5922_s12, %s5922_s12, %s5923_s13  }
  0x13   : > { %s27_s15 = sadd.s32 1, %s5914_s19  ;;  %s5138_s21 = sshll.u32 %s218_s14, 8 }
  0x14   : > { %p28_p13 = scmp.ge.s32.totalorder %s27_s15, 2  ;;  %s5569_s24 = sshll.u32 %s5914_s19, 8 }
  0x15   : > { %s229_s28 = scalar_lea.hbm %s7573_s0, %s5569_s24  ;;  %s222_s30 = scalar_lea.vmem [#allocation3], %s5138_s21 }
  0x16   : > { %s7618_s15 = smov (%p28_p13, %s27_s15), 0  ;;  %s232_s5 = sshll.u32 %s222_s30, 4  ;;  %s233_s5 = int_to_ptr.vmem [resolvable:$true] %s232_s5 }
  0x17   : > { %s35_s6 = ssub.s32 %s5914_s19, %s7618_s15  ;;  %s230_s7 = sshll.u32 %s229_s28, 4  ;;  %s231_s7 = int_to_ptr.hbm [resolvable:$true] %s230_s7 }
  0x18   : > { %p37_p0 = scmp.eq.s32.totalorder %s35_s6, 0  ;;  %s219_s10 = scalar_lea.sflag [#allocation4], %s218_s14 }
  0x19   : > { %s5924_s11 = smov 128   ;;  %s5925_s12 = smov 8  }
  0x1a   : > { %s6036_s8 = scalar_select %p37_p0, %s5906_s17, %s39_s22  }
  0x1b   : > { %5651 = dma.hbm_to_vmem [thread:$0]  (!%p6019_p12), %s231_s7, 4096, %s233_s5, %s219_s10, %s5924_s11, %s5924_s11, %s5925_s12  }
  0x1c   : > { %244 = sbr.rel (%p6005_p8) target bundleno = 872 (0x368), region = 36 }
  0x21   : > { %s246_s13 = sand.u32 1, %s5902_s16  }
  0x22   : > { %s5142_s21 = sshll.u32 %s246_s13, 8  ;;  %s247_s24 = scalar_lea.sflag [#allocation4], %s246_s13 }
  0x23   : > { %s6043_s26 = scalar_lea.vmem [#allocation3], %s5142_s21 }
  0x24   : > { %5889 = dma.done.wait (%p5997_p6), %s247_s24, 4096  }
  0x25   : > { %5891 = vsyncadd (%p5997_p6), %s247_s24, 4294963200 }
  0x26   : > { %5893 = dma.done.wait (%p5986_p3), [#allocation6], 1168  }
  0x27   : > { %5895 = vsyncadd (%p5986_p3), [#allocation6], 4294966128  ;;  %vm477_vm0 = vcmask 122880   ;;  %vm485_vm1 = vsmask.f32 256  ;;  %vm474_vm3 = vcmask 125952  }
  0x28   : > { %vm535_vm2 = vsmask.f32 7938  ;;  %vm6055_vm4 = vmand %vm477_vm0, %vm485_vm1  ;;  %v5926_v2 = vmov 0   ;;  %v5588_v3 = vld [vmem:[#allocation7 + $0x8] sm:$0xff]  ;;  %v313_v5 = vld [vmem:[%s6043_s26 + $0x38] sm:$0xff]  ;;  %vm1515_vm12 = vcmask 130048  }
  0x29   : > { %vm6061_vm5 = vmand %vm477_vm0, %vm535_vm2  ;;  %475 = vst.msk [vmem:[#allocation2] sm:$0xf] %vm474_vm3, %v5926_v2  ;;  %v312_v4 = vld [vmem:[%s6043_s26 + $0x30] sm:$0xff]  ;;  %v6071_v6 = vld [vmem:[#allocation5] ss:$0 sm:$0xff]  ;;  %5628 = vmatpush.bf16.msra.mxu1 %v5588_v3  ;;  %5629 = vmatpush.bf16.msra.mxu2 %v5588_v3  ;;  %vm1924_vm13 = vcmask 1042432  }
  0x2a   : > { %476 = vst.msk [vmem:[#allocation2 + $0x4] sm:$0xf] %vm474_vm3, %v5926_v2  ;;  %v6076_v7 = vld [vmem:[%s7575_s2] ss:$0 sm:$0xff]  ;;  %v496_v8 = vld [vmem:[#allocation2 + $0x30] sm:$0x1]  ;;  %5630 = vmatpush.bf16.msra.mxu3 %v5588_v3  ;;  %1571 = vmatpush.bf16.msra.mxu0 %v5588_v3  ;;  %v348_v10 = vmul.f32 %v6071_v6, %v312_v4  ;;  %v349_v11 = vmul.f32 %v6071_v6, %v313_v5  ;;  %vm6120_vm10 = vmand %vm474_vm3, %vm535_vm2 }
  0x2b   : > { %v546_v9 = vld [vmem:[#allocation2 + $0x38] sm:$0x1]  ;;  %v497_v12 = vsel %vm6055_vm4, 0, %v496_v8  ;;  %v320_v14 = vld [vmem:[%s6043_s26 + $0x70] sm:$0xff]  ;;  %v321_v15 = vld [vmem:[%s6043_s26 + $0x78] sm:$0xff]  ;;  %vm1925_vm14 = vcmask 1046532  }
  0x2c   : > { %v547_v13 = vsel %vm6061_vm5, 0, %v546_v9  ;;  %v508_v16 = vld [vmem:[#allocation2 + $0x60] sm:$0x1]  ;;  %498 = vst [vmem:[#allocation2 + $0x30] sm:$0x1] %v497_v12  ;;  %v356_v17 = vmul.f32 %v6071_v6, %v320_v14  ;;  %v357_v18 = vmul.f32 %v6071_v6, %v321_v15  ;;  %v328_v21 = vld [vmem:[%s6043_s26 + $0xb0] sm:$0xff]  ;;  %v384_v22 = vadd.f32 %v6076_v7, %v348_v10  ;;  %vm6504_vm15 = vmor %vm1924_vm13, %vm1925_vm14 }
  0x2d   : > { %v509_v19 = vsel %vm6055_vm4, 0, %v508_v16  ;;  %v558_v20 = vld [vmem:[#allocation2 + $0x68] sm:$0x1]  ;;  %v385_v23 = vadd.f32 %v6076_v7, %v349_v11  ;;  %548 = vst [vmem:[#allocation2 + $0x38] sm:$0x1] %v547_v13  ;;  %v329_v25 = vld [vmem:[%s6043_s26 + $0xb8] sm:$0xff]  ;;  %v364_v26 = vmul.f32 %v6071_v6, %v328_v21 }
  0x2e   : > { %v559_v24 = vsel %vm6061_vm5, 0, %v558_v20  ;;  %v520_v27 = vld [vmem:[#allocation2 + $0x90] sm:$0x1]  ;;  %vm585_vm6 = vsmask.f32 4368  ;;  %v392_v28 = vadd.f32 %v6076_v7, %v356_v17  ;;  %v393_v29 = vadd.f32 %v6076_v7, %v357_v18  ;;  %p298_p1 = scmp.lt.s32.totalorder %s5910_s18, 1 }
  0x2f   : > { %510 = vst [vmem:[#allocation2 + $0x60] sm:$0x1] %v509_v19  ;;  %v365_v30 = vmul.f32 %v6071_v6, %v329_v25  ;;  %v570_v31 = vld [vmem:[#allocation2 + $0x98] sm:$0x1]  ;;  %v416_v32 = vmax.f32 %v384_v22, 0.0  ;;  %v417_v33 = vmax.f32 %v385_v23, 0.0  ;;  %v400_v34 = vadd.f32 %v6076_v7, %v364_v26  ;;  %vm6110_vm7 = vmor %vm485_vm1, %vm585_vm6 }
  0x30   : > { %560 = vst [vmem:[#allocation2 + $0x68] sm:$0x1] %v559_v24  ;;  %v521_v35 = vsel %vm6055_vm4, 0, %v520_v27  ;;  %v424_v36 = vmax.f32 %v392_v28, 0.0  ;;  %v425_v37 = vmax.f32 %v393_v29, 0.0  ;;  %v571_v39 = vsel %vm6061_vm5, 0, %v570_v31 }
  0x31   : > { %v401_v38 = vadd.f32 %v6076_v7, %v365_v30  ;;  %522 = vst [vmem:[#allocation2 + $0x90] sm:$0x1] %v521_v35  ;;  %v448_v40 = vpack.c.bf16 %v416_v32, %v416_v32  ;;  %v449_v41 = vpack.c.bf16 %v417_v33, %v417_v33  ;;  %v432_v42 = vmax.f32 %v400_v34, 0.0  ;;  %v1021_v43 = vld [vmem:[#allocation2] sm:$0xf]  ;;  %v314_v25 = vld [vmem:[%s6043_s26 + $0x40] sm:$0xff] }
  0x32   : > { %572 = vst [vmem:[#allocation2 + $0x98] sm:$0x1] %v571_v39  ;;  %v456_v44 = vpack.c.bf16 %v424_v36, %v424_v36  ;;  %v457_v45 = vpack.c.bf16 %v425_v37, %v425_v37  ;;  %v1075_v47 = vshrl.u32 %v1021_v43, 16  ;;  %vm1071_vm8 = vsmask.f32 3328  ;;  %v315_v26 = vld [vmem:[%s6043_s26 + $0x48] sm:$0xff] }
  0x33   : > { %v433_v46 = vmax.f32 %v401_v38, 0.0  ;;  %478 = vst.msk [vmem:[#allocation2 + $0x8] sm:$0x1] %vm477_vm0, %v5926_v2  ;;  %v639_v48 = vshrl.u32 %v448_v40, 16  ;;  %v642_v49 = vshll.u32 %v448_v40, 16  ;;  %v647_v50 = vshrl.u32 %v449_v41, 16 }
  0x34   : > { %v650_v51 = vshll.u32 %v449_v41, 16  ;;  %v707_v52 = vshrl.u32 %v456_v44, 16  ;;  %v710_v53 = vshll.u32 %v456_v44, 16  ;;  %v715_v54 = vshrl.u32 %v457_v45, 16  ;;  %v930_v59 = vld [vmem:[#allocation2 + $0x30] sm:$0xf] }
  0x35   : > { %v718_v55 = vshll.u32 %v457_v45, 16  ;;  %v641_v57 = vrot.slane %v639_v48, 7  ;;  %v649_v58 = vrot.slane %v647_v50, 7  ;;  %vm1072_vm9 = vsmask.f32 7440  ;;  %v5589_v30 = vld [vmem:[#allocation7 + $0x10] sm:$0xff] }
  0x36   : > { %v464_v60 = vpack.c.bf16 %v432_v42, %v432_v42  ;;  %v6114_v61 = vpack.c.bf16 %v433_v46, %v433_v46  ;;  %480 = vst.msk [vmem:[#allocation2 + $0xcc] sm:$0xf] %vm474_vm3, %v5926_v2  ;;  %v934_v63 = vld [vmem:[#allocation2 + $0x38] sm:$0x1]  ;;  %v709_v3 = vrot.slane %v707_v52, 7  ;;  %v717_v4 = vrot.slane %v715_v54, 7  ;;  %2151 = vmatpush.bf16.msrb.mxu2 %v5589_v30  ;;  %vm6152_vm11 = vmor %vm1071_vm8, %vm1072_vm9 }
  0x37   : > { %v1077_v5 = vrot.slane %v1075_v47, 4  ;;  %v1078_v8 = vshll.u32 %v1021_v43, 16  ;;  %v644_v9 = vor.u32 %v642_v49, %v641_v57  ;;  %v645_v10 = vrot.slane %v641_v57, 4  ;;  %v958_v13 = vld [vmem:[#allocation2 + $0x60] sm:$0xf]  ;;  %v5606_v31 = vld [vmem:[#allocation7 + $0x18] sm:$0xff] }
  0x38   : > { %v652_v11 = vor.u32 %v650_v51, %v649_v58  ;;  %v654_v12 = vrot.slane %v649_v58, 4  ;;  %481 = vst.msk [vmem:[#allocation2 + $0xd0] sm:$0xf] %vm474_vm3, %v5926_v2  ;;  %v712_v14 = vor.u32 %v710_v53, %v709_v3  ;;  %v713_v15 = vrot.slane %v709_v3, 4  ;;  %v1022_v18 = vld [vmem:[#allocation2 + $0x4] sm:$0xf]  ;;  %2441 = vmatpush.bf16.msrb.mxu3 %v5606_v31 }
  0x39   : > { %v720_v16 = vor.u32 %v718_v55, %v717_v4  ;;  %v722_v17 = vrot.slane %v717_v4, 4  ;;  %482 = vst.msk [vmem:[#allocation2 + $0xd4] sm:$0x1] %vm477_vm0, %v5926_v2  ;;  %v931_v20 = vsel %vm6120_vm10, %v644_v9, %v930_v59  ;;  %v962_v22 = vld [vmem:[#allocation2 + $0x68] sm:$0x1]  ;;  %v775_v23 = vshrl.u32 %v464_v60, 16 }
  0x3a   : > { %v653_v19 = vsel %vm6110_vm7, %v645_v10, %v652_v11  ;;  %v935_v21 = vsel %vm6055_vm4, %v654_v12, %v934_v63  ;;  %v1055_v24 = vld [vmem:[#allocation2 + $0x8] sm:$0x1]  ;;  %932 = vst [vmem:[#allocation2 + $0x30] sm:$0xf] %v931_v20  ;;  %v959_v2 = vsel %vm6120_vm10, %v712_v14, %v958_v13  ;;  %v778_v28 = vshll.u32 %v464_v60, 16  ;;  %v5587_v32 = vld [vmem:[#allocation7] sm:$0xff] }
  0x3b   : > { %v721_v27 = vsel %vm6110_vm7, %v713_v15, %v720_v16  ;;  %v986_v29 = vld [vmem:[#allocation2 + $0x90] sm:$0xf]  ;;  %933 = vst.msk [vmem:[#allocation2 + $0x34] sm:$0xf] %vm474_vm3, %v653_v19  ;;  %v777_v33 = vrot.slane %v775_v23, 7  ;;  %v783_v34 = vshrl.u32 %v6114_v61, 16  ;;  %v963_v38 = vsel %vm6055_vm4, %v722_v17, %v962_v22  ;;  %1794 = vmatpush.bf16.msrb.mxu1 %v5587_v32 }
  0x3c   : > { %v786_v35 = vshll.u32 %v6114_v61, 16  ;;  %v1080_v36 = vrot.slane %v1078_v8, 5  ;;  %v499_v37 = vld [vmem:[#allocation2 + $0x3c] sm:$0x1]  ;;  %936 = vst [vmem:[#allocation2 + $0x38] sm:$0x1] %v935_v21  ;;  %v350_v50 = vmul.f32 %v6071_v6, %v314_v25  ;;  %v351_v51 = vmul.f32 %v6071_v6, %v315_v26 }
  0x3d   : > { %v1084_v39 = vshll.u32 %v1022_v18, 16  ;;  %v1088_v40 = vshrl.u32 %v1022_v18, 16  ;;  %v1094_v41 = vshll.u32 %v1055_v24, 16  ;;  %960 = vst [vmem:[#allocation2 + $0x60] sm:$0xf] %v959_v2  ;;  %v780_v42 = vor.u32 %v778_v28, %v777_v33  ;;  %v5607_v46 = vld [vmem:[#allocation7 + $0x20] sm:$0xff] }
  0x3e   : > { %v781_v43 = vrot.slane %v777_v33, 4  ;;  %v785_v44 = vrot.slane %v783_v34, 7  ;;  %v1081_v45 = vor.u32 %v1080_v36, %v1077_v5  ;;  %961 = vst.msk [vmem:[#allocation2 + $0x64] sm:$0xf] %vm474_vm3, %v721_v27  ;;  %v990_v47 = vld [vmem:[#allocation2 + $0x98] sm:$0x1]  ;;  %3099 = vmatpush.bf16.msrb.mxu0 %v5607_v46  ;;  %v6172_v14 = vadd.f32 %v6076_v7, %v350_v50 }
  0x3f   : > { %v1086_v48 = vrot.slane %v1084_v39, 5  ;;  %v1090_v49 = vrot.slane %v1088_v40, 4  ;;  %964 = vst [vmem:[#allocation2 + $0x68] sm:$0x1] %v963_v38  ;;  %v987_v54 = vsel %vm6120_vm10, %v780_v42, %v986_v29  ;;  %v549_v57 = vld [vmem:[#allocation2 + $0x44] sm:$0x1]  ;;  %v6175_v15 = vadd.f32 %v6076_v7, %v351_v51 }
  0x40   : > { %v788_v52 = vor.u32 %v786_v35, %v785_v44  ;;  %v790_v53 = vrot.slane %v785_v44, 4  ;;  %v1082_v55 = vrot.slane %v1081_v45, 4  ;;  %988 = vst [vmem:[#allocation2 + $0x90] sm:$0xf] %v987_v54  ;;  %v6156_v60 = vrot.slane %v1094_v41, 5  ;;  %v322_v63 = vld [vmem:[%s6043_s26 + $0x80] sm:$0xff] }
  0x41   : > { %v1091_v59 = vor.u32 %v1090_v49, %v1086_v48  ;;  %v500_v61 = vsel %vm6055_vm4, 0, %v499_v37  ;;  %v1029_v3 = vld [vmem:[#allocation2 + $0x30] sm:$0xf]  ;;  %v550_v9 = vsel %vm6061_vm5, 0, %v549_v57  ;;  %v323_v10 = vld [vmem:[%s6043_s26 + $0x88] sm:$0xff]  ;;  %v6180_v20 = vmul.f32 %v6071_v6, %v322_v63  ;;  %v330_v49 = vld [vmem:[%s6043_s26 + $0xc0] sm:$0xff] }
  0x42   : > { %v789_v4 = vsel %vm6110_vm7, %v781_v43, %v788_v52  ;;  %v991_v5 = vsel %vm6055_vm4, %v790_v53, %v990_v47  ;;  %v1087_v8 = vsel %vm6152_vm11, %v1082_v55, %v1086_v48  ;;  %501 = vst [vmem:[#allocation2 + $0x3c] sm:$0x1] %v500_v61  ;;  %v1030_v11 = vld [vmem:[#allocation2 + $0x34] sm:$0xf]  ;;  %v1171_v12 = vshrl.u32 %v1029_v3, 16  ;;  %s7620_s18 = smov (!%p298_p1, %s5910_s18), 1 }
  0x43   : > { %v1174_v13 = vshll.u32 %v1029_v3, 16  ;;  %989 = vst.msk [vmem:[#allocation2 + $0x94] sm:$0xf] %vm474_vm3, %v789_v4  ;;  %v1059_v16 = vld [vmem:[#allocation2 + $0x38] sm:$0x1]  ;;  %v1180_v17 = vshll.u32 %v1030_v11, 16  ;;  %v6177_v19 = vunpack.c.l.b16 %v1087_v8  ;;  %v359_v25 = vmul.f32 %v6071_v6, %v323_v10 }
  0x44   : > { %v1184_v18 = vshrl.u32 %v1030_v11, 16  ;;  %992 = vst [vmem:[#allocation2 + $0x98] sm:$0x1] %v991_v5  ;;  %v1173_v21 = vrot.slane %v1171_v12, 4  ;;  %v1190_v23 = vshll.u32 %v1059_v16, 16  ;;  %v1092_v43 = vrot.slane %v1091_v59, 4 }
  0x45   : > { %v1176_v22 = vrot.slane %v1174_v13, 5  ;;  %v1037_v24 = vld [vmem:[#allocation2 + $0x60] sm:$0xf]  ;;  %v1182_v26 = vrot.slane %v1180_v17, 5  ;;  %v1038_v2 = vld [vmem:[#allocation2 + $0x64] sm:$0xf]  ;;  %v6189_v5 = vmul.f32 %v6071_v6, %v330_v49 }
  0x46   : > { %v1186_v27 = vrot.slane %v1184_v18, 4  ;;  %v1267_v28 = vshrl.u32 %v1037_v24, 16  ;;  %v1270_v29 = vshll.u32 %v1037_v24, 16  ;;  %v1192_v31 = vrot.slane %v1190_v23, 5  ;;  %v1063_v32 = vld [vmem:[#allocation2 + $0x68] sm:$0x1] }
  0x47   : > { %v1177_v30 = vor.u32 %v1176_v22, %v1173_v21  ;;  %v1276_v33 = vshll.u32 %v1038_v2, 16  ;;  %v1280_v34 = vshrl.u32 %v1038_v2, 16  ;;  %v1286_v38 = vshll.u32 %v1063_v32, 16  ;;  %v1045_v39 = vld [vmem:[#allocation2 + $0x90] sm:$0xf]  ;;  %v331_v49 = vld [vmem:[%s6043_s26 + $0xc8] sm:$0xff] }
  0x48   : > { %v1187_v35 = vor.u32 %v1186_v27, %v1182_v26  ;;  %v1269_v36 = vrot.slane %v1267_v28, 4  ;;  %v1272_v37 = vrot.slane %v1270_v29, 5  ;;  %551 = vst [vmem:[#allocation2 + $0x44] sm:$0x1] %v550_v9  ;;  %v1363_v48 = vshrl.u32 %v1045_v39, 16  ;;  %s5570_s27 = sshll.u32 %s7620_s18, 8 }
  0x49   : > { %v1178_v40 = vrot.slane %v1177_v30, 4  ;;  %v1278_v41 = vrot.slane %v1276_v33, 5  ;;  %v1282_v42 = vrot.slane %v1280_v34, 4  ;;  %v1288_v46 = vrot.slane %v1286_v38, 5  ;;  %v561_v38 = vld [vmem:[#allocation2 + $0x74] sm:$0x1]  ;;  %s7275_s30 = scalar_lea.vmem %s7577_s4, %s5570_s27 }
  0x4a   : > { %v1188_v44 = vrot.slane %v1187_v35, 4  ;;  %v1273_v45 = vor.u32 %v1272_v37, %v1269_v36  ;;  %v1046_v47 = vld [vmem:[#allocation2 + $0x94] sm:$0xf]  ;;  %v1366_v53 = vshll.u32 %v1045_v39, 16  ;;  %v1365_v59 = vrot.slane %v1363_v48, 4 }
  0x4b   : > { %v1183_v50 = vsel %vm6152_vm11, %v1178_v40, %v1182_v26  ;;  %v1283_v51 = vor.u32 %v1282_v42, %v1278_v41  ;;  %v1067_v52 = vld [vmem:[#allocation2 + $0x98] sm:$0x1]  ;;  %v1372_v54 = vshll.u32 %v1046_v47, 16  ;;  %v1376_v10 = vshrl.u32 %v1046_v47, 16  ;;  %v511_v35 = vld [vmem:[#allocation2 + $0x6c] sm:$0x1] }
  0x4c   : > { %v1193_v55 = vsel %vm6152_vm11, %v1188_v44, %v1192_v31  ;;  %v1469_v57 = vunpack.c.l.b16 %v1183_v50  ;;  %v1274_v61 = vrot.slane %v1273_v45, 4  ;;  %v1368_v4 = vrot.slane %v1366_v53, 5 }
  0x4d   : > { %v1470_v63 = vunpack.c.l.b16 %v1193_v55  ;;  %v1284_v3 = vrot.slane %v1283_v51, 4  ;;  %v1374_v9 = vrot.slane %v1372_v54, 5  ;;  %v1382_v11 = vshll.u32 %v1067_v52, 16 }
  0x4e   : > { %v1279_v8 = vsel %vm6152_vm11, %v1274_v61, %v1278_v41  ;;  %v1369_v17 = vor.u32 %v1368_v4, %v1365_v59  ;;  %v1378_v21 = vrot.slane %v1376_v10, 4  ;;  %v1097_v23 = vsel %vm6152_vm11, %v1092_v43, %v6156_v60  ;;  %v937_v41 = vld [vmem:[#allocation2 + $0x3c] sm:$0xf] }
  0x4f   : > { %v1497_v12 = vpack.c.b16 %v1470_v63, %v1469_v57  ;;  %v1289_v13 = vsel %vm6152_vm11, %v1284_v3, %v1288_v46  ;;  %v1477_v16 = vunpack.c.l.b16 %v1279_v8  ;;  %v1384_v22 = vrot.slane %v1382_v11, 5  ;;  %v941_v59 = vld [vmem:[#allocation2 + $0x44] sm:$0x1] }
  0x50   : > { %v1478_v18 = vunpack.c.l.b16 %v1289_v13  ;;  %v1370_v24 = vrot.slane %v1369_v17, 4  ;;  %v1462_v26 = vunpack.c.l.b16 %v1097_v23  ;;  %v418_v27 = vmax.f32 %v6172_v14, 0.0  ;;  %v573_v13 = vld [vmem:[#allocation2 + $0xa4] sm:$0x1] }
  0x51   : > { %5155 = vmatmul.msk.bf16.vlgmr.msra.gmra.mxu1 %vm1515_vm12, %v1497_v12  ;;  %v419_v2 = vmax.f32 %v6175_v15, 0.0  ;;  %v1379_v29 = vor.u32 %v1378_v21, %v1374_v9  ;;  %v394_v30 = vadd.f32 %v6076_v7, %v6180_v20  ;;  %v395_v31 = vadd.f32 %v6076_v7, %v359_v25  ;;  %v307_v17 = vld [vmem:[%s6043_s26 + $0x8] sm:$0xff] }
  0x52   : > { %v1501_v28 = vpack.c.b16 %v1478_v18, %v1477_v16  ;;  %v1375_v32 = vsel %vm6152_vm11, %v1370_v24, %v1374_v9  ;;  %v1493_v60 = vpack.c.b16 %v1462_v26, %v6177_v19  ;;  %v450_v33 = vpack.c.bf16 %v418_v27, %v418_v27  ;;  %v523_v9 = vld [vmem:[#allocation2 + $0x9c] sm:$0x1]  ;;  %v6228_v24 = vld [vmem:[#allocation2 + $0xc] sm:$0x1] }
  0x53   : > { %v451_v34 = vpack.c.bf16 %v419_v2, %v419_v2  ;;  %v1380_v14 = vrot.slane %v1379_v29, 4  ;;  %v1485_v36 = vunpack.c.l.b16 %v1375_v32  ;;  %v426_v15 = vmax.f32 %v394_v30, 0.0  ;;  %v306_v16 = vld [vmem:[%s6043_s26] sm:$0xff]  ;;  %v316_v29 = vld [vmem:[%s6043_s26 + $0x50] sm:$0xff] }
  0x54   : > { %5159 = vmatmul.msk.bf16.vlgmr.msra.gmra.mxu2 %vm1515_vm12, %v1501_v28  ;;  %v427_v37 = vmax.f32 %v395_v31, 0.0  ;;  %5151 = vmatmul.msk.bf16.vlgmr.msra.gmra.mxu0 %vm1515_vm12, %v1493_v60  ;;  %v656_v20 = vshrl.u32 %v450_v33, 16  ;;  %v659_v25 = vshll.u32 %v450_v33, 16  ;;  %v512_v44 = vsel %vm6055_vm4, 0, %v511_v35  ;;  %v6234_v28 = vld [vmem:[#allocation2 + $0x14] sm:$0x1] }
  0x55   : > { %v664_v39 = vshrl.u32 %v451_v34, 16  ;;  %v667_v40 = vshll.u32 %v451_v34, 16  ;;  %v1385_v19 = vsel %vm6152_vm11, %v1380_v14, %v1384_v22  ;;  %v458_v42 = vpack.c.bf16 %v426_v15, %v426_v15  ;;  %513 = vst [vmem:[#allocation2 + $0x6c] sm:$0x1] %v512_v44  ;;  %v6237_v30 = vld [vmem:[#allocation2 + $0x48] sm:$0x1] }
  0x56   : > { %v459_v43 = vpack.c.bf16 %v427_v37, %v427_v37  ;;  %v1486_v45 = vunpack.c.l.b16 %v1385_v19  ;;  %v658_v46 = vrot.slane %v656_v20, 7  ;;  %v562_v48 = vsel %vm6061_vm5, 0, %v561_v38  ;;  %v317_v35 = vld [vmem:[%s6043_s26 + $0x58] sm:$0xff] }
  0x57   : > { %v666_v47 = vrot.slane %v664_v39, 7  ;;  %563 = vst [vmem:[#allocation2 + $0x74] sm:$0x1] %v562_v48  ;;  %v724_v50 = vshrl.u32 %v458_v42, 16  ;;  %v727_v51 = vshll.u32 %v458_v42, 16  ;;  %v367_v8 = vmul.f32 %v6071_v6, %v331_v49 }
  0x58   : > { %v732_v52 = vshrl.u32 %v459_v43, 16  ;;  %v735_v53 = vshll.u32 %v459_v43, 16  ;;  %v1505_v54 = vpack.c.b16 %v1486_v45, %v1485_v36  ;;  %v661_v55 = vor.u32 %v659_v25, %v658_v46 }
  0x59   : > { %v662_v57 = vrot.slane %v658_v46, 4  ;;  %v669_v61 = vor.u32 %v667_v40, %v666_v47  ;;  %v671_v63 = vrot.slane %v666_v47, 4  ;;  %v726_v3 = vrot.slane %v724_v50, 7 }
  0x5a   : > { %v734_v4 = vrot.slane %v732_v52, 7  ;;  %5163 = vmatmul.msk.bf16.vlgmr.msra.gmra.mxu3 %vm1515_vm12, %v1505_v54  ;;  %v938_v11 = vsel %vm6120_vm10, %v661_v55, %v937_v41  ;;  %v402_v12 = vadd.f32 %v6076_v7, %v6189_v5  ;;  %v403_v27 = vadd.f32 %v6076_v7, %v367_v8 }
  0x5b   : > { %v670_v10 = vsel %vm6110_vm7, %v662_v57, %v669_v61  ;;  %939 = vst [vmem:[#allocation2 + $0x3c] sm:$0xf] %v938_v11  ;;  %v942_v18 = vsel %vm6055_vm4, %v671_v63, %v941_v59  ;;  %v729_v21 = vor.u32 %v727_v51, %v726_v3  ;;  %v730_v22 = vrot.slane %v726_v3, 4 }
  0x5c   : > { %v737_v23 = vor.u32 %v735_v53, %v734_v4  ;;  %940 = vst.msk [vmem:[#allocation2 + $0x40] sm:$0xf] %vm474_vm3, %v670_v10  ;;  %v739_v26 = vrot.slane %v734_v4, 4  ;;  %v434_v5 = vmax.f32 %v402_v12, 0.0  ;;  %v524_v2 = vsel %vm6055_vm4, 0, %v523_v9 }
  0x5d   : > { %943 = vst [vmem:[#allocation2 + $0x44] sm:$0x1] %v942_v18  ;;  %v965_v32 = vld [vmem:[#allocation2 + $0x6c] sm:$0xf]  ;;  %v574_v60 = vsel %vm6061_vm5, 0, %v573_v13  ;;  %v342_v33 = vmul.f32 %v6071_v6, %v306_v16  ;;  %v343_v34 = vmul.f32 %v6071_v6, %v307_v17  ;;  %v435_v15 = vmax.f32 %v403_v27, 0.0 }
  0x5e   : > { %v738_v31 = vsel %vm6110_vm7, %v730_v22, %v737_v23  ;;  %v966_v14 = vsel %vm6120_vm10, %v729_v21, %v965_v32  ;;  %v969_v36 = vld [vmem:[#allocation2 + $0x74] sm:$0x1]  ;;  %v466_v37 = vpack.c.bf16 %v434_v5, %v434_v5  ;;  %v488_v38 = vsel %vm6055_vm4, 0, %v6228_v24  ;;  %525 = vst [vmem:[#allocation2 + $0x9c] sm:$0x1] %v524_v2 }
  0x5f   : > { %968 = vst.msk [vmem:[#allocation2 + $0x70] sm:$0xf] %vm474_vm3, %v738_v31  ;;  %v970_v20 = vsel %vm6055_vm4, %v739_v26, %v969_v36  ;;  %v378_v25 = vadd.f32 %v6076_v7, %v342_v33  ;;  %v6256_v39 = vadd.f32 %v6076_v7, %v343_v34  ;;  %v352_v40 = vmul.f32 %v6071_v6, %v316_v29 }
  0x60   : > { %967 = vst [vmem:[#allocation2 + $0x6c] sm:$0xf] %v966_v14  ;;  %v467_v19 = vpack.c.bf16 %v435_v15, %v435_v15  ;;  %v792_v41 = vshrl.u32 %v466_v37, 16  ;;  %v795_v42 = vshll.u32 %v466_v37, 16  ;;  %v353_v43 = vmul.f32 %v6071_v6, %v317_v35 }
  0x61   : > { %971 = vst [vmem:[#allocation2 + $0x74] sm:$0x1] %v970_v20  ;;  %v410_v44 = vmax.f32 %v378_v25, 0.0  ;;  %v411_v45 = vmax.f32 %v6256_v39, 0.0  ;;  %v538_v46 = vsel %vm6061_vm5, 0, %v6234_v28  ;;  %v503_v47 = vsel %vm6055_vm4, 0, %v6237_v30 }
  0x62   : > { %v1031_v48 = vld [vmem:[#allocation2 + $0x3c] sm:$0xf]  ;;  %575 = vst [vmem:[#allocation2 + $0xa4] sm:$0x1] %v574_v60  ;;  %v794_v49 = vrot.slane %v792_v41, 7  ;;  %v800_v50 = vshrl.u32 %v467_v19, 16  ;;  %v6268_v51 = vadd.f32 %v6076_v7, %v352_v40  ;;  %v6271_v57 = vadd.f32 %v6076_v7, %v353_v43 }
  0x63   : > { %v1032_v52 = vld [vmem:[#allocation2 + $0x40] sm:$0xf]  ;;  %v1195_v53 = vshrl.u32 %v1031_v48, 16  ;;  %v1198_v54 = vshll.u32 %v1031_v48, 16  ;;  %v803_v55 = vshll.u32 %v467_v19, 16  ;;  %v442_v34 = vpack.c.bf16 %v410_v44, %v410_v44 }
  0x64   : > { %v1060_v61 = vld [vmem:[#allocation2 + $0x44] sm:$0x1]  ;;  %v1204_v59 = vshll.u32 %v1032_v52, 16  ;;  %v1208_v63 = vshrl.u32 %v1032_v52, 16  ;;  %v797_v3 = vor.u32 %v795_v42, %v794_v49  ;;  %v798_v4 = vrot.slane %v794_v49, 4 }
  0x65   : > { %v1197_v8 = vrot.slane %v1195_v53, 4  ;;  %v1200_v9 = vrot.slane %v1198_v54, 5  ;;  %v1214_v10 = vshll.u32 %v1060_v61, 16  ;;  %v802_v12 = vrot.slane %v800_v50, 7  ;;  %v993_v31 = vld [vmem:[#allocation2 + $0x9c] sm:$0xf] }
  0x66   : > { %v1040_v11 = vld [vmem:[#allocation2 + $0x70] sm:$0xf]  ;;  %v1206_v13 = vrot.slane %v1204_v59, 5  ;;  %v1210_v16 = vrot.slane %v1208_v63, 4  ;;  %489 = vst [vmem:[#allocation2 + $0xc] sm:$0x1] %v488_v38  ;;  %v994_v19 = vsel %vm6120_vm10, %v797_v3, %v993_v31 }
  0x67   : > { %v1039_v17 = vld [vmem:[#allocation2 + $0x6c] sm:$0xf]  ;;  %v1300_v18 = vshll.u32 %v1040_v11, 16  ;;  %v1304_v21 = vshrl.u32 %v1040_v11, 16  ;;  %v1201_v22 = vor.u32 %v1200_v9, %v1197_v8  ;;  %v1216_v23 = vrot.slane %v1214_v10, 5 }
  0x68   : > { %v1064_v24 = vld [vmem:[#allocation2 + $0x74] sm:$0x1]  ;;  %v1291_v26 = vshrl.u32 %v1039_v17, 16  ;;  %v1294_v27 = vshll.u32 %v1039_v17, 16  ;;  %v1211_v5 = vor.u32 %v1210_v16, %v1206_v13  ;;  %v805_v15 = vor.u32 %v803_v55, %v802_v12  ;;  %539 = vst [vmem:[#allocation2 + $0x14] sm:$0x1] %v538_v46 }
  0x69   : > { %v1302_v2 = vrot.slane %v1300_v18, 5  ;;  %v1306_v28 = vrot.slane %v1304_v21, 4  ;;  %v1310_v29 = vshll.u32 %v1064_v24, 16  ;;  %v1202_v32 = vrot.slane %v1201_v22, 4  ;;  %v997_v37 = vld [vmem:[#allocation2 + $0xa4] sm:$0x1] }
  0x6a   : > { %v1293_v60 = vrot.slane %v1291_v26, 4  ;;  %v1296_v33 = vrot.slane %v1294_v27, 5  ;;  %v1212_v35 = vrot.slane %v1211_v5, 4  ;;  %v807_v40 = vrot.slane %v802_v12, 4  ;;  %995 = vst [vmem:[#allocation2 + $0x9c] sm:$0xf] %v994_v19 }
  0x6b   : > { %v1307_v14 = vor.u32 %v1306_v28, %v1302_v2  ;;  %v1312_v36 = vrot.slane %v1310_v29, 5  ;;  %v1207_v20 = vsel %vm6152_vm11, %v1202_v32, %v1206_v13  ;;  %v806_v44 = vsel %vm6110_vm7, %v798_v4, %v805_v15  ;;  %v552_v50 = vld [vmem:[#allocation2 + $0x50] sm:$0x1]  ;;  %v324_v61 = vld [vmem:[%s6043_s26 + $0x90] sm:$0xff]  ;;  %504 = vst [vmem:[#allocation2 + $0x48] sm:$0x1] %v503_v47 }
  0x6c   : > { %v1297_v25 = vor.u32 %v1296_v33, %v1293_v60  ;;  %v1217_v41 = vsel %vm6152_vm11, %v1212_v35, %v1216_v23  ;;  %v1471_v42 = vunpack.c.l.b16 %v1207_v20  ;;  %996 = vst.msk [vmem:[#allocation2 + $0xa0] sm:$0xf] %vm474_vm3, %v806_v44  ;;  %v998_v49 = vsel %vm6055_vm4, %v807_v40, %v997_v37  ;;  %v325_v26 = vld [vmem:[%s6043_s26 + $0x98] sm:$0xff] }
  0x6d   : > { %v1308_v43 = vrot.slane %v1307_v14, 4  ;;  %v1472_v38 = vunpack.c.l.b16 %v1217_v41  ;;  %v443_v46 = vpack.c.bf16 %v411_v45, %v411_v45  ;;  %999 = vst [vmem:[#allocation2 + $0xa4] sm:$0x1] %v998_v49  ;;  %v588_v53 = vshrl.u32 %v442_v34, 16  ;;  %v909_v10 = vld [vmem:[#allocation2 + $0xc] sm:$0xf] }
  0x6e   : > { %v1298_v48 = vrot.slane %v1297_v25, 4  ;;  %v591_v54 = vshll.u32 %v442_v34, 16  ;;  %v420_v55 = vmax.f32 %v6268_v51, 0.0  ;;  %v421_v9 = vmax.f32 %v6271_v57, 0.0 }
  0x6f   : > { %v1313_v52 = vsel %vm6152_vm11, %v1308_v43, %v1312_v36  ;;  %v1498_v59 = vpack.c.b16 %v1472_v38, %v1471_v42  ;;  %v596_v4 = vshrl.u32 %v443_v46, 16  ;;  %v590_v45 = vrot.slane %v588_v53, 7  ;;  %v913_v47 = vld [vmem:[#allocation2 + $0x14] sm:$0x1]  ;;  %v514_v38 = vld [vmem:[#allocation2 + $0x78] sm:$0x1] }
  0x70   : > { %v1303_v63 = vsel %vm6152_vm11, %v1298_v48, %v1302_v2  ;;  %v1480_v3 = vunpack.c.l.b16 %v1313_v52  ;;  %v599_v8 = vshll.u32 %v443_v46, 16  ;;  %v452_v11 = vpack.c.bf16 %v420_v55, %v420_v55 }
  0x71   : > { %v1479_v39 = vunpack.c.l.b16 %v1303_v63  ;;  %5156 = vmatmul.msk.bf16.gmra.mxu1 %vm1515_vm12, %v1498_v59  ;;  %v598_v51 = vrot.slane %v596_v4, 7  ;;  %v553_v12 = vsel %vm6061_vm5, 0, %v552_v50  ;;  %v360_v13 = vmul.f32 %v6071_v6, %v324_v61  ;;  %v1047_v21 = vld [vmem:[#allocation2 + $0x9c] sm:$0xf] }
  0x72   : > { %v593_v17 = vor.u32 %v591_v54, %v590_v45  ;;  %v594_v30 = vrot.slane %v590_v45, 4  ;;  %v453_v18 = vpack.c.bf16 %v421_v9, %v421_v9  ;;  %554 = vst [vmem:[#allocation2 + $0x50] sm:$0x1] %v553_v12  ;;  %v673_v23 = vshrl.u32 %v452_v11, 16  ;;  %v944_v43 = vld [vmem:[#allocation2 + $0x48] sm:$0xf] }
  0x73   : > { %v1502_v16 = vpack.c.b16 %v1480_v3, %v1479_v39  ;;  %v601_v22 = vor.u32 %v599_v8, %v598_v51  ;;  %v603_v57 = vrot.slane %v598_v51, 4  ;;  %v676_v24 = vshll.u32 %v452_v11, 16  ;;  %v1048_v27 = vld [vmem:[#allocation2 + $0xa0] sm:$0xf] }
  0x74   : > { %v1387_v5 = vshrl.u32 %v1047_v21, 16  ;;  %v1390_v2 = vshll.u32 %v1047_v21, 16  ;;  %v910_v28 = vsel %vm6120_vm10, %v593_v17, %v909_v10  ;;  %v681_v29 = vshrl.u32 %v453_v18, 16  ;;  %v1068_v31 = vld [vmem:[#allocation2 + $0xa4] sm:$0x1]  ;;  %v332_v17 = vld [vmem:[%s6043_s26 + $0xd0] sm:$0xff] }
  0x75   : > { %5160 = vmatmul.msk.bf16.gmra.mxu2 %vm1515_vm12, %v1502_v16  ;;  %v1396_v32 = vshll.u32 %v1048_v27, 16  ;;  %v1400_v60 = vshrl.u32 %v1048_v27, 16  ;;  %v602_v33 = vsel %vm6110_vm7, %v594_v30, %v601_v22  ;;  %911 = vst [vmem:[#allocation2 + $0xc] sm:$0xf] %v910_v28  ;;  %v914_v34 = vsel %vm6055_vm4, %v603_v57, %v913_v47  ;;  %v564_v39 = vld [vmem:[#allocation2 + $0x80] sm:$0x1] }
  0x76   : > { %v1389_v35 = vrot.slane %v1387_v5, 4  ;;  %v1392_v14 = vrot.slane %v1390_v2, 5  ;;  %v1406_v36 = vshll.u32 %v1068_v31, 16  ;;  %912 = vst.msk [vmem:[#allocation2 + $0x10] sm:$0xf] %vm474_vm3, %v602_v33  ;;  %v361_v15 = vmul.f32 %v6071_v6, %v325_v26  ;;  %v333_v31 = vld [vmem:[%s6043_s26 + $0xd8] sm:$0xff] }
  0x77   : > { %v1398_v37 = vrot.slane %v1396_v32, 5  ;;  %v1402_v20 = vrot.slane %v1400_v60, 4  ;;  %915 = vst [vmem:[#allocation2 + $0x14] sm:$0x1] %v914_v34  ;;  %v675_v25 = vrot.slane %v673_v23, 7  ;;  %v683_v40 = vrot.slane %v681_v29, 7 }
  0x78   : > { %v1393_v19 = vor.u32 %v1392_v14, %v1389_v35  ;;  %v1408_v41 = vrot.slane %v1406_v36, 5  ;;  %v684_v42 = vshll.u32 %v453_v18, 16  ;;  %v396_v44 = vadd.f32 %v6076_v7, %v360_v13  ;;  %v526_v57 = vld [vmem:[#allocation2 + $0xa8] sm:$0x1] }
  0x79   : > { %v1403_v48 = vor.u32 %v1402_v20, %v1398_v37  ;;  %v678_v49 = vor.u32 %v676_v24, %v675_v25  ;;  %v679_v46 = vrot.slane %v675_v25, 4  ;;  %v688_v50 = vrot.slane %v683_v40, 4  ;;  %v948_v52 = vld [vmem:[#allocation2 + $0x50] sm:$0x1] }
  0x7a   : > { %v1394_v53 = vrot.slane %v1393_v19, 4  ;;  %v686_v54 = vor.u32 %v684_v42, %v683_v40  ;;  %v397_v55 = vadd.f32 %v6076_v7, %v361_v15  ;;  %v428_v61 = vmax.f32 %v396_v44, 0.0 }
  0x7b   : > { %v1404_v59 = vrot.slane %v1403_v48, 4  ;;  %v945_v63 = vsel %vm6120_vm10, %v678_v49, %v944_v43  ;;  %v949_v3 = vsel %vm6055_vm4, %v688_v50, %v948_v52  ;;  %v515_v4 = vsel %vm6055_vm4, 0, %v514_v38 }
  0x7c   : > { %v1399_v45 = vsel %vm6152_vm11, %v1394_v53, %v1398_v37  ;;  %v1023_v8 = vld [vmem:[#allocation2 + $0xc] sm:$0xf]  ;;  %v687_v7 = vsel %vm6110_vm7, %v679_v46, %v686_v54  ;;  %946 = vst [vmem:[#allocation2 + $0x48] sm:$0xf] %v945_v63  ;;  %v429_v9 = vmax.f32 %v397_v55, 0.0  ;;  %v460_v51 = vpack.c.bf16 %v428_v61, %v428_v61 }
  0x7d   : > { %v1409_v10 = vsel %vm6152_vm11, %v1404_v59, %v1408_v41  ;;  %v1487_v11 = vunpack.c.l.b16 %v1399_v45  ;;  %v6326_v12 = vld [vmem:[#allocation2 + $0x10] sm:$0xf]  ;;  %v1099_v13 = vshrl.u32 %v1023_v8, 16  ;;  %v1102_v16 = vshll.u32 %v1023_v8, 16  ;;  %947 = vst.msk [vmem:[#allocation2 + $0x4c] sm:$0xf] %vm474_vm3, %v687_v7 }
  0x7e   : > { %v1488_v30 = vunpack.c.l.b16 %v1409_v10  ;;  %v6330_v47 = vld [vmem:[#allocation2 + $0x14] sm:$0x1]  ;;  %v1108_v18 = vshll.u32 %v6326_v12, 16  ;;  %v1112_v21 = vshrl.u32 %v6326_v12, 16  ;;  %950 = vst [vmem:[#allocation2 + $0x50] sm:$0x1] %v949_v3  ;;  %v461_v22 = vpack.c.bf16 %v429_v9, %v429_v9 }
  0x7f   : > { %v1101_v23 = vrot.slane %v1099_v13, 4  ;;  %v1104_v24 = vrot.slane %v1102_v16, 5  ;;  %v1118_v26 = vshll.u32 %v6330_v47, 16  ;;  %516 = vst [vmem:[#allocation2 + $0x78] sm:$0x1] %v515_v4  ;;  %v565_v27 = vsel %vm6061_vm5, 0, %v564_v39 }
  0x80   : > { %v1506_v5 = vpack.c.b16 %v1488_v30, %v1487_v11  ;;  %v1110_v2 = vrot.slane %v1108_v18, 5  ;;  %v1114_v28 = vrot.slane %v1112_v21, 4  ;;  %566 = vst [vmem:[#allocation2 + $0x80] sm:$0x1] %v565_v27  ;;  %v741_v29 = vshrl.u32 %v460_v51, 16  ;;  %v308_v10 = vld [vmem:[%s6043_s26 + $0x10] sm:$0xff] }
  0x81   : > { %v1105_v32 = vor.u32 %v1104_v24, %v1101_v23  ;;  %v1120_v60 = vrot.slane %v1118_v26, 5  ;;  %v744_v33 = vshll.u32 %v460_v51, 16  ;;  %v749_v34 = vshrl.u32 %v461_v22, 16  ;;  %v576_v51 = vld [vmem:[#allocation2 + $0xb0] sm:$0x1] }
  0x82   : > { %5164 = vmatmul.msk.bf16.gmra.mxu3 %vm1515_vm12, %v1506_v5  ;;  %v1115_v35 = vor.u32 %v1114_v28, %v1110_v2  ;;  %v743_v14 = vrot.slane %v741_v29, 7  ;;  %v752_v36 = vshll.u32 %v461_v22, 16  ;;  %v368_v15 = vmul.f32 %v6071_v6, %v332_v17  ;;  %v6353_v17 = vld [vmem:[%s7575_s2] ss:$0 sm:$0xff]  ;;  %v309_v18 = vld [vmem:[%s6043_s26 + $0x18] sm:$0xff] }
  0x83   : > { %v1106_v37 = vrot.slane %v1105_v32, 4  ;;  %v1033_v20 = vld [vmem:[#allocation2 + $0x48] sm:$0xf]  ;;  %v751_v25 = vrot.slane %v749_v34, 7  ;;  %v369_v40 = vmul.f32 %v6071_v6, %v333_v31  ;;  %v527_v19 = vsel %vm6055_vm4, 0, %v526_v57 }
  0x84   : > { %v1116_v41 = vrot.slane %v1115_v35, 4  ;;  %v1034_v42 = vld [vmem:[#allocation2 + $0x4c] sm:$0xf]  ;;  %v1219_v43 = vshrl.u32 %v1033_v20, 16  ;;  %v1222_v44 = vshll.u32 %v1033_v20, 16  ;;  %v746_v38 = vor.u32 %v744_v33, %v743_v14 }
  0x85   : > { %v1111_v48 = vsel %vm6152_vm11, %v1106_v37, %v1110_v2  ;;  %v1061_v49 = vld [vmem:[#allocation2 + $0x50] sm:$0x1]  ;;  %v1228_v46 = vshll.u32 %v1034_v42, 16  ;;  %v1232_v50 = vshrl.u32 %v1034_v42, 16  ;;  %v747_v52 = vrot.slane %v743_v14, 4 }
  0x86   : > { %v1121_v53 = vsel %vm6152_vm11, %v1116_v41, %v1120_v60  ;;  %v1463_v6 = vunpack.c.l.b16 %v1111_v48  ;;  %v1221_v54 = vrot.slane %v1219_v43, 4  ;;  %v1224_v55 = vrot.slane %v1222_v44, 5  ;;  %v972_v61 = vld [vmem:[#allocation2 + $0x78] sm:$0xf]  ;;  %528 = vst [vmem:[#allocation2 + $0xa8] sm:$0x1] %v527_v19 }
  0x87   : > { %v1464_v59 = vunpack.c.l.b16 %v1121_v53  ;;  %v1230_v63 = vrot.slane %v1228_v46, 5  ;;  %v1234_v3 = vrot.slane %v1232_v50, 4  ;;  %v1238_v4 = vshll.u32 %v1061_v49, 16  ;;  %v976_v39 = vld [vmem:[#allocation2 + $0x80] sm:$0x1] }
  0x88   : > { %v1225_v45 = vor.u32 %v1224_v55, %v1221_v54  ;;  %v754_v8 = vor.u32 %v752_v36, %v751_v25  ;;  %v756_v7 = vrot.slane %v751_v25, 4  ;;  %v973_v9 = vsel %vm6120_vm10, %v746_v38, %v972_v61  ;;  %v490_v21 = vld [vmem:[#allocation2 + $0x18] sm:$0x1]  ;;  %v540_v26 = vld [vmem:[#allocation2 + $0x20] sm:$0x1] }
  0x89   : > { %v1494_v11 = vpack.c.b16 %v1464_v59, %v1463_v6  ;;  %v1235_v13 = vor.u32 %v1234_v3, %v1230_v63  ;;  %v1240_v16 = vrot.slane %v1238_v4, 5  ;;  %974 = vst [vmem:[#allocation2 + $0x78] sm:$0xf] %v973_v9  ;;  %v404_v30 = vadd.f32 %v6353_v17, %v368_v15  ;;  %v6366_v28 = vld [vmem:[#allocation5] ss:$0 sm:$0xff]  ;;  %v319_v43 = vld [vmem:[%s6043_s26 + $0x68] sm:$0xff] }
  0x8a   : > { %v1226_v22 = vrot.slane %v1225_v45, 4  ;;  %v755_v57 = vsel %vm6110_vm7, %v747_v52, %v754_v8  ;;  %v977_v23 = vsel %vm6055_vm4, %v756_v7, %v976_v39  ;;  %v405_v24 = vadd.f32 %v6353_v17, %v369_v40  ;;  %v318_v15 = vld [vmem:[%s6043_s26 + $0x60] sm:$0xff] }
  0x8b   : > { %5152 = vmatmul.msk.bf16.gmra.mxu0 %vm1515_vm12, %v1494_v11  ;;  %v1236_v27 = vrot.slane %v1235_v13, 4  ;;  %975 = vst.msk [vmem:[#allocation2 + $0x7c] sm:$0xf] %vm474_vm3, %v755_v57  ;;  %v436_v5 = vmax.f32 %v404_v30, 0.0  ;;  %v577_v2 = vsel %vm6061_vm5, 0, %v576_v51  ;;  %v344_v29 = vmul.f32 %v6366_v28, %v308_v10 }
  0x8c   : > { %v1231_v31 = vsel %vm6152_vm11, %v1226_v22, %v1230_v63  ;;  %978 = vst [vmem:[#allocation2 + $0x80] sm:$0x1] %v977_v23  ;;  %v437_v32 = vmax.f32 %v405_v24, 0.0  ;;  %v345_v60 = vmul.f32 %v6366_v28, %v309_v18  ;;  %v491_v33 = vsel %vm6055_vm4, 0, %v490_v21 }
  0x8d   : > { %v1241_v34 = vsel %vm6152_vm11, %v1236_v27, %v1240_v16  ;;  %v1473_v35 = vunpack.c.l.b16 %v1231_v31  ;;  %v468_v14 = vpack.c.bf16 %v436_v5, %v436_v5  ;;  %578 = vst [vmem:[#allocation2 + $0xb0] sm:$0x1] %v577_v2  ;;  %v380_v36 = vadd.f32 %v6353_v17, %v344_v29  ;;  %v1000_v61 = vld [vmem:[#allocation2 + $0xa8] sm:$0xf]  ;;  %v505_v29 = vld [vmem:[#allocation2 + $0x54] sm:$0x1] }
  0x8e   : > { %v1474_v37 = vunpack.c.l.b16 %v1241_v34  ;;  %v469_v20 = vpack.c.bf16 %v437_v32, %v437_v32  ;;  %v381_v25 = vadd.f32 %v6353_v17, %v345_v60  ;;  %492 = vst [vmem:[#allocation2 + $0x18] sm:$0x1] %v491_v33  ;;  %v541_v40 = vsel %vm6061_vm5, 0, %v540_v26 }
  0x8f   : > { %v809_v19 = vshrl.u32 %v468_v14, 16  ;;  %v812_v41 = vshll.u32 %v468_v14, 16  ;;  %v412_v42 = vmax.f32 %v380_v36, 0.0  ;;  %542 = vst [vmem:[#allocation2 + $0x20] sm:$0x1] %v541_v40  ;;  %v354_v46 = vmul.f32 %v6366_v28, %v318_v15 }
  0x90   : > { %v1499_v44 = vpack.c.b16 %v1474_v37, %v1473_v35  ;;  %v1041_v38 = vld [vmem:[#allocation2 + $0x78] sm:$0xf]  ;;  %v817_v48 = vshrl.u32 %v469_v20, 16  ;;  %v413_v49 = vmax.f32 %v381_v25, 0.0  ;;  %v820_v6 = vshll.u32 %v469_v20, 16 }
  0x91   : > { %v1315_v50 = vshrl.u32 %v1041_v38, 16  ;;  %v1318_v52 = vshll.u32 %v1041_v38, 16  ;;  %v811_v53 = vrot.slane %v809_v19, 7  ;;  %v444_v59 = vpack.c.bf16 %v412_v42, %v412_v42  ;;  %v555_v19 = vld [vmem:[#allocation2 + $0x5c] sm:$0x1] }
  0x92   : > { %5157 = vmatmul.msk.bf16.gmra.mxu1 %vm1515_vm12, %v1499_v44  ;;  %v1042_v54 = vld [vmem:[#allocation2 + $0x7c] sm:$0xf]  ;;  %v819_v55 = vrot.slane %v817_v48, 7  ;;  %v445_v63 = vpack.c.bf16 %v413_v49, %v413_v49  ;;  %v355_v3 = vmul.f32 %v6366_v28, %v319_v43  ;;  %v390_v11 = vadd.f32 %v6353_v17, %v354_v46 }
  0x93   : > { %v1065_v4 = vld [vmem:[#allocation2 + $0x80] sm:$0x1]  ;;  %v1317_v39 = vrot.slane %v1315_v50, 4  ;;  %v1320_v45 = vrot.slane %v1318_v52, 5  ;;  %v1324_v8 = vshll.u32 %v1042_v54, 16  ;;  %v1328_v7 = vshrl.u32 %v1042_v54, 16 }
  0x94   : > { %v1334_v9 = vshll.u32 %v1065_v4, 16  ;;  %v814_v51 = vor.u32 %v812_v41, %v811_v53  ;;  %v815_v10 = vrot.slane %v811_v53, 4  ;;  %v822_v18 = vor.u32 %v820_v6, %v819_v55  ;;  %v1004_v21 = vld [vmem:[#allocation2 + $0xb0] sm:$0x1]  ;;  %v326_v48 = vld [vmem:[%s6043_s26 + $0xa0] sm:$0xff]  ;;  %v327_v53 = vld [vmem:[%s6043_s26 + $0xa8] sm:$0xff] }
  0x95   : > { %v1321_v13 = vor.u32 %v1320_v45, %v1317_v39  ;;  %v1326_v16 = vrot.slane %v1324_v8, 5  ;;  %v1330_v30 = vrot.slane %v1328_v7, 4  ;;  %v824_v57 = vrot.slane %v819_v55, 4  ;;  %v916_v14 = vld [vmem:[#allocation2 + $0x18] sm:$0xf]  ;;  %v335_v8 = vld [vmem:[%s6043_s26 + $0xe8] sm:$0xff] }
  0x96   : > { %v1336_v22 = vrot.slane %v1334_v9, 5  ;;  %v1001_v23 = vsel %vm6120_vm10, %v814_v51, %v1000_v61  ;;  %v605_v24 = vshrl.u32 %v444_v59, 16  ;;  %v823_v5 = vsel %vm6110_vm7, %v815_v10, %v822_v18  ;;  %v920_v42 = vld [vmem:[#allocation2 + $0x20] sm:$0x1] }
  0x97   : > { %v1322_v26 = vrot.slane %v1321_v13, 4  ;;  %v1331_v27 = vor.u32 %v1330_v30, %v1326_v16  ;;  %1002 = vst [vmem:[#allocation2 + $0xa8] sm:$0xf] %v1001_v23  ;;  %v608_v2 = vshll.u32 %v444_v59, 16  ;;  %v1005_v31 = vsel %vm6055_vm4, %v824_v57, %v1004_v21  ;;  %v334_v59 = vld [vmem:[%s6043_s26 + $0xe0] sm:$0xff] }
  0x98   : > { %1003 = vst.msk [vmem:[#allocation2 + $0xac] sm:$0xf] %vm474_vm3, %v823_v5  ;;  %v607_v32 = vrot.slane %v605_v24, 7  ;;  %v613_v60 = vshrl.u32 %v445_v63, 16  ;;  %v616_v33 = vshll.u32 %v445_v63, 16  ;;  %v391_v36 = vadd.f32 %v6353_v17, %v355_v3 }
  0x99   : > { %v1327_v34 = vsel %vm6152_vm11, %v1322_v26, %v1326_v16  ;;  %v1332_v35 = vrot.slane %v1331_v27, 4  ;;  %1006 = vst [vmem:[#allocation2 + $0xb0] sm:$0x1] %v1005_v31  ;;  %v422_v15 = vmax.f32 %v390_v11, 0.0  ;;  %v506_v38 = vsel %vm6055_vm4, 0, %v505_v29 }
  0x9a   : > { %v1481_v37 = vunpack.c.l.b16 %v1327_v34  ;;  %v610_v20 = vor.u32 %v608_v2, %v607_v32  ;;  %v611_v25 = vrot.slane %v607_v32, 4  ;;  %v615_v40 = vrot.slane %v613_v60, 7  ;;  %507 = vst [vmem:[#allocation2 + $0x54] sm:$0x1] %v506_v38 }
  0x9b   : > { %v1337_v41 = vsel %vm6152_vm11, %v1332_v35, %v1336_v22  ;;  %v423_v43 = vmax.f32 %v391_v36, 0.0  ;;  %v454_v44 = vpack.c.bf16 %v422_v15, %v422_v15  ;;  %v556_v54 = vsel %vm6061_vm5, 0, %v555_v19 }
  0x9c   : > { %v1482_v49 = vunpack.c.l.b16 %v1337_v41  ;;  %v618_v46 = vor.u32 %v616_v33, %v615_v40  ;;  %v620_v50 = vrot.slane %v615_v40, 4  ;;  %v917_v52 = vsel %vm6120_vm10, %v610_v20, %v916_v14  ;;  %557 = vst [vmem:[#allocation2 + $0x5c] sm:$0x1] %v556_v54 }
  0x9d   : > { %918 = vst [vmem:[#allocation2 + $0x18] sm:$0xf] %v917_v52  ;;  %v455_v6 = vpack.c.bf16 %v423_v43, %v423_v43  ;;  %v690_v55 = vshrl.u32 %v454_v44, 16  ;;  %v693_v61 = vshll.u32 %v454_v44, 16  ;;  %v362_v45 = vmul.f32 %v6366_v28, %v326_v48 }
  0x9e   : > { %v1503_v63 = vpack.c.b16 %v1482_v49, %v1481_v37  ;;  %v1049_v3 = vld [vmem:[#allocation2 + $0xa8] sm:$0xf]  ;;  %v619_v4 = vsel %vm6110_vm7, %v611_v25, %v618_v46  ;;  %v921_v39 = vsel %vm6055_vm4, %v620_v50, %v920_v42  ;;  %v363_v10 = vmul.f32 %v6366_v28, %v327_v53 }
  0x9f   : > { %v1050_v7 = vld [vmem:[#allocation2 + $0xac] sm:$0xf]  ;;  %v1411_v9 = vshrl.u32 %v1049_v3, 16  ;;  %v1414_v51 = vshll.u32 %v1049_v3, 16  ;;  %919 = vst.msk [vmem:[#allocation2 + $0x1c] sm:$0xf] %vm474_vm3, %v619_v4  ;;  %v398_v30 = vadd.f32 %v6353_v17, %v362_v45  ;;  %v370_v18 = vmul.f32 %v6366_v28, %v334_v59 }
  0xa0   : > { %5161 = vmatmul.msk.bf16.gmra.mxu2 %vm1515_vm12, %v1503_v63  ;;  %v1069_v11 = vld [vmem:[#allocation2 + $0xb0] sm:$0x1]  ;;  %v1420_v13 = vshll.u32 %v1050_v7, 16  ;;  %v1424_v16 = vshrl.u32 %v1050_v7, 16  ;;  %922 = vst [vmem:[#allocation2 + $0x20] sm:$0x1] %v921_v39  ;;  %v371_v23 = vmul.f32 %v6366_v28, %v335_v8  ;;  %v399_v60 = vadd.f32 %v6353_v17, %v363_v10 }
  0xa1   : > { %v1413_v21 = vrot.slane %v1411_v9, 4  ;;  %v1416_v22 = vrot.slane %v1414_v51, 5  ;;  %v1430_v57 = vshll.u32 %v1069_v11, 16  ;;  %v692_v27 = vrot.slane %v690_v55, 7  ;;  %v951_v32 = vld [vmem:[#allocation2 + $0x54] sm:$0xf] }
  0xa2   : > { %v1422_v24 = vrot.slane %v1420_v13, 5  ;;  %v1426_v26 = vrot.slane %v1424_v16, 4  ;;  %v698_v5 = vshrl.u32 %v455_v6, 16  ;;  %v701_v31 = vshll.u32 %v455_v6, 16  ;;  %v517_v55 = vld [vmem:[#allocation2 + $0x84] sm:$0x1] }
  0xa3   : > { %v1417_v2 = vor.u32 %v1416_v22, %v1413_v21  ;;  %v1432_v29 = vrot.slane %v1430_v57, 5  ;;  %v695_v35 = vor.u32 %v693_v61, %v692_v27  ;;  %v696_v14 = vrot.slane %v692_v27, 4  ;;  %v955_v44 = vld [vmem:[#allocation2 + $0x5c] sm:$0x1]  ;;  %v567_v4 = vld [vmem:[#allocation2 + $0x8c] sm:$0x1] }
  0xa4   : > { %v1427_v33 = vor.u32 %v1426_v26, %v1422_v24  ;;  %v1025_v34 = vld [vmem:[#allocation2 + $0x18] sm:$0xf]  ;;  %v700_v36 = vrot.slane %v698_v5, 7  ;;  %v430_v25 = vmax.f32 %v398_v30, 0.0  ;;  %v431_v7 = vmax.f32 %v399_v60, 0.0 }
  0xa5   : > { %v1418_v15 = vrot.slane %v1417_v2, 4  ;;  %v1123_v37 = vshrl.u32 %v1025_v34, 16  ;;  %v1126_v20 = vshll.u32 %v1025_v34, 16  ;;  %v952_v43 = vsel %vm6120_vm10, %v695_v35, %v951_v32  ;;  %v529_v22 = vld [vmem:[#allocation2 + $0xb4] sm:$0x1] }
  0xa6   : > { %v1428_v40 = vrot.slane %v1427_v33, 4  ;;  %v6420_v19 = vld [vmem:[#allocation2 + $0x1c] sm:$0xf]  ;;  %v703_v41 = vor.u32 %v701_v31, %v700_v36  ;;  %v705_v42 = vrot.slane %v700_v36, 4  ;;  %953 = vst [vmem:[#allocation2 + $0x54] sm:$0xf] %v952_v43  ;;  %v462_v10 = vpack.c.bf16 %v430_v25, %v430_v25 }
  0xa7   : > { %v1423_v38 = vsel %vm6152_vm11, %v1418_v15, %v1422_v24  ;;  %v6426_v48 = vld [vmem:[#allocation2 + $0x20] sm:$0x1]  ;;  %v1125_v49 = vrot.slane %v1123_v37, 4  ;;  %v1128_v46 = vrot.slane %v1126_v20, 5  ;;  %v1132_v50 = vshll.u32 %v6420_v19, 16 }
  0xa8   : > { %v1433_v52 = vsel %vm6152_vm11, %v1428_v40, %v1432_v29  ;;  %v1489_v53 = vunpack.c.l.b16 %v1423_v38  ;;  %v1136_v6 = vshrl.u32 %v6420_v19, 16  ;;  %v1142_v54 = vshll.u32 %v6426_v48, 16 }
  0xa9   : > { %v1490_v61 = vunpack.c.l.b16 %v1433_v52  ;;  %v1129_v59 = vor.u32 %v1128_v46, %v1125_v49  ;;  %v1134_v63 = vrot.slane %v1132_v50, 5  ;;  %v704_v3 = vsel %vm6110_vm7, %v696_v14, %v703_v41 }
  0xaa   : > { %v1138_v39 = vrot.slane %v1136_v6, 4  ;;  %v1144_v45 = vrot.slane %v1142_v54, 5  ;;  %954 = vst.msk [vmem:[#allocation2 + $0x58] sm:$0xf] %vm474_vm3, %v704_v3  ;;  %v956_v8 = vsel %vm6055_vm4, %v705_v42, %v955_v44  ;;  %v518_v11 = vsel %vm6055_vm4, 0, %v517_v55  ;;  %v310_v3 = vld [vmem:[%s6043_s26 + $0x20] sm:$0xff] }
  0xab   : > { %v1507_v9 = vpack.c.b16 %v1490_v61, %v1489_v53  ;;  %v1130_v51 = vrot.slane %v1129_v59, 4  ;;  %957 = vst [vmem:[#allocation2 + $0x5c] sm:$0x1] %v956_v8  ;;  %v463_v16 = vpack.c.bf16 %v431_v7, %v431_v7  ;;  %v568_v30 = vsel %vm6061_vm5, 0, %v567_v4  ;;  %v579_v6 = vld [vmem:[#allocation2 + $0xbc] sm:$0x1] }
  0xac   : > { %v1139_v13 = vor.u32 %v1138_v39, %v1134_v63  ;;  %519 = vst [vmem:[#allocation2 + $0x84] sm:$0x1] %v518_v11  ;;  %v406_v21 = vadd.f32 %v6353_v17, %v370_v18  ;;  %v758_v24 = vshrl.u32 %v462_v10, 16  ;;  %v761_v26 = vshll.u32 %v462_v10, 16  ;;  %v311_v7 = vld [vmem:[%s6043_s26 + $0x28] sm:$0xff] }
  0xad   : > { %5165 = vmatmul.msk.bf16.gmra.mxu3 %vm1515_vm12, %v1507_v9  ;;  %v1135_v57 = vsel %vm6152_vm11, %v1130_v51, %v1134_v63  ;;  %569 = vst [vmem:[#allocation2 + $0x8c] sm:$0x1] %v568_v30  ;;  %v407_v27 = vadd.f32 %v6353_v17, %v371_v23  ;;  %v766_v29 = vshrl.u32 %v463_v16, 16  ;;  %v769_v31 = vshll.u32 %v463_v16, 16  ;;  %v1035_v32 = vld [vmem:[#allocation2 + $0x54] sm:$0xf] }
  0xae   : > { %v1140_v5 = vrot.slane %v1139_v13, 4  ;;  %v1465_v2 = vunpack.c.l.b16 %v1135_v57  ;;  %v760_v60 = vrot.slane %v758_v24, 7  ;;  %v438_v33 = vmax.f32 %v406_v21, 0.0  ;;  %v493_v9 = vld [vmem:[#allocation2 + $0x24] sm:$0x1] }
  0xaf   : > { %v439_v34 = vmax.f32 %v407_v27, 0.0  ;;  %v530_v18 = vsel %vm6055_vm4, 0, %v529_v22  ;;  %v1243_v14 = vshrl.u32 %v1035_v32, 16  ;;  %v1246_v36 = vshll.u32 %v1035_v32, 16 }
  0xb0   : > { %v1145_v35 = vsel %vm6152_vm11, %v1140_v5, %v1144_v45  ;;  %v768_v15 = vrot.slane %v766_v29, 7  ;;  %531 = vst [vmem:[#allocation2 + $0xb4] sm:$0x1] %v530_v18  ;;  %v763_v20 = vor.u32 %v761_v26, %v760_v60  ;;  %v764_v25 = vrot.slane %v760_v60, 4  ;;  %v543_v60 = vld [vmem:[#allocation2 + $0x2c] sm:$0x1] }
  0xb1   : > { %v1466_v37 = vunpack.c.l.b16 %v1145_v35  ;;  %v6451_v23 = vld [vmem:[#allocation2 + $0x58] sm:$0xf]  ;;  %v470_v40 = vpack.c.bf16 %v438_v33, %v438_v33  ;;  %v1245_v42 = vrot.slane %v1243_v14, 4  ;;  %v1248_v43 = vrot.slane %v1246_v36, 5 }
  0xb2   : > { %v6453_v41 = vld [vmem:[#allocation2 + $0x5c] sm:$0x1]  ;;  %v1252_v44 = vshll.u32 %v6451_v23, 16  ;;  %v1256_v38 = vshrl.u32 %v6451_v23, 16  ;;  %v771_v50 = vor.u32 %v769_v31, %v768_v15  ;;  %v773_v52 = vrot.slane %v768_v15, 4 }
  0xb3   : > { %v1495_v49 = vpack.c.b16 %v1466_v37, %v1465_v2  ;;  %v1262_v46 = vshll.u32 %v6453_v41, 16  ;;  %v979_v53 = vld [vmem:[#allocation2 + $0x84] sm:$0xf]  ;;  %v1249_v54 = vor.u32 %v1248_v43, %v1245_v42  ;;  %v471_v8 = vpack.c.bf16 %v439_v34, %v439_v34 }
  0xb4   : > { %v1254_v55 = vrot.slane %v1252_v44, 5  ;;  %v1258_v61 = vrot.slane %v1256_v38, 4  ;;  %v980_v59 = vsel %vm6120_vm10, %v763_v20, %v979_v53  ;;  %v983_v63 = vld [vmem:[#allocation2 + $0x8c] sm:$0x1]  ;;  %v772_v39 = vsel %vm6110_vm7, %v764_v25, %v771_v50 }
  0xb5   : > { %5153 = vmatmul.msk.bf16.gmra.mxu0 %vm1515_vm12, %v1495_v49  ;;  %v1264_v4 = vrot.slane %v1262_v46, 5  ;;  %981 = vst [vmem:[#allocation2 + $0x84] sm:$0xf] %v980_v59  ;;  %v984_v45 = vsel %vm6055_vm4, %v773_v52, %v983_v63  ;;  %v1250_v51 = vrot.slane %v1249_v54, 4  ;;  %v580_v11 = vsel %vm6061_vm5, 0, %v579_v6 }
  0xb6   : > { %v1259_v10 = vor.u32 %v1258_v61, %v1254_v55  ;;  %982 = vst.msk [vmem:[#allocation2 + $0x88] sm:$0xf] %vm474_vm3, %v772_v39  ;;  %v826_v13 = vshrl.u32 %v470_v40, 16  ;;  %v829_v16 = vshll.u32 %v470_v40, 16  ;;  %v834_v30 = vshrl.u32 %v471_v8, 16 }
  0xb7   : > { %985 = vst [vmem:[#allocation2 + $0x8c] sm:$0x1] %v984_v45  ;;  %v837_v21 = vshll.u32 %v471_v8, 16  ;;  %v346_v22 = vmul.f32 %v6366_v28, %v310_v3  ;;  %v1255_v57 = vsel %vm6152_vm11, %v1250_v51, %v1254_v55  ;;  %v347_v27 = vmul.f32 %v6366_v28, %v311_v7  ;;  %v1007_v29 = vld [vmem:[#allocation2 + $0xb4] sm:$0xf] }
  0xb8   : > { %v1260_v24 = vrot.slane %v1259_v10, 4  ;;  %581 = vst [vmem:[#allocation2 + $0xbc] sm:$0x1] %v580_v11  ;;  %v828_v26 = vrot.slane %v826_v13, 7  ;;  %v1475_v5 = vunpack.c.l.b16 %v1255_v57  ;;  %v836_v2 = vrot.slane %v834_v30, 7 }
  0xb9   : > { %v382_v31 = vadd.f32 %v6353_v17, %v346_v22  ;;  %v494_v32 = vsel %vm6055_vm4, 0, %v493_v9  ;;  %v383_v35 = vadd.f32 %v6353_v17, %v347_v27  ;;  %v544_v40 = vsel %vm6061_vm5, 0, %v543_v60 }
  0xba   : > { %v1265_v33 = vsel %vm6152_vm11, %v1260_v24, %v1264_v4  ;;  %v831_v34 = vor.u32 %v829_v16, %v828_v26  ;;  %v832_v18 = vrot.slane %v828_v26, 4  ;;  %495 = vst [vmem:[#allocation2 + $0x24] sm:$0x1] %v494_v32  ;;  %v839_v36 = vor.u32 %v837_v21, %v836_v2  ;;  %v5625_v16 = vld [vmem:[#allocation7 + $0x30] sm:$0xff] }
  0xbb   : > { %v1476_v14 = vunpack.c.l.b16 %v1265_v33  ;;  %v414_v28 = vmax.f32 %v382_v31, 0.0  ;;  %v841_v37 = vrot.slane %v836_v2, 4  ;;  %v415_v25 = vmax.f32 %v383_v35, 0.0  ;;  %545 = vst [vmem:[#allocation2 + $0x2c] sm:$0x1] %v544_v40  ;;  %3792 = vmatpush.bf16.msra.mxu2 %v5625_v16 }
  0xbc   : > { %v1043_v15 = vld [vmem:[#allocation2 + $0x84] sm:$0xf]  ;;  %v1008_v20 = vsel %vm6120_vm10, %v831_v34, %v1007_v29  ;;  %v840_v17 = vsel %vm6110_vm7, %v832_v18, %v839_v36  ;;  %vm4966_vm0 = vcmask 261120  }
  0xbd   : > { %v1500_v42 = vpack.c.b16 %v1476_v14, %v1475_v5  ;;  %v1044_v43 = vld [vmem:[#allocation2 + $0x88] sm:$0xf]  ;;  %v1339_v44 = vshrl.u32 %v1043_v15, 16  ;;  %v1342_v38 = vshll.u32 %v1043_v15, 16  ;;  %1009 = vst [vmem:[#allocation2 + $0xb4] sm:$0xf] %v1008_v20  ;;  %v446_v52 = vpack.c.bf16 %v414_v28, %v414_v28 }
  0xbe   : > { %v1066_v49 = vld [vmem:[#allocation2 + $0x8c] sm:$0x1]  ;;  %v1348_v46 = vshll.u32 %v1044_v43, 16  ;;  %v1352_v50 = vshrl.u32 %v1044_v43, 16  ;;  %1010 = vst.msk [vmem:[#allocation2 + $0xb8] sm:$0xf] %vm474_vm3, %v840_v17  ;;  %v447_v53 = vpack.c.bf16 %v415_v25, %v415_v25 }
  0xbf   : > { %5158 = vmatmul.msk.bf16.gmra.mxu1 %vm1515_vm12, %v1500_v42  ;;  %v1341_v6 = vrot.slane %v1339_v44, 4  ;;  %v1344_v54 = vrot.slane %v1342_v38, 5  ;;  %v1358_v55 = vshll.u32 %v1066_v49, 16  ;;  %v1011_v61 = vld [vmem:[#allocation2 + $0xbc] sm:$0x1]  ;;  %v622_v4 = vshrl.u32 %v446_v52, 16 }
  0xc0   : > { %v1350_v59 = vrot.slane %v1348_v46, 5  ;;  %v1354_v63 = vrot.slane %v1352_v50, 4  ;;  %v1012_v3 = vsel %vm6055_vm4, %v841_v37, %v1011_v61  ;;  %v625_v45 = vshll.u32 %v446_v52, 16  ;;  %v1876_v28 = vld [vmem:[#allocation2] sm:$0xe] }
  0xc1   : > { %v1345_v39 = vor.u32 %v1344_v54, %v1341_v6  ;;  %1013 = vst [vmem:[#allocation2 + $0xbc] sm:$0x1] %v1012_v3  ;;  %v630_v8 = vshrl.u32 %v447_v53, 16  ;;  %v1360_v9 = vrot.slane %v1358_v55, 5  ;;  %v624_v51 = vrot.slane %v622_v4, 7 }
  0xc2   : > { %v1355_v7 = vor.u32 %v1354_v63, %v1350_v59  ;;  %v633_v10 = vshll.u32 %v447_v53, 16  ;;  %v923_v29 = vld [vmem:[#allocation2 + $0x24] sm:$0xf]  ;;  %v927_v36 = vld [vmem:[#allocation2 + $0x2c] sm:$0x1]  ;;  %v5251_v6 = vrot.slane %v1876_v28, 9 }
  0xc3   : > { %v1346_v11 = vrot.slane %v1345_v39, 4  ;;  %v632_v13 = vrot.slane %v630_v8, 7  ;;  %v627_v22 = vor.u32 %v625_v45, %v624_v51  ;;  %v628_v57 = vrot.slane %v624_v51, 4  ;;  %v5716_v49 = vld [vmem:[#allocation2 + $0x4] sm:$0xf]  ;;  %v5626_v51 = vld [vmem:[#allocation7 + $0x38] sm:$0xff] }
  0xc4   : > { %v1356_v30 = vrot.slane %v1355_v7, 4  ;;  %v1051_v21 = vld [vmem:[#allocation2 + $0xb4] sm:$0xf]  ;;  %v1929_v46 = vrot.slane %v5716_v49, 5  ;;  %v5571_v53 = vld [vmem:[#allocation2] sm:$0xff]  ;;  %4450 = vmatpush.bf16.msra.mxu3 %v5626_v51 }
  0xc5   : > { %v1351_v24 = vsel %vm6152_vm11, %v1346_v11, %v1350_v59  ;;  %v1052_v26 = vld [vmem:[#allocation2 + $0xb8] sm:$0xf]  ;;  %v1435_v27 = vshrl.u32 %v1051_v21, 16  ;;  %v1438_v5 = vshll.u32 %v1051_v21, 16  ;;  %v635_v2 = vor.u32 %v633_v10, %v632_v13  ;;  %v5717_v54 = vld [vmem:[#allocation2 + $0x8] sm:$0x1] }
  0xc6   : > { %v1361_v31 = vsel %vm6152_vm11, %v1356_v30, %v1360_v9  ;;  %v1483_v32 = vunpack.c.l.b16 %v1351_v24  ;;  %v1444_v60 = vshll.u32 %v1052_v26, 16  ;;  %v1448_v33 = vshrl.u32 %v1052_v26, 16  ;;  %v2555_v4 = vld [vmem:[#allocation2 + $0xc] sm:$0xf]  ;;  %v2556_v8 = vld [vmem:[#allocation2 + $0x10] sm:$0xf] }
  0xc7   : > { %v1484_v34 = vunpack.c.l.b16 %v1361_v31  ;;  %v1437_v18 = vrot.slane %v1435_v27, 4  ;;  %v1440_v35 = vrot.slane %v1438_v5, 5  ;;  %v636_v14 = vsel %vm6110_vm7, %v628_v57, %v635_v2  ;;  %v5608_v10 = vld [vmem:[#allocation7 + $0x28] sm:$0xff]  ;;  %v5627_v11 = vld [vmem:[#allocation7 + $0x40] sm:$0xff] }
  0xc8   : > { %v1070_v15 = vld [vmem:[#allocation2 + $0xbc] sm:$0x1]  ;;  %v1446_v37 = vrot.slane %v1444_v60, 5  ;;  %v1450_v20 = vrot.slane %v1448_v33, 4  ;;  %v637_v25 = vrot.slane %v632_v13, 4  ;;  %v924_v40 = vsel %vm6120_vm10, %v627_v22, %v923_v29  ;;  %3501 = vmatpush.bf16.msra.mxu1 %v5608_v10  ;;  %4852 = vmatpush.bf16.msra.mxu0 %v5627_v11 }
  0xc9   : > { %v1504_v42 = vpack.c.b16 %v1484_v34, %v1483_v32  ;;  %v1441_v43 = vor.u32 %v1440_v35, %v1437_v18  ;;  %v1454_v44 = vshll.u32 %v1070_v15, 16  ;;  %925 = vst [vmem:[#allocation2 + $0x24] sm:$0xf] %v924_v40  ;;  %v1932_v55 = vrot.slane %v5717_v54, 5  ;;  %v1878_v51 = vld [vmem:[#allocation2 + $0x18] sm:$0xe] }
  0xca   : > { %v1451_v38 = vor.u32 %v1450_v20, %v1446_v37  ;;  %926 = vst.msk [vmem:[#allocation2 + $0x28] sm:$0xf] %vm474_vm3, %v636_v14  ;;  %v928_v17 = vsel %vm6055_vm4, %v637_v25, %v927_v36  ;;  %v1931_v63 = vrot.slane %v1929_v46, 4  ;;  %v1930_v9 = vsel %vm6504_vm15, %v5251_v6, %v1929_v46  ;;  %v5741_v0 = vld [vmem:[#allocation2 + $0xbc] sm:$0x1] }
  0xcb   : > { %5162 = vmatmul.msk.bf16.gmra.mxu2 %vm1515_vm12, %v1504_v42  ;;  %v1442_v50 = vrot.slane %v1441_v43, 4  ;;  %v1456_v52 = vrot.slane %v1454_v44, 5  ;;  %929 = vst [vmem:[#allocation2 + $0x2c] sm:$0x1] %v928_v17  ;;  %v2604_v30 = vshrl.u32 %v2555_v4, 16  ;;  %v2607_v21 = vshll.u32 %v2555_v4, 16 }
  0xcc   : > { %v1452_v61 = vrot.slane %v1451_v38, 4  ;;  %v1933_v16 = vsel %vm6504_vm15, %v1931_v63, %v1932_v55  ;;  %v2613_v27 = vshll.u32 %v2556_v8, 16  ;;  %v2042_v31 = vunpack.c.l.b16 %v1930_v9  ;;  %v2557_v44 = vld [vmem:[#allocation2 + $0x14] sm:$0x1]  ;;  %v2558_v9 = vld [vmem:[#allocation2 + $0x18] sm:$0xf] }
  0xcd   : > { %v1447_v3 = vsel %vm6152_vm11, %v1442_v50, %v1446_v37  ;;  %v2617_v32 = vshrl.u32 %v2556_v8, 16  ;;  %v2043_v18 = vunpack.c.l.b16 %v1933_v16  ;;  %v2606_v28 = vrot.slane %v2604_v30, 4  ;;  %v1877_v50 = vld [vmem:[#allocation2 + $0xc] sm:$0xe]  ;;  %v2559_v30 = vld [vmem:[#allocation2 + $0x1c] sm:$0xf] }
  0xce   : > { %v1457_v39 = vsel %vm6152_vm11, %v1452_v61, %v1456_v52  ;;  %v1491_v45 = vunpack.c.l.b16 %v1447_v3  ;;  %v2609_v15 = vrot.slane %v2607_v21, 5  ;;  %v2615_v25 = vrot.slane %v2613_v27, 5  ;;  %v5572_v61 = vld [vmem:[#allocation2 + $0xc] sm:$0xff] }
  0xcf   : > { %v1492_v7 = vunpack.c.l.b16 %v1457_v39  ;;  %5235 = vmatmul.msk.bf16.vlgmr.msrb.gmra.mxu1 %vm1515_vm12, %v5571_v53  ;;  %v2619_v40 = vrot.slane %v2617_v32, 4  ;;  %v2074_v43 = vpack.c.b16 %v2043_v18, %v2042_v31  ;;  %v1936_v17 = vrot.slane %v6326_v12, 5  ;;  %v5590_v39 = vld [vmem:[#allocation2 + $0xc] sm:$0xff] }
  0xd0   : > { %v1027_v13 = vld [vmem:[#allocation2 + $0x24] sm:$0xf]  ;;  %v2610_v46 = vor.u32 %v2609_v15, %v2606_v28  ;;  %v2623_v54 = vshll.u32 %v2557_v44, 16  ;;  %v5252_v63 = vrot.slane %v1877_v50, 9  ;;  %v1939_v4 = vrot.slane %v6330_v47, 5 }
  0xd1   : > { %v1508_v22 = vpack.c.b16 %v1492_v7, %v1491_v45  ;;  %v6517_v57 = vld [vmem:[#allocation2 + $0x28] sm:$0xf]  ;;  %v1147_v24 = vshrl.u32 %v1027_v13, 16  ;;  %v1150_v26 = vshll.u32 %v1027_v13, 16  ;;  %v2620_v6 = vor.u32 %v2619_v40, %v2615_v25  ;;  %v5573_v40 = vld [vmem:[#allocation2 + $0x18] sm:$0xff] }
  0xd2   : > { %v6519_v5 = vld [vmem:[#allocation2 + $0x2c] sm:$0x1]  ;;  %v1156_v2 = vshll.u32 %v6517_v57, 16  ;;  %v1160_v29 = vshrl.u32 %v6517_v57, 16  ;;  %v1938_v3 = vrot.slane %v1936_v17, 4  ;;  %v2611_v45 = vrot.slane %v2610_v46, 4 }
  0xd3   : > { %5166 = vmatmul.msk.bf16.gmra.mxu3 %vm1515_vm12, %v1508_v22  ;;  %v1149_v60 = vrot.slane %v1147_v24, 4  ;;  %v1152_v33 = vrot.slane %v1150_v26, 5  ;;  %v1166_v34 = vshll.u32 %v6519_v5, 16  ;;  %v2621_v8 = vrot.slane %v2620_v6, 4  ;;  %v2561_v50 = vld [vmem:[#allocation2 + $0x24] sm:$0xf] }
  0xd4   : > { %v1158_v35 = vrot.slane %v1156_v2, 5  ;;  %v1162_v14 = vrot.slane %v1160_v29, 4  ;;  %v2625_v7 = vrot.slane %v2623_v54, 5  ;;  %v1943_v10 = vrot.slane %v6420_v19, 5 }
  0xd5   : > { %v1153_v36 = vor.u32 %v1152_v33, %v1149_v60  ;;  %v1168_v20 = vrot.slane %v1166_v34, 5  ;;  %v1946_v11 = vrot.slane %v6426_v48, 5  ;;  %v1937_v13 = vsel %vm6504_vm15, %v5252_v63, %v1936_v17 }
  0xd6   : > { %v1163_v37 = vor.u32 %v1162_v14, %v1158_v35  ;;  %v1940_v47 = vsel %vm6504_vm15, %v1938_v3, %v1939_v4  ;;  %v5253_v16 = vrot.slane %v1878_v51, 9  ;;  %v1945_v21 = vrot.slane %v1943_v10, 4  ;;  %v1879_v51 = vld [vmem:[#allocation2 + $0x24] sm:$0xe] }
  0xd7   : > { %v1154_v42 = vrot.slane %v1153_v36, 4  ;;  %v2616_v22 = vsel %vm6152_vm11, %v2611_v45, %v2615_v25  ;;  %v2626_v24 = vsel %vm6152_vm11, %v2621_v8, %v2625_v7  ;;  %v2628_v26 = vshrl.u32 %v2558_v9, 16  ;;  %v2563_v45 = vld [vmem:[#allocation2 + $0x2c] sm:$0x1] }
  0xd8   : > { %v1164_v38 = vrot.slane %v1163_v37, 4  ;;  %v1944_v19 = vsel %vm6504_vm15, %v5253_v16, %v1943_v10  ;;  %v2044_v48 = vunpack.c.l.b16 %v1937_v13  ;;  %v2045_v27 = vunpack.c.l.b16 %v1940_v47  ;;  %v5574_v47 = vld [vmem:[#allocation2 + $0x24] sm:$0xff] }
  0xd9   : > { %v1159_v49 = vsel %vm6152_vm11, %v1154_v42, %v1158_v35  ;;  %v1947_v2 = vsel %vm6504_vm15, %v1945_v21, %v1946_v11  ;;  %v2046_v29 = vunpack.c.l.b16 %v1944_v19  ;;  %v2631_v31 = vshll.u32 %v2558_v9, 16  ;;  %v2564_v19 = vld [vmem:[#allocation2 + $0x30] sm:$0xf] }
  0xda   : > { %v1169_v52 = vsel %vm6152_vm11, %v1164_v38, %v1168_v20  ;;  %v1467_v53 = vunpack.c.l.b16 %v1159_v49  ;;  %v2637_v32 = vshll.u32 %v2559_v30, 16  ;;  %v2641_v60 = vshrl.u32 %v2559_v30, 16  ;;  %v2560_v20 = vld [vmem:[#allocation2 + $0x20] sm:$0x1]  ;;  %v5591_v38 = vld [vmem:[#allocation2 + $0x18] sm:$0xff] }
  0xdb   : > { %v1468_v55 = vunpack.c.l.b16 %v1169_v52  ;;  %5271 = vmatmul.msk.bf16.vlgmr.msrb.gmra.mxu2 %vm1515_vm12, %v2074_v43  ;;  %v2047_v33 = vunpack.c.l.b16 %v1947_v2  ;;  %v2990_v18 = vunpack.c.l.b16 %v2616_v22  ;;  %v2991_v35 = vunpack.c.l.b16 %v2626_v24  ;;  %v2562_v52 = vld [vmem:[#allocation2 + $0x28] sm:$0xf] }
  0xdc   : > { %v2075_v14 = vpack.c.b16 %v2045_v27, %v2044_v48  ;;  %v2630_v36 = vrot.slane %v2628_v26, 4  ;;  %v2633_v28 = vrot.slane %v2631_v31, 5  ;;  %v2639_v15 = vrot.slane %v2637_v32, 5  ;;  %v5592_v24 = vld [vmem:[#allocation2 + $0x24] sm:$0xff] }
  0xdd   : > { %v1496_v12 = vpack.c.b16 %v1468_v55, %v1467_v53  ;;  %v2076_v34 = vpack.c.b16 %v2047_v33, %v2046_v29  ;;  %v2643_v37 = vrot.slane %v2641_v60, 4  ;;  %v3022_v25 = vpack.c.b16 %v2991_v35, %v2990_v18  ;;  %v2565_v29 = vld [vmem:[#allocation2 + $0x34] sm:$0xf] }
  0xde   : > { %v2634_v42 = vor.u32 %v2633_v28, %v2630_v36  ;;  %v2647_v44 = vshll.u32 %v2560_v20, 16  ;;  %v2652_v53 = vshrl.u32 %v2561_v50, 16  ;;  %v2655_v6 = vshll.u32 %v2561_v50, 16  ;;  %v6571_v28 = vpop.f32.mrf.mxu1  ;;  %v5575_v50 = vld [vmem:[#allocation2 + $0x30] sm:$0xff] }
  0xdf   : > { %5154 = vmatmul.msk.bf16.gmra.mxu0 %vm1515_vm12, %v1496_v12  ;;  %5236 = vmatmul.msk.bf16.gmra.mxu1 %vm1515_vm12, %v5572_v61  ;;  %v2644_v43 = vor.u32 %v2643_v37, %v2639_v15  ;;  %v2661_v61 = vshll.u32 %v2562_v52, 16  ;;  %v2665_v63 = vshrl.u32 %v2562_v52, 16  ;;  %v1950_v9 = vrot.slane %v6517_v57, 5 }
  0xe0   : > { %v2635_v17 = vrot.slane %v2634_v42, 4  ;;  %v2649_v46 = vrot.slane %v2647_v44, 5  ;;  %v2654_v12 = vrot.slane %v2652_v53, 4  ;;  %v2671_v13 = vshll.u32 %v2563_v45, 16  ;;  %v2567_v45 = vld [vmem:[#allocation2 + $0x3c] sm:$0xf] }
  0xe1   : > { %v2645_v49 = vrot.slane %v2644_v43, 4  ;;  %v2663_v8 = vrot.slane %v2661_v61, 5  ;;  %v2667_v7 = vrot.slane %v2665_v63, 4  ;;  %v5254_v30 = vrot.slane %v1879_v51, 9  ;;  %v5718_v43 = vld [vmem:[#allocation2 + $0x34] sm:$0xf]  ;;  %v6584_v51 = vpop.f32.mrf.mxu2 }
  0xe2   : > { %v2640_v54 = vsel %vm6152_vm11, %v2635_v17, %v2639_v15  ;;  %v1952_v21 = vrot.slane %v1950_v9, 4  ;;  %v1953_v22 = vrot.slane %v6519_v5, 5  ;;  %v2673_v26 = vrot.slane %v2671_v13, 5  ;;  %v5593_v63 = vld [vmem:[#allocation2 + $0x30] sm:$0xff] }
  0xe3   : > { %5355 = vmatmul.msk.bf16.vlgmr.msrb.gmra.mxu3 %vm1515_vm12, %v5590_v39  ;;  %v2650_v55 = vsel %vm6152_vm11, %v2645_v49, %v2649_v46  ;;  %v2992_v3 = vunpack.c.l.b16 %v2640_v54  ;;  %v2657_v39 = vrot.slane %v2655_v6, 5  ;;  %v2668_v16 = vor.u32 %v2667_v7, %v2663_v8  ;;  %v5719_v54 = vld [vmem:[#allocation2 + $0x38] sm:$0x1]  ;;  %v2568_v7 = vld [vmem:[#allocation2 + $0x40] sm:$0xf] }
  0xe4   : > { %v2993_v4 = vunpack.c.l.b16 %v2650_v55  ;;  %v1951_v27 = vsel %vm6504_vm15, %v5254_v30, %v1950_v9  ;;  %v1954_v2 = vsel %vm6504_vm15, %v1952_v21, %v1953_v22  ;;  %v2676_v31 = vshrl.u32 %v2564_v19, 16 }
  0xe5   : > { %v2658_v11 = vor.u32 %v2657_v39, %v2654_v12  ;;  %v2669_v48 = vrot.slane %v2668_v16, 4  ;;  %v2679_v32 = vshll.u32 %v2564_v19, 16  ;;  %v2048_v5 = vunpack.c.l.b16 %v1951_v27 }
  0xe6   : > { %v3023_v10 = vpack.c.b16 %v2993_v4, %v2992_v3  ;;  %v2049_v60 = vunpack.c.l.b16 %v1954_v2  ;;  %v2685_v18 = vshll.u32 %v2565_v29, 16  ;;  %v2689_v35 = vshrl.u32 %v2565_v29, 16 }
  0xe7   : > { %v2659_v57 = vrot.slane %v2658_v11, 4  ;;  %v2681_v36 = vrot.slane %v2679_v32, 5  ;;  %v1957_v44 = vrot.slane %v5718_v43, 5  ;;  %v1960_v55 = vrot.slane %v5719_v54, 5  ;;  %v2570_v43 = vld [vmem:[#allocation2 + $0x48] sm:$0xf] }
  0xe8   : > { %v2077_v20 = vpack.c.b16 %v2049_v60, %v2048_v5  ;;  %v2691_v42 = vrot.slane %v2689_v35, 4  ;;  %v2700_v13 = vshrl.u32 %v2567_v45, 16  ;;  %v2709_v30 = vshll.u32 %v2568_v7, 16  ;;  %v1881_v5 = vld [vmem:[#allocation2 + $0x3c] sm:$0xe]  ;;  %v6591_v60 = vpop.f32.mrf.mxu3 }
  0xe9   : > { %v2664_v33 = vsel %vm6152_vm11, %v2659_v57, %v2663_v8  ;;  %v1959_v6 = vrot.slane %v1957_v44, 4  ;;  %v6580_v8 = vpop.f32.mrf.mxu1  ;;  %v2713_v21 = vshrl.u32 %v2568_v7, 16  ;;  %v5576_v35 = vld [vmem:[#allocation2 + $0x3c] sm:$0xff] }
  0xea   : > { %v2994_v15 = vunpack.c.l.b16 %v2664_v33  ;;  %v2702_v19 = vrot.slane %v2700_v13, 4  ;;  %v2711_v27 = vrot.slane %v2709_v30, 5  ;;  %v2572_v13 = vld [vmem:[#allocation2 + $0x50] sm:$0x1] }
  0xeb   : > { %5272 = vmatmul.msk.bf16.gmra.mxu2 %vm1515_vm12, %v2075_v14  ;;  %v2678_v14 = vrot.slane %v2676_v31, 4  ;;  %v1961_v39 = vsel %vm6504_vm15, %v1959_v6, %v1960_v55  ;;  %v2715_v2 = vrot.slane %v2713_v21, 4  ;;  %v5720_v31 = vld [vmem:[#allocation2 + $0x40] sm:$0xf]  ;;  %v2727_v6 = vshll.u32 %v2570_v43, 16 }
  0xec   : > { %v2051_v11 = vunpack.c.l.b16 %v1961_v39  ;;  %v1964_v32 = vrot.slane %v5720_v31, 5  ;;  %v5722_v21 = vld [vmem:[#allocation2 + $0x4c] sm:$0xf] }
  0xed   : > { %v2682_v17 = vor.u32 %v2681_v36, %v2678_v14  ;;  %v2716_v14 = vor.u32 %v2715_v2, %v2711_v27  ;;  %v6594_v36 = vpop.f32.mrf.mxu2 }
  0xef   : > { %5375 = vmatmul.msk.bf16.vlgmr.msrb.gmra.mxu0 %vm1515_vm12, %v3022_v25  ;;  %5237 = vmatmul.msk.bf16.gmra.mxu1 %vm1515_vm12, %v5573_v40  ;;  %v2566_v25 = vld [vmem:[#allocation2 + $0x38] sm:$0x1]  ;;  %v2687_v40 = vrot.slane %v2685_v18, 5  ;;  %v2683_v61 = vrot.slane %v2682_v17, 4  ;;  %v2717_v17 = vrot.slane %v2716_v14, 4 }
  0xf0   : > { %v2695_v46 = vshll.u32 %v2566_v25, 16 }
  0xf1   : > { %v2692_v52 = vor.u32 %v2691_v42, %v2687_v40  ;;  %v2688_v9 = vsel %vm6152_vm11, %v2683_v61, %v2687_v40  ;;  %v6589_v29 = vpop.f32.mrf.mxu1  ;;  %v5594_v40 = vld [vmem:[#allocation2 + $0x3c] sm:$0xff] }
  0xf2   : > { %v2697_v4 = vrot.slane %v2695_v46, 5  ;;  %v2996_v22 = vunpack.c.l.b16 %v2688_v9 }
  0xf3   : > { %5356 = vmatmul.msk.bf16.gmra.mxu3 %vm1515_vm12, %v5591_v38  ;;  %v1880_v38 = vld [vmem:[#allocation2 + $0x30] sm:$0xe]  ;;  %v2693_v3 = vrot.slane %v2692_v52, 4  ;;  %v2571_v52 = vld [vmem:[#allocation2 + $0x4c] sm:$0xf] }
  0xf4   : > { %v5255_v53 = vrot.slane %v1880_v38, 9 }
  0xf5   : > { %v2698_v16 = vsel %vm6152_vm11, %v2693_v3, %v2697_v4  ;;  %v6611_v3 = vpop.f32.mrf.mxu3  ;;  %v2733_v4 = vshll.u32 %v2571_v52, 16 }
  0xf6   : > { %v1958_v12 = vsel %vm6504_vm15, %v5255_v53, %v1957_v44  ;;  %v6598_v44 = vpop.f32.mrf.mxu0  ;;  %v2724_v53 = vshrl.u32 %v2570_v43, 16 }
  0xf8   : > { %v2726_v39 = vrot.slane %v2724_v53, 4  ;;  %v6613_v7 = vpop.f32.mrf.mxu2 }
  0xfb   : > { %5273 = vmatmul.msk.bf16.gmra.mxu2 %vm1515_vm12, %v2076_v34  ;;  %v2674_v34 = vsel %vm6152_vm11, %v2669_v48, %v2673_v26  ;;  %v2569_v48 = vld [vmem:[#allocation2 + $0x44] sm:$0x1] }
  0xfc   : > { %v2995_v37 = vunpack.c.l.b16 %v2674_v34  ;;  %v2719_v18 = vshll.u32 %v2569_v48, 16  ;;  %v2743_v48 = vshll.u32 %v2572_v13, 16  ;;  %v1978_v13 = vrot.slane %v6451_v23, 5  ;;  %v5596_v23 = vld [vmem:[#allocation2 + $0x54] sm:$0xff] }
  0xfe   : > { %v3024_v49 = vpack.c.b16 %v2995_v37, %v2994_v15  ;;  %v5256_v15 = vrot.slane %v1881_v5, 9  ;;  %v1966_v37 = vrot.slane %v1964_v32, 4  ;;  %v2721_v42 = vrot.slane %v2719_v18, 5  ;;  %v5723_v5 = vld [vmem:[#allocation2 + $0x50] sm:$0x1] }
  0xff   : > { %5376 = vmatmul.msk.bf16.gmra.mxu0 %vm1515_vm12, %v3023_v10  ;;  %5238 = vmatmul.msk.bf16.gmra.mxu1 %vm1515_vm12, %v5574_v47  ;;  %v2050_v10 = vunpack.c.l.b16 %v1958_v12  ;;  %v2703_v47 = vshll.u32 %v2567_v45, 16  ;;  %v2737_v12 = vshrl.u32 %v2571_v52, 16  ;;  %v2729_v45 = vrot.slane %v2727_v6, 5 }
 0x101   : > { %v2078_v26 = vpack.c.b16 %v2051_v11, %v2050_v10  ;;  %v2705_v57 = vrot.slane %v2703_v47, 5  ;;  %v2735_v47 = vrot.slane %v2733_v4, 5 }
 0x103   : > { %5357 = vmatmul.msk.bf16.gmra.mxu3 %vm1515_vm12, %v5592_v24  ;;  %v2997_v24 = vunpack.c.l.b16 %v2698_v16  ;;  %v2706_v34 = vor.u32 %v2705_v57, %v2702_v19  ;;  %v2739_v16 = vrot.slane %v2737_v12, 4  ;;  %v2730_v19 = vor.u32 %v2729_v45, %v2726_v39 }
 0x105   : > { %v3025_v33 = vpack.c.b16 %v2997_v24, %v2996_v22  ;;  %v2707_v38 = vrot.slane %v2706_v34, 4  ;;  %v1971_v22 = vrot.slane %v5722_v21, 5  ;;  %v1882_v24 = vld [vmem:[#allocation2 + $0x48] sm:$0xe]  ;;  %v2740_v2 = vor.u32 %v2739_v16, %v2735_v47  ;;  %v6620_v18 = vpop.f32.mrf.mxu3 }
 0x106   : > { %v5257_v31 = vrot.slane %v1882_v24, 9  ;;  %v2731_v34 = vrot.slane %v2730_v19, 4  ;;  %v5578_v19 = vld [vmem:[#allocation2 + $0x54] sm:$0xff] }
 0x107   : > { %v2712_v61 = vsel %vm6152_vm11, %v2707_v38, %v2711_v27  ;;  %v5577_v27 = vld [vmem:[#allocation2 + $0x48] sm:$0xff]  ;;  %v2741_v14 = vrot.slane %v2740_v2, 4  ;;  %v1980_v2 = vrot.slane %v1978_v13, 4 }
 0x108   : > { %v2998_v9 = vunpack.c.l.b16 %v2712_v61  ;;  %v2736_v43 = vsel %vm6152_vm11, %v2731_v34, %v2735_v47  ;;  %v1883_v47 = vld [vmem:[#allocation2 + $0x54] sm:$0xe] }
 0x109   : > { %v3000_v61 = vunpack.c.l.b16 %v2736_v43 }
 0x10b   : > { %5274 = vmatmul.msk.bf16.gmra.mxu2 %vm1515_vm12, %v2077_v20  ;;  %v5721_v20 = vld [vmem:[#allocation2 + $0x44] sm:$0x1] }
 0x10c   : > { %v1967_v25 = vrot.slane %v5721_v20, 5  ;;  %v1972_v20 = vsel %vm6504_vm15, %v5257_v31, %v1971_v22  ;;  %v1981_v31 = vrot.slane %v6453_v41, 5 }
 0x10d   : > { %v6639_v45 = vpop.f32.mrf.mxu3 }
 0x10e   : > { %v1968_v46 = vsel %vm6504_vm15, %v1966_v37, %v1967_v25  ;;  %v6624_v37 = vpop.f32.mrf.mxu2 }
 0x10f   : > { %5377 = vmatmul.msk.bf16.gmra.mxu0 %vm1515_vm12, %v3024_v49  ;;  %5239 = vmatmul.msk.bf16.gmra.mxu1 %vm1515_vm12, %v5575_v50  ;;  %v1965_v49 = vsel %vm6504_vm15, %v5256_v15, %v1964_v32  ;;  %v6604_v50 = vpop.f32.mrf.mxu1  ;;  %v2053_v55 = vunpack.c.l.b16 %v1968_v46  ;;  %v1973_v32 = vrot.slane %v1971_v22, 4  ;;  %v2745_v15 = vrot.slane %v2743_v48, 5 }
 0x110   : > { %v2052_v54 = vunpack.c.l.b16 %v1965_v49 }
 0x111   : > { %v2746_v6 = vsel %vm6152_vm11, %v2741_v14, %v2745_v15  ;;  %v1982_v15 = vsel %vm6504_vm15, %v1980_v2, %v1981_v31 }
 0x112   : > { %v2079_v11 = vpack.c.b16 %v2053_v55, %v2052_v54  ;;  %v2057_v43 = vunpack.c.l.b16 %v1982_v15 }
 0x113   : > { %5358 = vmatmul.msk.bf16.gmra.mxu3 %vm1515_vm12, %v5593_v63  ;;  %v2722_v63 = vsel %vm6152_vm11, %v2717_v17, %v2721_v42  ;;  %v2574_v42 = vld [vmem:[#allocation2 + $0x58] sm:$0xf]  ;;  %v2054_v17 = vunpack.c.l.b16 %v1972_v20  ;;  %v2577_v20 = vld [vmem:[#allocation2 + $0x64] sm:$0xf] }
 0x114   : > { %v2999_v10 = vunpack.c.l.b16 %v2722_v63  ;;  %v2757_v54 = vshll.u32 %v2574_v42, 16  ;;  %v2761_v55 = vshrl.u32 %v2574_v42, 16  ;;  %v3001_v63 = vunpack.c.l.b16 %v2746_v6 }
 0x115   : > { %v2785_v6 = vshrl.u32 %v2577_v20, 16 }
 0x116   : > { %v3026_v57 = vpack.c.b16 %v2999_v10, %v2998_v9  ;;  %v2575_v9 = vld [vmem:[#allocation2 + $0x5c] sm:$0x1]  ;;  %v2759_v10 = vrot.slane %v2757_v54, 5  ;;  %v3027_v21 = vpack.c.b16 %v3001_v63, %v3000_v61 }
 0x117   : > { %v6615_v30 = vpop.f32.mrf.mxu1  ;;  %v2767_v24 = vshll.u32 %v2575_v9, 16 }
 0x11b   : > { %5275 = vmatmul.msk.bf16.gmra.mxu2 %vm1515_vm12, %v2078_v26  ;;  %v6617_v26 = vpop.f32.mrf.mxu0 }
 0x11f   : > { %5378 = vmatmul.msk.bf16.gmra.mxu0 %vm1515_vm12, %v3025_v33  ;;  %5240 = vmatmul.msk.bf16.gmra.mxu1 %vm1515_vm12, %v5576_v35  ;;  %v1974_v33 = vrot.slane %v5723_v5, 5  ;;  %v5595_v35 = vld [vmem:[#allocation2 + $0x48] sm:$0xff]  ;;  %v6632_v38 = vpop.f32.mrf.mxu1  ;;  %v2769_v5 = vrot.slane %v2767_v24, 5 }
 0x120   : > { %v5725_v24 = vld [vmem:[#allocation2 + $0x68] sm:$0x1] }
 0x121   : > { %v1975_v25 = vsel %vm6504_vm15, %v1973_v32, %v1974_v33  ;;  %v2576_v33 = vld [vmem:[#allocation2 + $0x60] sm:$0xf] }
 0x122   : > { %v2055_v49 = vunpack.c.l.b16 %v1975_v25  ;;  %v2772_v41 = vshrl.u32 %v2576_v33, 16 }
 0x123   : > { %5359 = vmatmul.msk.bf16.gmra.mxu3 %vm1515_vm12, %v5594_v40  ;;  %v2573_v40 = vld [vmem:[#allocation2 + $0x54] sm:$0xf]  ;;  %v6635_v53 = vpop.f32.mrf.mxu0  ;;  %v6642_v16 = vpop.f32.mrf.mxu2 }
 0x124   : > { %v2748_v46 = vshrl.u32 %v2573_v40, 16  ;;  %v2751_v52 = vshll.u32 %v2573_v40, 16  ;;  %v2080_v4 = vpack.c.b16 %v2055_v49, %v2054_v17  ;;  %v2775_v40 = vshll.u32 %v2576_v33, 16 }
 0x126   : > { %v2750_v12 = vrot.slane %v2748_v46, 4  ;;  %v2753_v39 = vrot.slane %v2751_v52, 5  ;;  %v2781_v52 = vshll.u32 %v2577_v20, 16  ;;  %v2777_v61 = vrot.slane %v2775_v40, 5  ;;  %v5597_v20 = vld [vmem:[#allocation2 + $0x60] sm:$0xff] }
 0x128   : > { %v2754_v22 = vor.u32 %v2753_v39, %v2750_v12  ;;  %v2783_v9 = vrot.slane %v2781_v52, 5 }
 0x12a   : > { %v2755_v34 = vrot.slane %v2754_v22, 4 }
 0x12b   : > { %5276 = vmatmul.msk.bf16.gmra.mxu2 %vm1515_vm12, %v2079_v11  ;;  %v2763_v11 = vrot.slane %v2761_v55, 4  ;;  %v6648_v32 = vpop.f32.mrf.mxu0  ;;  %v6663_v46 = vpop.f32.mrf.mxu2  ;;  %v2774_v55 = vrot.slane %v2772_v41, 4  ;;  %v2579_v41 = vld [vmem:[#allocation2 + $0x6c] sm:$0xf] }
 0x12c   : > { %v2760_v17 = vsel %vm6152_vm11, %v2755_v34, %v2759_v10 }
 0x12d   : > { %v3002_v63 = vunpack.c.l.b16 %v2760_v17  ;;  %v2778_v22 = vor.u32 %v2777_v61, %v2774_v55  ;;  %v2799_v55 = vshll.u32 %v2579_v41, 16 }
 0x12f   : > { %5379 = vmatmul.msk.bf16.gmra.mxu0 %vm1515_vm12, %v3026_v57  ;;  %5241 = vmatmul.msk.bf16.gmra.mxu1 %vm1515_vm12, %v5577_v27  ;;  %v2764_v57 = vor.u32 %v2763_v11, %v2759_v10  ;;  %v5258_v27 = vrot.slane %v1883_v47, 9  ;;  %v2787_v11 = vrot.slane %v2785_v6, 4  ;;  %v2578_v47 = vld [vmem:[#allocation2 + $0x68] sm:$0x1]  ;;  %v2796_v6 = vshrl.u32 %v2579_v41, 16 }
 0x130   : > { %v6656_v25 = vpop.f32.mrf.mxu3 }
 0x131   : > { %v1979_v14 = vsel %vm6504_vm15, %v5258_v27, %v1978_v13  ;;  %v5724_v13 = vld [vmem:[#allocation2 + $0x64] sm:$0xf]  ;;  %v2788_v31 = vor.u32 %v2787_v11, %v2783_v9 }
 0x132   : > { %v2056_v42 = vunpack.c.l.b16 %v1979_v14  ;;  %v1985_v10 = vrot.slane %v5724_v13, 5  ;;  %v5579_v27 = vld [vmem:[#allocation2 + $0x60] sm:$0xff]  ;;  %v2779_v14 = vrot.slane %v2778_v22, 4  ;;  %v2798_v22 = vrot.slane %v2796_v6, 4 }
 0x133   : > { %5360 = vmatmul.msk.bf16.gmra.mxu3 %vm1515_vm12, %v5595_v35  ;;  %v2765_v35 = vrot.slane %v2764_v57, 4  ;;  %v6667_v39 = vpop.f32.mrf.mxu0  ;;  %v2789_v40 = vrot.slane %v2788_v31, 4 }
 0x134   : > { %v2081_v12 = vpack.c.b16 %v2057_v43, %v2056_v42  ;;  %v1987_v34 = vrot.slane %v1985_v10, 4 }
 0x135   : > { %v2770_v49 = vsel %vm6152_vm11, %v2765_v35, %v2769_v5 }
 0x138   : > { %v6670_v2 = vpop.f32.mrf.mxu3 }
 0x139   : > { %7595 = vst [vmem:[#allocation10_spill] sm:$0xff] %v6670_v2 }
 0x13b   : > { %5277 = vmatmul.msk.bf16.gmra.mxu2 %vm1515_vm12, %v2080_v4  ;;  %v3003_v4 = vunpack.c.l.b16 %v2770_v49  ;;  %v2580_v49 = vld [vmem:[#allocation2 + $0x70] sm:$0xf]  ;;  %v6681_v52 = vpop.f32.mrf.mxu0 }
 0x13c   : > { %v6645_v48 = vpop.f32.mrf.mxu1 }
 0x13d   : > { %v3028_v57 = vpack.c.b16 %v3003_v4, %v3002_v63  ;;  %v2805_v4 = vshll.u32 %v2580_v49, 16 }
 0x13f   : > { %5380 = vmatmul.msk.bf16.gmra.mxu0 %vm1515_vm12, %v3027_v21  ;;  %5242 = vmatmul.msk.bf16.gmra.mxu1 %vm1515_vm12, %v5578_v19  ;;  %v1884_v21 = vld [vmem:[#allocation2 + $0x60] sm:$0xe]  ;;  %v1988_v19 = vrot.slane %v5725_v24, 5  ;;  %v2801_v24 = vrot.slane %v2799_v55, 5 }
 0x140   : > { %v5259_v33 = vrot.slane %v1884_v21, 9 }
 0x141   : > { %v1989_v17 = vsel %vm6504_vm15, %v1987_v34, %v1988_v19  ;;  %v2802_v34 = vor.u32 %v2801_v24, %v2798_v22  ;;  %v2582_v24 = vld [vmem:[#allocation2 + $0x78] sm:$0xf] }
 0x142   : > { %v1986_v43 = vsel %vm6504_vm15, %v5259_v33, %v1985_v10  ;;  %v2059_v63 = vunpack.c.l.b16 %v1989_v17  ;;  %v1885_v33 = vld [vmem:[#allocation2 + $0x6c] sm:$0xe] }
 0x143   : > { %5361 = vmatmul.msk.bf16.gmra.mxu3 %vm1515_vm12, %v5596_v23  ;;  %v2791_v23 = vshll.u32 %v2578_v47, 16  ;;  %v2058_v61 = vunpack.c.l.b16 %v1986_v43 }
 0x144   : > { %v6665_v54 = vpop.f32.mrf.mxu1 }
 0x145   : > { %v2793_v42 = vrot.slane %v2791_v23, 5  ;;  %v2082_v19 = vpack.c.b16 %v2059_v63, %v2058_v61  ;;  %v5726_v23 = vld [vmem:[#allocation2 + $0x70] sm:$0xf]  ;;  %v2803_v63 = vrot.slane %v2802_v34, 4 }
 0x147   : > { %v2794_v11 = vsel %vm6152_vm11, %v2789_v40, %v2793_v42  ;;  %v5580_v40 = vld [vmem:[#allocation2 + $0x6c] sm:$0xff]  ;;  %v5727_v42 = vld [vmem:[#allocation2 + $0x74] sm:$0x1] }
 0x148   : > { %v1995_v43 = vrot.slane %v5727_v42, 5 }
 0x14b   : > { %5278 = vmatmul.msk.bf16.gmra.mxu2 %vm1515_vm12, %v2081_v12  ;;  %v2809_v12 = vshrl.u32 %v2580_v49, 16 }
 0x14c   : > { %v1796_v5 = vpop.f32.mrf.mxu1 }
 0x14d   : > { %v1797_v35 = vadd.f32 %v1796_v5, %v6598_v44  ;;  %v2784_v44 = vsel %vm6152_vm11, %v2779_v14, %v2783_v9  ;;  %v3005_v9 = vunpack.c.l.b16 %v2794_v11  ;;  %v2811_v31 = vrot.slane %v2809_v12, 4  ;;  %v5598_v11 = vld [vmem:[#allocation2 + $0x6c] sm:$0xff] }
 0x14e   : > { %v6673_v15 = vpop.f32.mrf.mxu2  ;;  %v3004_v10 = vunpack.c.l.b16 %v2784_v44  ;;  %v1992_v5 = vrot.slane %v5726_v23, 5  ;;  %v5260_v44 = vrot.slane %v1885_v33, 9  ;;  %v2823_v23 = vshll.u32 %v2582_v24, 16 }
 0x14f   : > { %5381 = vmatmul.msk.bf16.gmra.mxu0 %vm1515_vm12, %v3028_v57  ;;  %5243 = vmatmul.msk.bf16.gmra.mxu1 %vm1515_vm12, %v5579_v27  ;;  %v2581_v57 = vld [vmem:[#allocation2 + $0x74] sm:$0x1]  ;;  %v2807_v27 = vrot.slane %v2805_v4, 5 }
 0x150   : > { %v2815_v14 = vshll.u32 %v2581_v57, 16  ;;  %v1994_v6 = vrot.slane %v1992_v5, 4 }
 0x151   : > { %v2812_v41 = vor.u32 %v2811_v31, %v2807_v27  ;;  %v2808_v57 = vsel %vm6152_vm11, %v2803_v63, %v2807_v27  ;;  %v2820_v31 = vshrl.u32 %v2582_v24, 16 }
 0x152   : > { %v2817_v4 = vrot.slane %v2815_v14, 5 }
 0x153   : > { %5362 = vmatmul.msk.bf16.gmra.mxu3 %vm1515_vm12, %v5597_v20  ;;  %v3029_v20 = vpack.c.b16 %v3005_v9, %v3004_v10  ;;  %v2813_v10 = vrot.slane %v2812_v41, 4  ;;  %v2583_v9 = vld [vmem:[#allocation2 + $0x7c] sm:$0xf] }
 0x154   : > { %v1798_v13 = vpop.f32.mrf.mxu1  ;;  %v2829_v33 = vshll.u32 %v2583_v9, 16 }
 0x155   : > { %v1799_v42 = vadd.f32 %v1798_v13, %v6617_v26  ;;  %v5581_v13 = vld [vmem:[#allocation2 + $0x78] sm:$0xff] }
 0x156   : > { %v6688_v47 = vpop.f32.mrf.mxu3  ;;  %v6690_v21 = vpop.f32.mrf.mxu2  ;;  %v2831_v63 = vrot.slane %v2829_v33, 5 }
 0x157   : > { %7596 = vst [vmem:[#allocation11_spill] sm:$0xff] %v6688_v47 }
 0x15b   : > { %5279 = vmatmul.msk.bf16.gmra.mxu2 %vm1515_vm12, %v2082_v19  ;;  %v1993_v19 = vsel %vm6504_vm15, %v5260_v44, %v1992_v5  ;;  %v2822_v44 = vrot.slane %v2820_v31, 4 }
 0x15c   : > { %v6693_v17 = vpop.f32.mrf.mxu0  ;;  %v1801_v49 = vpop.f32.mrf.mxu1  ;;  %v2060_v34 = vunpack.c.l.b16 %v1993_v19 }
 0x15d   : > { %v6696_v55 = vadd.f32 %v1801_v49, %v6635_v53  ;;  %v1996_v53 = vsel %vm6504_vm15, %v1994_v6, %v1995_v43  ;;  %v2825_v6 = vrot.slane %v2823_v23, 5 }
 0x15e   : > { %v6698_v61 = vpop.f32.mrf.mxu3  ;;  %v2153_v12 = vpop.f32.mrf.mxu2  ;;  %v2061_v14 = vunpack.c.l.b16 %v1996_v53 }
 0x15f   : > { %7597 = vst [vmem:[#allocation12_spill] sm:$0xff] %v6698_v61  ;;  %5382 = vmatmul.msk.bf16.gmra.mxu0 %vm1515_vm12, %v3029_v20  ;;  %v2233_v22 = vadd.f32 %v2153_v12, %v1797_v35  ;;  %5244 = vmatmul.msk.bf16.gmra.mxu1 %vm1515_vm12, %v5580_v40  ;;  %v2818_v35 = vsel %vm6152_vm11, %v2813_v10, %v2817_v4  ;;  %v2833_v20 = vshrl.u32 %v2583_v9, 16  ;;  %v3006_v40 = vunpack.c.l.b16 %v2808_v57  ;;  %v2584_v61 = vld [vmem:[#allocation2 + $0x80] sm:$0x1]  ;;  %v5728_v10 = vld [vmem:[#allocation2 + $0x7c] sm:$0xf] }
 0x160   : > { %v3007_v43 = vunpack.c.l.b16 %v2818_v35  ;;  %v2083_v24 = vpack.c.b16 %v2061_v14, %v2060_v34  ;;  %v1999_v19 = vrot.slane %v5728_v10, 5  ;;  %v1886_v9 = vld [vmem:[#allocation2 + $0x78] sm:$0xe]  ;;  %v2826_v53 = vor.u32 %v2825_v6, %v2822_v44  ;;  %v5729_v57 = vld [vmem:[#allocation2 + $0x80] sm:$0x1] }
 0x161   : > { %v2835_v4 = vrot.slane %v2833_v20, 4  ;;  %v2839_v47 = vshll.u32 %v2584_v61, 16  ;;  %v2002_v35 = vrot.slane %v5729_v57, 5  ;;  %v5261_v33 = vrot.slane %v1886_v9, 9  ;;  %v2585_v6 = vld [vmem:[#allocation2 + $0x84] sm:$0xf] }
 0x162   : > { %v3030_v2 = vpack.c.b16 %v3007_v43, %v3006_v40  ;;  %v5599_v43 = vld [vmem:[#allocation2 + $0x78] sm:$0xff] }
 0x163   : > { %5363 = vmatmul.msk.bf16.gmra.mxu3 %vm1515_vm12, %v5598_v11  ;;  %v2836_v26 = vor.u32 %v2835_v4, %v2831_v63  ;;  %v2844_v4 = vshrl.u32 %v2585_v6, 16 }
 0x164   : > { %v6711_v41 = vpop.f32.mrf.mxu0  ;;  %v1803_v5 = vpop.f32.mrf.mxu1 }
 0x165   : > { %v1804_v57 = vadd.f32 %v1803_v5, %v6648_v32 }
 0x166   : > { %v2443_v49 = vpop.f32.mrf.mxu3  ;;  %v2155_v27 = vpop.f32.mrf.mxu2 }
 0x167   : > { %v2523_v12 = vadd.f32 %v2443_v49, %v2233_v22  ;;  %v2234_v11 = vadd.f32 %v2155_v27, %v1799_v42  ;;  %v2001_v22 = vrot.slane %v1999_v19, 4  ;;  %v2827_v42 = vrot.slane %v2826_v53, 4 }
 0x168   : > { %v2841_v49 = vrot.slane %v2839_v47, 5  ;;  %v2837_v27 = vrot.slane %v2836_v26, 4 }
 0x169   : > { %v2832_v47 = vsel %vm6152_vm11, %v2827_v42, %v2831_v63 }
 0x16b   : > { %5280 = vmatmul.msk.bf16.gmra.mxu2 %vm1515_vm12, %v2083_v24  ;;  %v2586_v24 = vld [vmem:[#allocation2 + $0x88] sm:$0xf] }
 0x16c   : > { %v3101_v31 = vpop.f32.mrf.mxu0  ;;  %v1806_v23 = vpop.f32.mrf.mxu1  ;;  %v2857_v53 = vshrl.u32 %v2586_v24, 16 }
 0x16d   : > { %v6716_v34 = vadd.f32 %v1806_v23, %v6667_v39  ;;  %v6718_v14 = vadd.f32 %v3101_v31, %v2523_v12  ;;  %v2000_v39 = vsel %vm6504_vm15, %v5261_v33, %v1999_v19  ;;  %v2003_v12 = vsel %vm6504_vm15, %v2001_v22, %v2002_v35 }
 0x16e   : > { %v2445_v20 = vpop.f32.mrf.mxu3  ;;  %v2158_v61 = vpop.f32.mrf.mxu2  ;;  %v2062_v10 = vunpack.c.l.b16 %v2000_v39  ;;  %v2063_v9 = vunpack.c.l.b16 %v2003_v12  ;;  %v3008_v19 = vunpack.c.l.b16 %v2832_v47  ;;  %v2846_v22 = vrot.slane %v2844_v4, 4  ;;  %v1887_v12 = vld [vmem:[#allocation2 + $0x84] sm:$0xe] }
 0x16f   : > { %5383 = vmatmul.msk.bf16.gmra.mxu0 %vm1515_vm12, %v3030_v2  ;;  %v2524_v40 = vadd.f32 %v2445_v20, %v2234_v11  ;;  %v2235_v44 = vadd.f32 %v2158_v61, %v6696_v55  ;;  %5245 = vmatmul.msk.bf16.gmra.mxu1 %vm1515_vm12, %v5581_v13  ;;  %v2847_v2 = vshll.u32 %v2585_v6, 16  ;;  %v2853_v11 = vshll.u32 %v2586_v24, 16  ;;  %v2587_v6 = vld [vmem:[#allocation2 + $0x8c] sm:$0x1]  ;;  %v5730_v24 = vld [vmem:[#allocation2 + $0x88] sm:$0xf] }
 0x170   : > { %v2842_v55 = vsel %vm6152_vm11, %v2837_v27, %v2841_v49  ;;  %v2859_v27 = vrot.slane %v2857_v53, 4  ;;  %v2006_v39 = vrot.slane %v5730_v24, 5  ;;  %v5582_v47 = vld [vmem:[#allocation2 + $0x84] sm:$0xff] }
 0x171   : > { %v3009_v31 = vunpack.c.l.b16 %v2842_v55  ;;  %v2849_v20 = vrot.slane %v2847_v2, 5  ;;  %v2855_v42 = vrot.slane %v2853_v11, 5  ;;  %v5731_v55 = vld [vmem:[#allocation2 + $0x8c] sm:$0x1]  ;;  %v5262_v11 = vrot.slane %v1887_v12, 9 }
 0x173   : > { %5364 = vmatmul.msk.bf16.gmra.mxu3 %vm1515_vm12, %v5599_v43  ;;  %v2084_v43 = vpack.c.b16 %v2063_v9, %v2062_v10  ;;  %v2850_v32 = vor.u32 %v2849_v20, %v2846_v22  ;;  %v3031_v5 = vpack.c.b16 %v3009_v31, %v3008_v19  ;;  %v5600_v31 = vld [vmem:[#allocation2 + $0x84] sm:$0xff]  ;;  %v2588_v20 = vld [vmem:[#allocation2 + $0x90] sm:$0xf] }
 0x174   : > { %v3103_v26 = vpop.f32.mrf.mxu0  ;;  %v1808_v13 = vpop.f32.mrf.mxu1  ;;  %v2871_v12 = vshll.u32 %v2588_v20, 16 }
 0x175   : > { %v6734_v35 = vadd.f32 %v1808_v13, %v6681_v52  ;;  %v6736_v63 = vadd.f32 %v3103_v26, %v2524_v40  ;;  %v2860_v52 = vor.u32 %v2859_v27, %v2855_v42  ;;  %v2863_v40 = vshll.u32 %v2587_v6, 16 }
 0x176   : > { %v2448_v23 = vpop.f32.mrf.mxu3  ;;  %v2160_v33 = vpop.f32.mrf.mxu2  ;;  %v2009_v26 = vrot.slane %v5731_v55, 5  ;;  %v2851_v13 = vrot.slane %v2850_v32, 4  ;;  %v2868_v6 = vshrl.u32 %v2588_v20, 16  ;;  %v2590_v20 = vld [vmem:[#allocation2 + $0x98] sm:$0x1] }
 0x177   : > { %v2525_v49 = vadd.f32 %v2448_v23, %v2235_v44  ;;  %v2236_v61 = vadd.f32 %v2160_v33, %v1804_v57  ;;  %v2008_v44 = vrot.slane %v2006_v39, 4  ;;  %v2861_v23 = vrot.slane %v2860_v52, 4 }
 0x178   : > { %v2865_v33 = vrot.slane %v2863_v40, 5  ;;  %v2856_v27 = vsel %vm6152_vm11, %v2851_v13, %v2855_v42  ;;  %v2873_v13 = vrot.slane %v2871_v12, 5 }
 0x179   : > { %v3010_v55 = vunpack.c.l.b16 %v2856_v27  ;;  %v5583_v27 = vld [vmem:[#allocation2 + $0x90] sm:$0xff] }
 0x17b   : > { %5281 = vmatmul.msk.bf16.gmra.mxu2 %vm1515_vm12, %v2084_v43  ;;  %v2589_v43 = vld [vmem:[#allocation2 + $0x94] sm:$0xf] }
 0x17c   : > { %v3106_v4 = vpop.f32.mrf.mxu0  ;;  %v1811_v2 = vpop.f32.mrf.mxu1  ;;  %v2881_v52 = vshrl.u32 %v2589_v43, 16 }
 0x17d   : > { %v6740_v10 = vadd.f32 %v1811_v2, %v6693_v17  ;;  %v6742_v9 = vadd.f32 %v3106_v4, %v2525_v49  ;;  %v2007_v17 = vsel %vm6504_vm15, %v5262_v11, %v2006_v39  ;;  %v2010_v49 = vsel %vm6504_vm15, %v2008_v44, %v2009_v26 }
 0x17e   : > { %v2450_v53 = vpop.f32.mrf.mxu3  ;;  %v2163_v57 = vpop.f32.mrf.mxu2  ;;  %v2065_v24 = vunpack.c.l.b16 %v2010_v49  ;;  %v2870_v2 = vrot.slane %v2868_v6, 4 }
 0x17f   : > { %5384 = vmatmul.msk.bf16.gmra.mxu0 %vm1515_vm12, %v3031_v5  ;;  %v2526_v19 = vadd.f32 %v2450_v53, %v2236_v61  ;;  %v2237_v22 = vadd.f32 %v2163_v57, %v6716_v34  ;;  %5246 = vmatmul.msk.bf16.gmra.mxu1 %vm1515_vm12, %v5582_v47  ;;  %v2866_v61 = vsel %vm6152_vm11, %v2861_v23, %v2865_v33  ;;  %v2064_v34 = vunpack.c.l.b16 %v2007_v17  ;;  %v5732_v23 = vld [vmem:[#allocation2 + $0x94] sm:$0xf]  ;;  %v1888_v17 = vld [vmem:[#allocation2 + $0x90] sm:$0xe] }
 0x180   : > { %v2877_v5 = vshll.u32 %v2589_v43, 16  ;;  %v3011_v42 = vunpack.c.l.b16 %v2866_v61  ;;  %v2013_v33 = vrot.slane %v5732_v23, 5  ;;  %v2874_v43 = vor.u32 %v2873_v13, %v2870_v2 }
 0x181   : > { %v2085_v53 = vpack.c.b16 %v2065_v24, %v2064_v34 }
 0x182   : > { %v2879_v57 = vrot.slane %v2877_v5, 5  ;;  %v2015_v34 = vrot.slane %v2013_v33, 4 }
 0x183   : > { %5365 = vmatmul.msk.bf16.gmra.mxu3 %vm1515_vm12, %v5600_v31  ;;  %v2883_v31 = vrot.slane %v2881_v52, 4  ;;  %v2591_v52 = vld [vmem:[#allocation2 + $0x9c] sm:$0xf] }
 0x184   : > { %v3108_v32 = vpop.f32.mrf.mxu0  ;;  %v1813_v39 = vpop.f32.mrf.mxu1  ;;  %v2895_v23 = vshll.u32 %v2591_v52, 16 }
 0x185   : > { %v6757_v40 = vadd.f32 %v1813_v39, %v6711_v41  ;;  %v6759_v47 = vadd.f32 %v3108_v32, %v2526_v19  ;;  %v5733_v41 = vld [vmem:[#allocation2 + $0x98] sm:$0x1]  ;;  %v3032_v19 = vpack.c.b16 %v3011_v42, %v3010_v55  ;;  %v2884_v6 = vor.u32 %v2883_v31, %v2879_v57 }
 0x186   : > { %v2453_v26 = vpop.f32.mrf.mxu3  ;;  %v2165_v4 = vpop.f32.mrf.mxu2  ;;  %v2016_v49 = vrot.slane %v5733_v41, 5  ;;  %v2875_v55 = vrot.slane %v2874_v43, 4  ;;  %v2892_v31 = vshrl.u32 %v2591_v52, 16 }
 0x187   : > { %7598 = vst [vmem:[#allocation13_spill] sm:$0xff] %v6759_v47  ;;  %v2527_v11 = vadd.f32 %v2453_v26, %v2237_v22  ;;  %v2238_v44 = vadd.f32 %v2165_v4, %v6734_v35  ;;  %v2887_v22 = vshll.u32 %v2590_v20, 16  ;;  %v5263_v35 = vrot.slane %v1888_v17, 9  ;;  %v5601_v26 = vld [vmem:[#allocation2 + $0x90] sm:$0xff]  ;;  %v2592_v4 = vld [vmem:[#allocation2 + $0xa0] sm:$0xf] }
 0x188   : > { %v2885_v2 = vrot.slane %v2884_v6, 4  ;;  %v2901_v20 = vshll.u32 %v2592_v4, 16  ;;  %v2905_v17 = vshrl.u32 %v2592_v4, 16  ;;  %v5734_v4 = vld [vmem:[#allocation2 + $0xa0] sm:$0xf] }
 0x189   : > { %v2014_v13 = vsel %vm6504_vm15, %v5263_v35, %v2013_v33  ;;  %v2894_v33 = vrot.slane %v2892_v31, 4  ;;  %v336_v31 = vld [vmem:[%s6043_s26 + $0xf0] sm:$0xff] }
 0x18b   : > { %5282 = vmatmul.msk.bf16.gmra.mxu2 %vm1515_vm12, %v2085_v53  ;;  %v2889_v53 = vrot.slane %v2887_v22, 5 }
 0x18c   : > { %v3111_v61 = vpop.f32.mrf.mxu0  ;;  %v1816_v32 = vpop.f32.mrf.mxu1 }
 0x18d   : > { %v6763_v24 = vadd.f32 %v3111_v61, %v2527_v11  ;;  %v2017_v11 = vsel %vm6504_vm15, %v2015_v34, %v2016_v49  ;;  %v2890_v43 = vsel %vm6152_vm11, %v2885_v2, %v2889_v53  ;;  %v2897_v61 = vrot.slane %v2895_v23, 5  ;;  %v337_v23 = vld [vmem:[%s6043_s26 + $0xf8] sm:$0xff] }
 0x18e   : > { %v2455_v12 = vpop.f32.mrf.mxu3  ;;  %v2168_v5 = vpop.f32.mrf.mxu2  ;;  %v2067_v41 = vunpack.c.l.b16 %v2017_v11  ;;  %v6781_v34 = vrot.slane %v2901_v20, 5  ;;  %v2020_v2 = vrot.slane %v5734_v4, 5  ;;  %v5584_v20 = vld [vmem:[#allocation2 + $0x9c] sm:$0xff] }
 0x18f   : > { %7599 = vst [vmem:[#allocation14_spill] sm:$0xff] %v6763_v24  ;;  %5385 = vmatmul.msk.bf16.gmra.mxu0 %vm1515_vm12, %v3032_v19  ;;  %v2528_v39 = vadd.f32 %v2455_v12, %v2238_v44  ;;  %v2239_v42 = vadd.f32 %v2168_v5, %v6740_v10  ;;  %5247 = vmatmul.msk.bf16.gmra.mxu1 %vm1515_vm12, %v5583_v27  ;;  %v2066_v44 = vunpack.c.l.b16 %v2014_v13  ;;  %v3013_v12 = vunpack.c.l.b16 %v2890_v43  ;;  %v1889_v13 = vld [vmem:[#allocation2 + $0x9c] sm:$0xe]  ;;  %v5738_v24 = vld [vmem:[#allocation2 + $0xac] sm:$0xf] }
 0x190   : > { %v2880_v10 = vsel %vm6152_vm11, %v2875_v55, %v2879_v57  ;;  %v2907_v57 = vrot.slane %v2905_v17, 4  ;;  %v2593_v55 = vld [vmem:[#allocation2 + $0xa4] sm:$0x1]  ;;  %v2898_v53 = vor.u32 %v2897_v61, %v2894_v33  ;;  %v5735_v17 = vld [vmem:[#allocation5] ss:$0 sm:$0xff]  ;;  %v1817_v61 = vadd.f32 %v1816_v32, %v6571_v28 }
 0x191   : > { %v3012_v6 = vunpack.c.l.b16 %v2880_v10  ;;  %v2911_v11 = vshll.u32 %v2593_v55, 16  ;;  %v373_v33 = vmul.f32 %v5735_v17, %v337_v23  ;;  %v5602_v23 = vld [vmem:[#allocation2 + $0x9c] sm:$0xff]  ;;  %v2595_v28 = vld [vmem:[#allocation2 + $0xac] sm:$0xf]  ;;  %v2027_v47 = vrot.slane %v5738_v24, 5 }
 0x193   : > { %5366 = vmatmul.msk.bf16.gmra.mxu3 %vm1515_vm12, %v5601_v26  ;;  %v2086_v26 = vpack.c.b16 %v2067_v41, %v2066_v44  ;;  %v3033_v10 = vpack.c.b16 %v3013_v12, %v3012_v6  ;;  %v5264_v41 = vrot.slane %v1889_v13, 9  ;;  %v5737_v6 = vld [vmem:[%s7575_s2] ss:$0 sm:$0xff] }
 0x194   : > { %v3113_v19 = vpop.f32.mrf.mxu0  ;;  %v6777_v27 = vpop.f32.mrf.mxu1 }
 0x195   : > { %v6779_v49 = vadd.f32 %v3113_v19, %v2528_v39  ;;  %v2908_v39 = vor.u32 %v2907_v57, %v6781_v34  ;;  %v372_v19 = vmul.f32 %v5735_v17, %v336_v31  ;;  %v2594_v57 = vld [vmem:[#allocation2 + $0xa8] sm:$0xf]  ;;  %v2913_v31 = vrot.slane %v2911_v11, 5 }
 0x196   : > { %v2458_v22 = vpop.f32.mrf.mxu3  ;;  %v2170_v35 = vpop.f32.mrf.mxu2 }
 0x197   : > { %7600 = vst [vmem:[#allocation15_spill] sm:$0xff] %v6779_v49  ;;  %v2529_v5 = vadd.f32 %v2458_v22, %v2239_v42  ;;  %v2240_v52 = vadd.f32 %v2170_v35, %v6757_v40  ;;  %v5736_v42 = vld [vmem:[#allocation2 + $0xa4] sm:$0x1]  ;;  %v2022_v22 = vrot.slane %v2020_v2, 4  ;;  %v2899_v35 = vrot.slane %v2898_v53, 4 }
 0x198   : > { %v2023_v43 = vrot.slane %v5736_v42, 5  ;;  %v408_v12 = vadd.f32 %v5737_v6, %v372_v19  ;;  %v2909_v4 = vrot.slane %v2908_v39, 4  ;;  %v409_v49 = vadd.f32 %v5737_v6, %v373_v33  ;;  %v532_v53 = vld [vmem:[#allocation2 + $0xc0] sm:$0x1] }
 0x199   : > { %v2021_v19 = vsel %vm6504_vm15, %v5264_v41, %v2020_v2  ;;  %v2916_v39 = vshrl.u32 %v2594_v57, 16  ;;  %v533_v11 = vsel %vm6055_vm4, 0, %v532_v53  ;;  %v2929_v33 = vshrl.u32 %v2595_v28, 16 }
 0x19a   : > { %v440_v32 = vmax.f32 %v408_v12, 0.0  ;;  %534 = vst [vmem:[#allocation2 + $0xc0] sm:$0x1] %v533_v11  ;;  %v2914_v2 = vsel %vm6152_vm11, %v2909_v4, %v2913_v31 }
 0x19b   : > { %5283 = vmatmul.msk.bf16.gmra.mxu2 %vm1515_vm12, %v2086_v26  ;;  %v2931_v4 = vrot.slane %v2929_v33, 4 }
 0x19c   : > { %v3116_v40 = vpop.f32.mrf.mxu0  ;;  %v6788_v44 = vpop.f32.mrf.mxu1 }
 0x19d   : > { %v6794_v26 = vadd.f32 %v3116_v40, %v2529_v5  ;;  %v2024_v5 = vsel %vm6504_vm15, %v2022_v22, %v2023_v43  ;;  %v472_v40 = vpack.c.bf16 %v440_v32, %v440_v32  ;;  %v2068_v43 = vunpack.c.l.b16 %v2021_v19 }
 0x19e   : > { %v2460_v55 = vpop.f32.mrf.mxu3  ;;  %v2173_v42 = vpop.f32.mrf.mxu2  ;;  %v2069_v41 = vunpack.c.l.b16 %v2024_v5 }
 0x19f   : > { %7601 = vst [vmem:[#allocation16_spill] sm:$0xff] %v6794_v26  ;;  %5386 = vmatmul.msk.bf16.gmra.mxu0 %vm1515_vm12, %v3033_v10  ;;  %v2530_v13 = vadd.f32 %v2460_v55, %v2240_v52  ;;  %v2241_v17 = vadd.f32 %v2173_v42, %v1817_v61  ;;  %5248 = vmatmul.msk.bf16.gmra.mxu1 %vm1515_vm12, %v5584_v20  ;;  %v2919_v10 = vshll.u32 %v2594_v57, 16  ;;  %v2925_v20 = vshll.u32 %v2595_v28, 16  ;;  %v1890_v26 = vld [vmem:[#allocation2 + $0xa8] sm:$0xe] }
 0x1a0   : > { %v2904_v52 = vsel %vm6152_vm11, %v2899_v35, %v6781_v34  ;;  %v441_v61 = vmax.f32 %v409_v49, 0.0  ;;  %v843_v22 = vshrl.u32 %v472_v40, 16  ;;  %v2918_v55 = vrot.slane %v2916_v39, 4  ;;  %v2596_v39 = vld [vmem:[#allocation2 + $0xb0] sm:$0x1] }
 0x1a1   : > { %v3014_v12 = vunpack.c.l.b16 %v2904_v52  ;;  %v1819_v34 = vadd.f32 %v6777_v27, %v6580_v8  ;;  %v2921_v35 = vrot.slane %v2919_v10, 5  ;;  %v3015_v49 = vunpack.c.l.b16 %v2914_v2  ;;  %v1014_v8 = vld [vmem:[#allocation2 + $0xc0] sm:$0xf] }
 0x1a2   : > { %v845_v57 = vrot.slane %v843_v22, 7  ;;  %v6816_v53 = vrot.slane %v2925_v20, 5  ;;  %v473_v31 = vpack.c.bf16 %v441_v61, %v441_v61  ;;  %v2087_v11 = vpack.c.b16 %v2069_v41, %v2068_v43 }
 0x1a3   : > { %5367 = vmatmul.msk.bf16.gmra.mxu3 %vm1515_vm12, %v5602_v23  ;;  %v846_v52 = vshll.u32 %v472_v40, 16  ;;  %v2922_v27 = vor.u32 %v2921_v35, %v2918_v55  ;;  %v2935_v22 = vshll.u32 %v2596_v39, 16  ;;  %v3034_v61 = vpack.c.b16 %v3015_v49, %v3014_v12  ;;  %v2597_v40 = vld [vmem:[#allocation2 + $0xb4] sm:$0xf] }
 0x1a4   : > { %v3118_v6 = vpop.f32.mrf.mxu0  ;;  %v6810_v42 = vpop.f32.mrf.mxu1  ;;  %v2932_v2 = vor.u32 %v2931_v4, %v6816_v53  ;;  %v854_v20 = vshll.u32 %v473_v31, 16  ;;  %v5265_v43 = vrot.slane %v1890_v26, 9  ;;  %v849_v35 = vrot.slane %v845_v57, 4 }
 0x1a5   : > { %v6814_v28 = vadd.f32 %v3118_v6, %v2530_v13  ;;  %v848_v10 = vor.u32 %v846_v52, %v845_v57  ;;  %v582_v13 = vld [vmem:[#allocation2 + $0xc8] sm:$0x1]  ;;  %v851_v6 = vshrl.u32 %v473_v31, 16  ;;  %v1822_v12 = vadd.f32 %v6788_v44, %v6589_v29 }
 0x1a6   : > { %v2463_v23 = vpop.f32.mrf.mxu3  ;;  %v2175_v32 = vpop.f32.mrf.mxu2  ;;  %v2923_v62 = vrot.slane %v2922_v27, 4  ;;  %v2933_v4 = vrot.slane %v2932_v2, 4  ;;  %v2937_v31 = vrot.slane %v2935_v22, 5  ;;  %v5603_v52 = vld [vmem:[#allocation2 + $0xa8] sm:$0xff]  ;;  %v2940_v1 = vshrl.u32 %v2597_v40, 16 }
 0x1a7   : > { %7602 = vst [vmem:[#allocation17_spill] sm:$0xff] %v6814_v28  ;;  %v2531_v19 = vadd.f32 %v2463_v23, %v2241_v17  ;;  %v2242_v5 = vadd.f32 %v2175_v32, %v1819_v34  ;;  %v5739_v28 = vld [vmem:[#allocation2 + $0xb0] sm:$0x1]  ;;  %v5585_v17 = vld [vmem:[#allocation2 + $0xa8] sm:$0xff]  ;;  %v1015_v24 = vsel %vm6120_vm10, %v848_v10, %v1014_v8  ;;  %v2029_v34 = vrot.slane %v2027_v47, 4 }
 0x1a8   : > { %v2030_v33 = vrot.slane %v5739_v28, 5  ;;  %v853_v23 = vrot.slane %v851_v6, 7  ;;  %1016 = vst [vmem:[#allocation2 + $0xc0] sm:$0xf] %v1015_v24  ;;  %v583_v32 = vsel %vm6061_vm5, 0, %v582_v13  ;;  %v2943_v10 = vshll.u32 %v2597_v40, 16 }
 0x1a9   : > { %v2598_v28 = vld [vmem:[#allocation2 + $0xb8] sm:$0xf]  ;;  %584 = vst [vmem:[#allocation2 + $0xc8] sm:$0x1] %v583_v32  ;;  %v2028_v29 = vsel %vm6504_vm15, %v5265_v43, %v2027_v47  ;;  %v1824_v40 = vadd.f32 %v6810_v42, %v6604_v50  ;;  %v2599_v32 = vld [vmem:[#allocation2 + $0xbc] sm:$0x1] }
 0x1aa   : > { %v856_v39 = vor.u32 %v854_v20, %v853_v23  ;;  %v2031_v44 = vsel %vm6504_vm15, %v2029_v34, %v2030_v33  ;;  %v2953_v13 = vshrl.u32 %v2598_v28, 16  ;;  %v858_v2 = vrot.slane %v853_v23, 4 }
 0x1ab   : > { %5284 = vmatmul.msk.bf16.gmra.mxu2 %vm1515_vm12, %v2087_v11  ;;  %v2070_v22 = vunpack.c.l.b16 %v2028_v29  ;;  %v2071_v6 = vunpack.c.l.b16 %v2031_v44  ;;  %v2938_v20 = vsel %vm6152_vm11, %v2933_v4, %v2937_v31  ;;  %v2942_v33 = vrot.slane %v2940_v1, 4  ;;  %v5586_v29 = vld [vmem:[#allocation2 + $0xb4] sm:$0xff] }
 0x1ac   : > { %v3121_v41 = vpop.f32.mrf.mxu0  ;;  %v6822_v55 = vpop.f32.mrf.mxu1  ;;  %v857_v27 = vsel %vm6110_vm7, %v849_v35, %v856_v39  ;;  %v2955_v24 = vrot.slane %v2953_v13, 4  ;;  %v2959_v42 = vshll.u32 %v2599_v32, 16 }
 0x1ad   : > { %v6828_v26 = vadd.f32 %v3121_v41, %v2531_v19  ;;  %v2949_v19 = vshll.u32 %v2598_v28, 16  ;;  %1017 = vst.msk [vmem:[#allocation2 + $0xc4] sm:$0xf] %vm474_vm3, %v857_v27  ;;  %v2088_v31 = vpack.c.b16 %v2071_v6, %v2070_v22 }
 0x1ae   : > { %v2465_v49 = vpop.f32.mrf.mxu3  ;;  %v2178_v11 = vpop.f32.mrf.mxu2  ;;  %v2961_v22 = vrot.slane %v2959_v42, 5 }
 0x1af   : > { %5387 = vmatmul.msk.bf16.gmra.mxu0 %vm1515_vm12, %v3034_v61  ;;  %v2532_v57 = vadd.f32 %v2465_v49, %v2242_v5  ;;  %v2243_v8 = vadd.f32 %v2178_v11, %v1822_v12  ;;  %5249 = vmatmul.msk.bf16.gmra.mxu1 %vm1515_vm12, %v5585_v17  ;;  %v2928_v5 = vsel %vm6152_vm11, %v2923_v62, %v6816_v53  ;;  %v2945_v61 = vrot.slane %v2943_v10, 5  ;;  %v5740_v12 = vld [vmem:[#allocation2 + $0xb8] sm:$0xf]  ;;  %v1891_v11 = vld [vmem:[#allocation2 + $0xb4] sm:$0xe] }
 0x1b0   : > { %v6845_v56 = vrot.slane %v2949_v19, 5  ;;  %v1018_v43 = vld [vmem:[#allocation2 + $0xc8] sm:$0x1]  ;;  %v3016_v34 = vunpack.c.l.b16 %v2928_v5  ;;  %v2034_v28 = vrot.slane %v5740_v12, 5  ;;  %v3017_v49 = vunpack.c.l.b16 %v2938_v20  ;;  %v2600_v44 = vld [vmem:[#allocation2 + $0xc0] sm:$0xf] }
 0x1b1   : > { %v1019_v53 = vsel %vm6055_vm4, %v858_v2, %v1018_v43  ;;  %v2946_v39 = vor.u32 %v2945_v61, %v2942_v33  ;;  %v1827_v2 = vadd.f32 %v6822_v55, %v6615_v30  ;;  %v2964_v43 = vshrl.u32 %v2600_v44, 16  ;;  %v3906_v12 = vld [vmem:[#allocation2 + $0x18] sm:$0xf] }
 0x1b2   : > { %1020 = vst [vmem:[#allocation2 + $0xc8] sm:$0x1] %v1019_v53  ;;  %v2956_v50 = vor.u32 %v2955_v24, %v6845_v56  ;;  %v2036_v1 = vrot.slane %v2034_v28, 4  ;;  %v3035_v10 = vpack.c.b16 %v3017_v49, %v3016_v34  ;;  %v5604_v53 = vld [vmem:[#allocation2 + $0xb4] sm:$0xff] }
 0x1b3   : > { %5368 = vmatmul.msk.bf16.gmra.mxu3 %vm1515_vm12, %v5603_v52  ;;  %v2037_v52 = vrot.slane %v5741_v0, 5  ;;  %v2947_v27 = vrot.slane %v2946_v39, 4 }
 0x1b4   : > { %v3123_v47 = vpop.f32.mrf.mxu0  ;;  %v6847_v17 = vpop.f32.mrf.mxu1  ;;  %v2957_v5 = vrot.slane %v2956_v50, 4 }
 0x1b5   : > { %v6853_v41 = vadd.f32 %v3123_v47, %v2532_v57  ;;  %v5266_v57 = vrot.slane %v1891_v11, 9  ;;  %v2038_v61 = vsel %vm6504_vm15, %v2036_v1, %v2037_v52  ;;  %v2952_v32 = vsel %vm6152_vm11, %v2947_v27, %v6845_v56  ;;  %v6872_v11 = vld [vmem:[#allocation2 + $0x1c] sm:$0xf]  ;;  %v3213_v27 = vld [vmem:[#allocation2 + $0xc] sm:$0xe] }
 0x1b6   : > { %v2468_v35 = vpop.f32.mrf.mxu3  ;;  %v2180_v23 = vpop.f32.mrf.mxu2  ;;  %v2073_v49 = vunpack.c.l.b16 %v2038_v61  ;;  %v2962_v50 = vsel %vm6152_vm11, %v2957_v5, %v2961_v22  ;;  %v3018_v56 = vunpack.c.l.b16 %v2952_v32 }
 0x1b7   : > { %v2533_v62 = vadd.f32 %v2468_v35, %v2243_v8  ;;  %v2244_v4 = vadd.f32 %v2180_v23, %v1824_v40  ;;  %v2601_v8 = vld [vmem:[#allocation2 + $0xc4] sm:$0xf]  ;;  %v2035_v33 = vsel %vm6504_vm15, %v5266_v57, %v2034_v28  ;;  %v2967_v40 = vshll.u32 %v2600_v44, 16  ;;  %v5742_v35 = vld [vmem:[#allocation2 + $0x10] sm:$0xf] }
 0x1b8   : > { %v2973_v30 = vshll.u32 %v2601_v8, 16  ;;  %v2977_v55 = vshrl.u32 %v2601_v8, 16  ;;  %v3279_v23 = vrot.slane %v5742_v35, 5  ;;  %v2072_v28 = vunpack.c.l.b16 %v2035_v33 }
 0x1b9   : > { %v2602_v1 = vld [vmem:[#allocation2 + $0xc8] sm:$0x1]  ;;  %v3958_v44 = vshll.u32 %v3906_v12, 16  ;;  %v3964_v8 = vshll.u32 %v6872_v11, 16  ;;  %v3019_v22 = vunpack.c.l.b16 %v2962_v50 }
 0x1ba   : > { %v6877_v42 = vrot.slane %v2973_v30, 5  ;;  %v2979_v0 = vrot.slane %v2977_v55, 4  ;;  %v3281_v52 = vrot.slane %v3279_v23, 4  ;;  %v2089_v33 = vpack.c.b16 %v2073_v49, %v2072_v28  ;;  %v6892_v28 = vld [vmem:[#allocation2 + $0x20] sm:$0x1] }
 0x1bb   : > { %5285 = vmatmul.msk.bf16.gmra.mxu2 %vm1515_vm12, %v2088_v31  ;;  %v2969_v31 = vrot.slane %v2967_v40, 5  ;;  %v2983_v55 = vshll.u32 %v2602_v1, 16  ;;  %v3036_v49 = vpack.c.b16 %v3019_v22, %v3018_v56 }
 0x1bc   : > { %v3126_v19 = vpop.f32.mrf.mxu0  ;;  %v6857_v13 = vpop.f32.mrf.mxu1  ;;  %v2980_v30 = vor.u32 %v2979_v0, %v6877_v42 }
 0x1bd   : > { %v6861_v6 = vadd.f32 %v3126_v19, %v2533_v62  ;;  %v2966_v62 = vrot.slane %v2964_v43, 4  ;;  %v1829_v19 = vadd.f32 %v6847_v17, %v6632_v38  ;;  %v5391_v43 = vrot.slane %v3213_v27, 9 }
 0x1be   : > { %v2470_v47 = vpop.f32.mrf.mxu3  ;;  %v2183_v20 = vpop.f32.mrf.mxu2  ;;  %v2981_v0 = vrot.slane %v2980_v30, 4 }
 0x1bf   : > { %5388 = vmatmul.msk.bf16.gmra.mxu0 %vm1515_vm12, %v3035_v10  ;;  %v2534_v24 = vadd.f32 %v2470_v47, %v2244_v4  ;;  %v2245_v34 = vadd.f32 %v2183_v20, %v1827_v2  ;;  %5250 = vmatmul.msk.bf16.gmra.mxu1 %vm1515_vm12, %v5586_v29  ;;  %v5743_v4 = vld [vmem:[#allocation2 + $0x14] sm:$0x1]  ;;  %v3955_v29 = vshrl.u32 %v3906_v12, 16  ;;  %v3968_v2 = vshrl.u32 %v6872_v11, 16 }
 0x1c0   : > { %v3282_v39 = vrot.slane %v5743_v4, 5  ;;  %v2970_v61 = vor.u32 %v2969_v31, %v2966_v62  ;;  %v3280_v38 = vsel %vm6504_vm15, %v5391_v43, %v3279_v23  ;;  %v3966_v4 = vrot.slane %v3964_v8, 5  ;;  %v5605_v8 = vld [vmem:[#allocation2 + $0xc0] sm:$0xff] }
 0x1c1   : > { %v3957_v35 = vrot.slane %v3955_v29, 4  ;;  %v3392_v32 = vunpack.c.l.b16 %v3280_v38  ;;  %v3970_v50 = vrot.slane %v3968_v2, 4  ;;  %v1832_v31 = vadd.f32 %v6857_v13, %v6645_v48  ;;  %v5745_v38 = vld [vmem:[#allocation2 + $0x1c] sm:$0xf] }
 0x1c2   : > { %v3283_v17 = vsel %vm6504_vm15, %v3281_v52, %v3282_v39  ;;  %v2971_v23 = vrot.slane %v2970_v61, 4  ;;  %v3974_v29 = vshll.u32 %v6892_v28, 16  ;;  %v5744_v61 = vld [vmem:[#allocation2 + $0x20] sm:$0x1] }
 0x1c3   : > { %5369 = vmatmul.msk.bf16.gmra.mxu3 %vm1515_vm12, %v5604_v53  ;;  %v3393_v12 = vunpack.c.l.b16 %v3283_v17  ;;  %v3971_v1 = vor.u32 %v3970_v50, %v3966_v4  ;;  %v3289_v43 = vrot.slane %v5744_v61, 5  ;;  %v3286_v17 = vrot.slane %v5745_v38, 5 }
 0x1c4   : > { %v3128_v57 = vpop.f32.mrf.mxu0  ;;  %v6879_v10 = vpop.f32.mrf.mxu1  ;;  %v2976_v48 = vsel %vm6152_vm11, %v2971_v23, %v6877_v42 }
 0x1c5   : > { %v6885_v5 = vadd.f32 %v3128_v57, %v2534_v24  ;;  %v3960_v24 = vrot.slane %v3958_v44, 5  ;;  %v2985_v57 = vrot.slane %v2983_v55, 5  ;;  %v1834_v42 = vadd.f32 %v6879_v10, %v6665_v54 }
 0x1c6   : > { %v2473_v47 = vpop.f32.mrf.mxu3  ;;  %v2185_v20 = vpop.f32.mrf.mxu2 }
 0x1c7   : > { %v2535_v40 = vadd.f32 %v2473_v47, %v2245_v34  ;;  %v2246_v53 = vadd.f32 %v2185_v20, %v1829_v19  ;;  %v3424_v34 = vpack.c.b16 %v3393_v12, %v3392_v32  ;;  %v3961_v52 = vor.u32 %v3960_v24, %v3957_v35  ;;  %v6910_v35 = vld [vmem:[#allocation2 + $0x28] sm:$0xf]  ;;  %v3214_v12 = vld [vmem:[#allocation2 + $0x18] sm:$0xe] }
 0x1c8   : > { %v2986_v13 = vsel %vm6152_vm11, %v2981_v0, %v2985_v57  ;;  %v3972_v47 = vrot.slane %v3971_v1, 4  ;;  %v3976_v20 = vrot.slane %v3974_v29, 5  ;;  %v5609_v1 = vld [vmem:[#allocation2 + $0x18] sm:$0xff]  ;;  %v3988_v54 = vshll.u32 %v6910_v35, 16 }
 0x1c9   : > { %v3962_v22 = vrot.slane %v3961_v52, 4  ;;  %v3021_v30 = vunpack.c.l.b16 %v2986_v13  ;;  %v3992_v10 = vshrl.u32 %v6910_v35, 16  ;;  %v4564_v13 = vld [vmem:[#allocation2 + $0x18] sm:$0xe] }
 0x1ca   : > { %v3977_v32 = vsel %vm6152_vm11, %v3972_v47, %v3976_v20 }
 0x1cb   : > { %5286 = vmatmul.msk.bf16.gmra.mxu2 %vm1515_vm12, %v2089_v33  ;;  %v3909_v33 = vld [vmem:[#allocation2 + $0x24] sm:$0xf]  ;;  %v3967_v24 = vsel %vm6152_vm11, %v3962_v22, %v3966_v4  ;;  %v3994_v61 = vrot.slane %v3992_v10, 4 }
 0x1cc   : > { %v3131_v62 = vpop.f32.mrf.mxu0  ;;  %v1836_v39 = vpop.f32.mrf.mxu1  ;;  %v3979_v23 = vshrl.u32 %v3909_v33, 16  ;;  %v3982_v0 = vshll.u32 %v3909_v33, 16  ;;  %v6928_v33 = vrot.slane %v3988_v54, 5 }
 0x1cd   : > { %v6898_v44 = vadd.f32 %v3131_v62, %v2535_v40  ;;  %v5392_v62 = vrot.slane %v3214_v12, 9 }
 0x1ce   : > { %v2475_v19 = vpop.f32.mrf.mxu3  ;;  %v2188_v27 = vpop.f32.mrf.mxu2  ;;  %v3984_v22 = vrot.slane %v3982_v0, 5  ;;  %v5746_v0 = vld [vmem:[#allocation2 + $0x2c] sm:$0x1] }
 0x1cf   : > { %5389 = vmatmul.msk.bf16.gmra.mxu0 %vm1515_vm12, %v3036_v49  ;;  %v2536_v56 = vadd.f32 %v2475_v19, %v2246_v53  ;;  %v2247_v2 = vadd.f32 %v2188_v27, %v1832_v31  ;;  %5411 = vmatmul.msk.bf16.vlgmr.msra.gmra.mxu1 %vm1515_vm12, %v3424_v34  ;;  %v3020_v53 = vunpack.c.l.b16 %v2976_v48  ;;  %v3288_v31 = vrot.slane %v3286_v17, 4 }
 0x1d0   : > { %v3287_v4 = vsel %vm6504_vm15, %v5392_v62, %v3286_v17  ;;  %v4630_v19 = vrot.slane %v6872_v11, 5  ;;  %v4342_v48 = vunpack.c.l.b16 %v3977_v32  ;;  %v1837_v11 = vadd.f32 %v1836_v39, %v6584_v51 }
 0x1d1   : > { %v3290_v29 = vsel %vm6504_vm15, %v3288_v31, %v3289_v43  ;;  %v3394_v27 = vunpack.c.l.b16 %v3287_v4  ;;  %v3037_v47 = vpack.c.b16 %v3021_v30, %v3020_v53  ;;  %v6932_v43 = vld [vmem:[#allocation2 + $0x2c] sm:$0x1]  ;;  %v5531_v17 = vrot.slane %v4564_v13, 9 }
 0x1d2   : > { %v4632_v12 = vrot.slane %v4630_v19, 4  ;;  %v4633_v53 = vrot.slane %v6892_v28, 5  ;;  %v3995_v31 = vor.u32 %v3994_v61, %v6928_v33  ;;  %v3998_v51 = vshll.u32 %v6932_v43, 16 }
 0x1d3   : > { %5370 = vmatmul.msk.bf16.gmra.mxu3 %vm1515_vm12, %v5605_v8  ;;  %v4341_v8 = vunpack.c.l.b16 %v3967_v24  ;;  %v4631_v39 = vsel %vm6504_vm15, %v5531_v17, %v4630_v19  ;;  %v4637_v17 = vrot.slane %v6910_v35, 5 }
 0x1d4   : > { %v3133_v40 = vpop.f32.mrf.mxu0  ;;  %v6908_v55 = vpop.f32.mrf.mxu1  ;;  %v4634_v28 = vsel %vm6504_vm15, %v4632_v12, %v4633_v53  ;;  %v3996_v54 = vrot.slane %v3995_v31, 4  ;;  %v4000_v10 = vrot.slane %v3998_v51, 5  ;;  %v4565_v51 = vld [vmem:[#allocation2 + $0x24] sm:$0xe] }
 0x1d5   : > { %v6918_v50 = vadd.f32 %v3133_v40, %v2536_v56  ;;  %v3395_v56 = vunpack.c.l.b16 %v3290_v29  ;;  %v4373_v32 = vpack.c.b16 %v4342_v48, %v4341_v8  ;;  %v4743_v29 = vunpack.c.l.b16 %v4631_v39 }
 0x1d6   : > { %v2478_v49 = vpop.f32.mrf.mxu3  ;;  %v2190_v34 = vpop.f32.mrf.mxu2  ;;  %v1839_v13 = vadd.f32 %v6908_v55, %v6594_v36  ;;  %v4744_v61 = vunpack.c.l.b16 %v4634_v28  ;;  %v4001_v55 = vsel %vm6152_vm11, %v3996_v54, %v4000_v10  ;;  %v6967_v28 = vld [vmem:[#allocation2 + $0x38] sm:$0x1] }
 0x1d7   : > { %v2537_v57 = vadd.f32 %v2478_v49, %v2247_v2  ;;  %v2248_v52 = vadd.f32 %v2190_v34, %v1834_v42  ;;  %v3981_v2 = vrot.slane %v3979_v23, 4  ;;  %v3425_v20 = vpack.c.b16 %v3395_v56, %v3394_v27  ;;  %v3912_v23 = vld [vmem:[#allocation2 + $0x30] sm:$0xf]  ;;  %v5747_v56 = vld [vmem:[#allocation2 + $0x28] sm:$0xf] }
 0x1d8   : > { %v3293_v8 = vrot.slane %v5747_v56, 5  ;;  %v4003_v19 = vshrl.u32 %v3912_v23, 16  ;;  %v4006_v48 = vshll.u32 %v3912_v23, 16 }
 0x1d9   : > { %v3985_v49 = vor.u32 %v3984_v22, %v3981_v2  ;;  %v3215_v2 = vld [vmem:[#allocation2 + $0x24] sm:$0xe] }
 0x1da   : > { %v4005_v31 = vrot.slane %v4003_v19, 4  ;;  %v4008_v35 = vrot.slane %v4006_v48, 5  ;;  %v4640_v19 = vrot.slane %v6932_v43, 5 }
 0x1db   : > { %5495 = vmatmul.msk.bf16.vlgmr.msra.gmra.mxu2 %vm1515_vm12, %v5609_v1  ;;  %v6944_v1 = vld [vmem:[#allocation2 + $0x34] sm:$0xf] }
 0x1dc   : > { %v3136_v40 = vpop.f32.mrf.mxu0  ;;  %v6930_v38 = vpop.f32.mrf.mxu1  ;;  %v4012_v22 = vshll.u32 %v6944_v1, 16 }
 0x1dd   : > { %v6935_v42 = vadd.f32 %v3136_v40, %v2537_v57  ;;  %v3296_v57 = vrot.slane %v5746_v0, 5  ;;  %v1842_v56 = vadd.f32 %v6930_v38, %v6613_v7 }
 0x1de   : > { %v2480_v24 = vpop.f32.mrf.mxu3  ;;  %v2193_v30 = vpop.f32.mrf.mxu2  ;;  %v4014_v23 = vrot.slane %v4012_v22, 5  ;;  %v4022_v22 = vshll.u32 %v6967_v28, 16 }
 0x1df   : > { %5390 = vmatmul.msk.bf16.gmra.mxu0 %vm1515_vm12, %v3037_v47  ;;  %v2538_v34 = vadd.f32 %v2480_v24, %v2248_v52  ;;  %v2249_v62 = vadd.f32 %v2193_v30, %v1837_v11  ;;  %5412 = vmatmul.msk.bf16.gmra.mxu1 %vm1515_vm12, %v3425_v20  ;;  %v3986_v52 = vrot.slane %v3985_v49, 4  ;;  %v4016_v47 = vshrl.u32 %v6944_v1, 16  ;;  %v5610_v30 = vld [vmem:[#allocation2 + $0x24] sm:$0xff] }
 0x1e0   : > { %v5393_v24 = vrot.slane %v3215_v2, 9 }
 0x1e1   : > { %v3991_v36 = vsel %vm6152_vm11, %v3986_v52, %v6928_v33  ;;  %v4018_v0 = vrot.slane %v4016_v47, 4  ;;  %v4344_v52 = vunpack.c.l.b16 %v4001_v55 }
 0x1e2   : > { %v3294_v49 = vsel %vm6504_vm15, %v5393_v24, %v3293_v8  ;;  %v4343_v33 = vunpack.c.l.b16 %v3991_v36  ;;  %v5748_v36 = vld [vmem:[#allocation2 + $0x38] sm:$0x1] }
 0x1e3   : > { %5515 = vmatmul.msk.bf16.vlgmr.msra.gmra.mxu3 %vm1515_vm12, %v4373_v32  ;;  %v3295_v32 = vrot.slane %v3293_v8, 4  ;;  %v3396_v39 = vunpack.c.l.b16 %v3294_v49  ;;  %v4639_v8 = vrot.slane %v4637_v17, 4  ;;  %v4019_v2 = vor.u32 %v4018_v0, %v4014_v23 }
 0x1e4   : > { %v3138_v4 = vpop.f32.mrf.mxu0  ;;  %v6949_v27 = vpop.f32.mrf.mxu1  ;;  %v3303_v55 = vrot.slane %v5748_v36, 5 }
 0x1e5   : > { %v6955_v20 = vadd.f32 %v3138_v4, %v2538_v34  ;;  %v3297_v34 = vsel %vm6504_vm15, %v3295_v32, %v3296_v57  ;;  %v4775_v4 = vpack.c.b16 %v4744_v61, %v4743_v29  ;;  %v5532_v57 = vrot.slane %v4565_v51, 9 }
 0x1e6   : > { %v2483_v40 = vpop.f32.mrf.mxu3  ;;  %v2195_v11 = vpop.f32.mrf.mxu2  ;;  %v4641_v38 = vsel %vm6504_vm15, %v4639_v8, %v4640_v19  ;;  %v4020_v32 = vrot.slane %v4019_v2, 4  ;;  %v5611_v2 = vld [vmem:[#allocation2 + $0x30] sm:$0xff] }
 0x1e7   : > { %v2539_v12 = vadd.f32 %v2483_v40, %v2249_v62  ;;  %v2250_v53 = vadd.f32 %v2195_v11, %v1839_v13  ;;  %v3397_v62 = vunpack.c.l.b16 %v3297_v34  ;;  %v4009_v13 = vor.u32 %v4008_v35, %v4005_v31  ;;  %v5749_v35 = vld [vmem:[#allocation2 + $0x34] sm:$0xf] }
 0x1e8   : > { %v4374_v11 = vpack.c.b16 %v4344_v52, %v4343_v33  ;;  %v4638_v7 = vsel %vm6504_vm15, %v5532_v57, %v4637_v17  ;;  %v4746_v34 = vunpack.c.l.b16 %v4641_v38  ;;  %v3300_v51 = vrot.slane %v5749_v35, 5  ;;  %v4566_v38 = vld [vmem:[#allocation2 + $0x30] sm:$0xe] }
 0x1e9   : > { %v3426_v54 = vpack.c.b16 %v3397_v62, %v3396_v39  ;;  %v4010_v43 = vrot.slane %v4009_v13, 4  ;;  %v6985_v39 = vld [vmem:[#allocation2 + $0x40] sm:$0xf]  ;;  %v1844_v17 = vadd.f32 %v6949_v27, %v6624_v37 }
 0x1ea   : > { %v4036_v37 = vshll.u32 %v6985_v39, 16  ;;  %v4040_v27 = vshrl.u32 %v6985_v39, 16 }
 0x1eb   : > { %5496 = vmatmul.msk.bf16.gmra.mxu2 %vm1515_vm12, %v5610_v30  ;;  %v4024_v30 = vrot.slane %v4022_v22, 5  ;;  %v4015_v62 = vsel %vm6152_vm11, %v4010_v43, %v4014_v23 }
 0x1ec   : > { %v3141_v10 = vpop.f32.mrf.mxu0  ;;  %v1846_v48 = vpop.f32.mrf.mxu1  ;;  %v4042_v36 = vrot.slane %v4040_v27, 4 }
 0x1ed   : > { %v6974_v47 = vadd.f32 %v3141_v10, %v2539_v12  ;;  %v3915_v12 = vld [vmem:[#allocation2 + $0x3c] sm:$0xf]  ;;  %v4025_v0 = vsel %vm6152_vm11, %v4020_v32, %v4024_v30 }
 0x1ee   : > { %v2485_v29 = vpop.f32.mrf.mxu3  ;;  %v2198_v61 = vpop.f32.mrf.mxu2  ;;  %v4027_v57 = vshrl.u32 %v3915_v12, 16  ;;  %v4030_v8 = vshll.u32 %v3915_v12, 16  ;;  %v7003_v12 = vrot.slane %v4036_v37, 5 }
 0x1ef   : > { %5551 = vmatmul.msk.bf16.vlgmr.msra.gmra.mxu0 %vm1515_vm12, %v4775_v4  ;;  %v2540_v40 = vadd.f32 %v2485_v29, %v2250_v53  ;;  %v2251_v24 = vadd.f32 %v2198_v61, %v1842_v56  ;;  %5413 = vmatmul.msk.bf16.gmra.mxu1 %vm1515_vm12, %v3426_v54  ;;  %v4745_v53 = vunpack.c.l.b16 %v4638_v7  ;;  %v3216_v4 = vld [vmem:[#allocation2 + $0x30] sm:$0xe]  ;;  %v3302_v56 = vrot.slane %v3300_v51, 4 }
 0x1f0   : > { %v5394_v10 = vrot.slane %v3216_v4, 9  ;;  %v4644_v29 = vrot.slane %v6944_v1, 5  ;;  %v4346_v7 = vunpack.c.l.b16 %v4025_v0  ;;  %v4032_v43 = vrot.slane %v4030_v8, 5  ;;  %v5750_v8 = vld [vmem:[#allocation2 + $0x44] sm:$0x1] }
 0x1f1   : > { %v3304_v22 = vsel %vm6504_vm15, %v3302_v56, %v3303_v55  ;;  %v4776_v32 = vpack.c.b16 %v4746_v34, %v4745_v53  ;;  %v7007_v55 = vld [vmem:[#allocation2 + $0x44] sm:$0x1]  ;;  %v1847_v1 = vadd.f32 %v1846_v48, %v6642_v16  ;;  %v4647_v53 = vrot.slane %v6967_v28, 5 }
 0x1f2   : > { %v3301_v23 = vsel %vm6504_vm15, %v5394_v10, %v3300_v51  ;;  %v5533_v51 = vrot.slane %v4566_v38, 9  ;;  %v4646_v4 = vrot.slane %v4644_v29, 4  ;;  %v4043_v56 = vor.u32 %v4042_v36, %v7003_v12 }
 0x1f3   : > { %5516 = vmatmul.msk.bf16.gmra.mxu3 %vm1515_vm12, %v4374_v11  ;;  %v3398_v61 = vunpack.c.l.b16 %v3301_v23  ;;  %v4345_v11 = vunpack.c.l.b16 %v4015_v62  ;;  %v4046_v16 = vshll.u32 %v7007_v55, 16 }
 0x1f4   : > { %v3143_v49 = vpop.f32.mrf.mxu0  ;;  %v6983_v31 = vpop.f32.mrf.mxu1  ;;  %v4645_v48 = vsel %vm6504_vm15, %v5533_v51, %v4644_v29  ;;  %v4648_v28 = vsel %vm6504_vm15, %v4646_v4, %v4647_v53  ;;  %v4044_v37 = vrot.slane %v4043_v56, 4  ;;  %v4651_v51 = vrot.slane %v6985_v39, 5 }
 0x1f5   : > { %v6993_v33 = vadd.f32 %v3143_v49, %v2540_v40  ;;  %v3399_v40 = vunpack.c.l.b16 %v3304_v22  ;;  %v4375_v0 = vpack.c.b16 %v4346_v7, %v4345_v11  ;;  %v4048_v27 = vrot.slane %v4046_v16, 5  ;;  %v4567_v16 = vld [vmem:[#allocation2 + $0x3c] sm:$0xe] }
 0x1f6   : > { %v2488_v52 = vpop.f32.mrf.mxu3  ;;  %v2200_v54 = vpop.f32.mrf.mxu2  ;;  %v4747_v22 = vunpack.c.l.b16 %v4645_v48  ;;  %v1849_v38 = vadd.f32 %v6983_v31, %v6663_v46  ;;  %v4748_v36 = vunpack.c.l.b16 %v4648_v28  ;;  %v7042_v28 = vld [vmem:[#allocation2 + $0x50] sm:$0x1] }
 0x1f7   : > { %v2541_v19 = vadd.f32 %v2488_v52, %v2251_v24  ;;  %v2252_v13 = vadd.f32 %v2200_v54, %v1844_v17  ;;  %v4029_v24 = vrot.slane %v4027_v57, 4  ;;  %v3427_v30 = vpack.c.b16 %v3399_v40, %v3398_v61  ;;  %v3918_v57 = vld [vmem:[#allocation2 + $0x48] sm:$0xf]  ;;  %v5751_v40 = vld [vmem:[#allocation2 + $0x40] sm:$0xf] }
 0x1f8   : > { %v3307_v11 = vrot.slane %v5751_v40, 5  ;;  %v4051_v29 = vshrl.u32 %v3918_v57, 16  ;;  %v4054_v7 = vshll.u32 %v3918_v57, 16  ;;  %v4049_v31 = vsel %vm6152_vm11, %v4044_v37, %v4048_v27 }
 0x1f9   : > { %v4033_v52 = vor.u32 %v4032_v43, %v4029_v24  ;;  %v3217_v24 = vld [vmem:[#allocation2 + $0x3c] sm:$0xe] }
 0x1fa   : > { %v4053_v56 = vrot.slane %v4051_v29, 4  ;;  %v4056_v39 = vrot.slane %v4054_v7, 5  ;;  %v4654_v29 = vrot.slane %v7007_v55, 5 }
 0x1fb   : > { %5497 = vmatmul.msk.bf16.gmra.mxu2 %vm1515_vm12, %v5611_v2  ;;  %v7019_v2 = vld [vmem:[#allocation2 + $0x4c] sm:$0xf] }
 0x1fc   : > { %v3146_v49 = vpop.f32.mrf.mxu0  ;;  %v7005_v35 = vpop.f32.mrf.mxu1  ;;  %v4060_v43 = vshll.u32 %v7019_v2, 16 }
 0x1fd   : > { %v7010_v17 = vadd.f32 %v3146_v49, %v2541_v19  ;;  %v3310_v19 = vrot.slane %v5750_v8, 5  ;;  %v1852_v40 = vadd.f32 %v7005_v35, %v6673_v15 }
 0x1fe   : > { %v2490_v62 = vpop.f32.mrf.mxu3  ;;  %v2203_v34 = vpop.f32.mrf.mxu2  ;;  %v4062_v57 = vrot.slane %v4060_v43, 5  ;;  %v4070_v43 = vshll.u32 %v7042_v28, 16 }
 0x1ff   : > { %5552 = vmatmul.msk.bf16.gmra.mxu0 %vm1515_vm12, %v4776_v32  ;;  %v2542_v54 = vadd.f32 %v2490_v62, %v2252_v13  ;;  %v2253_v10 = vadd.f32 %v2203_v34, %v1847_v1  ;;  %5414 = vmatmul.msk.bf16.gmra.mxu1 %vm1515_vm12, %v3427_v30  ;;  %v4034_v13 = vrot.slane %v4033_v52, 4  ;;  %v4064_v32 = vshrl.u32 %v7019_v2, 16  ;;  %v5612_v34 = vld [vmem:[#allocation2 + $0x3c] sm:$0xff] }
 0x200   : > { %v5395_v62 = vrot.slane %v3217_v24, 9 }
 0x201   : > { %v4039_v46 = vsel %vm6152_vm11, %v4034_v13, %v7003_v12  ;;  %v4066_v8 = vrot.slane %v4064_v32, 4  ;;  %v4348_v13 = vunpack.c.l.b16 %v4049_v31 }
 0x202   : > { %v3308_v52 = vsel %vm6504_vm15, %v5395_v62, %v3307_v11  ;;  %v4347_v12 = vunpack.c.l.b16 %v4039_v46  ;;  %v5752_v46 = vld [vmem:[#allocation2 + $0x50] sm:$0x1] }
 0x203   : > { %5517 = vmatmul.msk.bf16.gmra.mxu3 %vm1515_vm12, %v4375_v0  ;;  %v3309_v0 = vrot.slane %v3307_v11, 4  ;;  %v3400_v48 = vunpack.c.l.b16 %v3308_v52  ;;  %v4653_v11 = vrot.slane %v4651_v51, 4  ;;  %v4067_v24 = vor.u32 %v4066_v8, %v4062_v57 }
 0x204   : > { %v3148_v23 = vpop.f32.mrf.mxu0  ;;  %v7024_v61 = vpop.f32.mrf.mxu1  ;;  %v3317_v31 = vrot.slane %v5752_v46, 5 }
 0x205   : > { %v7030_v30 = vadd.f32 %v3148_v23, %v2542_v54  ;;  %v3311_v54 = vsel %vm6504_vm15, %v3309_v0, %v3310_v19  ;;  %v4777_v23 = vpack.c.b16 %v4748_v36, %v4747_v22  ;;  %v5534_v19 = vrot.slane %v4567_v16, 9 }
 0x206   : > { %v2493_v49 = vpop.f32.mrf.mxu3  ;;  %v2205_v1 = vpop.f32.mrf.mxu2  ;;  %v4655_v35 = vsel %vm6504_vm15, %v4653_v11, %v4654_v29  ;;  %v4068_v0 = vrot.slane %v4067_v24, 4  ;;  %v5613_v24 = vld [vmem:[#allocation2 + $0x48] sm:$0xff] }
 0x207   : > { %v2543_v4 = vadd.f32 %v2493_v49, %v2253_v10  ;;  %v2254_v53 = vadd.f32 %v2205_v1, %v1849_v38  ;;  %v3401_v10 = vunpack.c.l.b16 %v3311_v54  ;;  %v4057_v38 = vor.u32 %v4056_v39, %v4053_v56  ;;  %v5753_v39 = vld [vmem:[#allocation2 + $0x4c] sm:$0xf] }
 0x208   : > { %v4376_v1 = vpack.c.b16 %v4348_v13, %v4347_v12  ;;  %v4652_v15 = vsel %vm6504_vm15, %v5534_v19, %v4651_v51  ;;  %v4750_v54 = vunpack.c.l.b16 %v4655_v35  ;;  %v3314_v16 = vrot.slane %v5753_v39, 5  ;;  %v4568_v35 = vld [vmem:[#allocation2 + $0x48] sm:$0xe] }
 0x209   : > { %v3428_v37 = vpack.c.b16 %v3401_v10, %v3400_v48  ;;  %v4058_v55 = vrot.slane %v4057_v38, 4  ;;  %v7060_v48 = vld [vmem:[#allocation2 + $0x58] sm:$0xf]  ;;  %v1854_v51 = vadd.f32 %v7024_v61, %v6690_v21 }
 0x20a   : > { %v4084_v21 = vshll.u32 %v7060_v48, 16  ;;  %v4088_v61 = vshrl.u32 %v7060_v48, 16 }
 0x20b   : > { %5498 = vmatmul.msk.bf16.gmra.mxu2 %vm1515_vm12, %v5612_v34  ;;  %v4072_v34 = vrot.slane %v4070_v43, 5  ;;  %v4063_v10 = vsel %vm6152_vm11, %v4058_v55, %v4062_v57 }
 0x20c   : > { %v3151_v27 = vpop.f32.mrf.mxu0  ;;  %v1856_v7 = vpop.f32.mrf.mxu1  ;;  %v4090_v46 = vrot.slane %v4088_v61, 4 }
 0x20d   : > { %v7049_v32 = vadd.f32 %v3151_v27, %v2543_v4  ;;  %v3921_v4 = vld [vmem:[#allocation2 + $0x54] sm:$0xf]  ;;  %v4073_v8 = vsel %vm6152_vm11, %v4068_v0, %v4072_v34 }
 0x20e   : > { %v2495_v22 = vpop.f32.mrf.mxu3  ;;  %v2208_v36 = vpop.f32.mrf.mxu2  ;;  %v4075_v19 = vshrl.u32 %v3921_v4, 16  ;;  %v4078_v11 = vshll.u32 %v3921_v4, 16  ;;  %v7078_v4 = vrot.slane %v4084_v21, 5 }
 0x20f   : > { %5553 = vmatmul.msk.bf16.gmra.mxu0 %vm1515_vm12, %v4777_v23  ;;  %v2544_v49 = vadd.f32 %v2495_v22, %v2254_v53  ;;  %v2255_v62 = vadd.f32 %v2208_v36, %v1852_v40  ;;  %5415 = vmatmul.msk.bf16.gmra.mxu1 %vm1515_vm12, %v3428_v37  ;;  %v4749_v53 = vunpack.c.l.b16 %v4652_v15  ;;  %v3218_v23 = vld [vmem:[#allocation2 + $0x48] sm:$0xe]  ;;  %v3316_v40 = vrot.slane %v3314_v16, 4 }
 0x210   : > { %v5396_v27 = vrot.slane %v3218_v23, 9  ;;  %v4658_v22 = vrot.slane %v7019_v2, 5  ;;  %v4350_v15 = vunpack.c.l.b16 %v4073_v8  ;;  %v4080_v55 = vrot.slane %v4078_v11, 5  ;;  %v5754_v11 = vld [vmem:[#allocation2 + $0x5c] sm:$0x1] }
 0x211   : > { %v3318_v43 = vsel %vm6504_vm15, %v3316_v40, %v3317_v31  ;;  %v4778_v0 = vpack.c.b16 %v4750_v54, %v4749_v53  ;;  %v7082_v31 = vld [vmem:[#allocation2 + $0x5c] sm:$0x1]  ;;  %v1857_v2 = vadd.f32 %v1856_v7, %v6591_v60  ;;  %v4661_v53 = vrot.slane %v7042_v28, 5 }
 0x212   : > { %v3315_v57 = vsel %vm6504_vm15, %v5396_v27, %v3314_v16  ;;  %v5535_v16 = vrot.slane %v4568_v35, 9  ;;  %v4660_v23 = vrot.slane %v4658_v22, 4  ;;  %v4091_v40 = vor.u32 %v4090_v46, %v7078_v4 }
 0x213   : > { %5518 = vmatmul.msk.bf16.gmra.mxu3 %vm1515_vm12, %v4376_v1  ;;  %v3402_v36 = vunpack.c.l.b16 %v3315_v57  ;;  %v4349_v1 = vunpack.c.l.b16 %v4063_v10  ;;  %v4094_v60 = vshll.u32 %v7082_v31, 16 }
 0x214   : > { %v3153_v52 = vpop.f32.mrf.mxu0  ;;  %v7058_v56 = vpop.f32.mrf.mxu1  ;;  %v4659_v7 = vsel %vm6504_vm15, %v5535_v16, %v4658_v22  ;;  %v4662_v28 = vsel %vm6504_vm15, %v4660_v23, %v4661_v53  ;;  %v4092_v21 = vrot.slane %v4091_v40, 4  ;;  %v4665_v16 = vrot.slane %v7060_v48, 5 }
 0x215   : > { %v7068_v12 = vadd.f32 %v3153_v52, %v2544_v49  ;;  %v3403_v49 = vunpack.c.l.b16 %v3318_v43  ;;  %v4377_v8 = vpack.c.b16 %v4350_v15, %v4349_v1  ;;  %v4096_v61 = vrot.slane %v4094_v60, 5  ;;  %v4569_v60 = vld [vmem:[#allocation2 + $0x54] sm:$0xe] }
 0x216   : > { %v2498_v13 = vpop.f32.mrf.mxu3  ;;  %v2210_v37 = vpop.f32.mrf.mxu2  ;;  %v4751_v43 = vunpack.c.l.b16 %v4659_v7  ;;  %v1859_v35 = vadd.f32 %v7058_v56, %v6611_v3  ;;  %v4752_v46 = vunpack.c.l.b16 %v4662_v28  ;;  %v7117_v28 = vld [vmem:[#allocation2 + $0x68] sm:$0x1] }
 0x217   : > { %v2545_v29 = vadd.f32 %v2498_v13, %v2255_v62  ;;  %v2256_v38 = vadd.f32 %v2210_v37, %v1854_v51  ;;  %v4077_v62 = vrot.slane %v4075_v19, 4  ;;  %v3429_v34 = vpack.c.b16 %v3403_v49, %v3402_v36  ;;  %v3924_v19 = vld [vmem:[#allocation2 + $0x60] sm:$0xf]  ;;  %v5755_v49 = vld [vmem:[#allocation2 + $0x58] sm:$0xf] }
 0x218   : > { %v3321_v1 = vrot.slane %v5755_v49, 5  ;;  %v4099_v22 = vshrl.u32 %v3924_v19, 16  ;;  %v4102_v15 = vshll.u32 %v3924_v19, 16  ;;  %v4097_v56 = vsel %vm6152_vm11, %v4092_v21, %v4096_v61 }
 0x219   : > { %v4081_v13 = vor.u32 %v4080_v55, %v4077_v62  ;;  %v3219_v62 = vld [vmem:[#allocation2 + $0x54] sm:$0xe] }
 0x21a   : > { %v4101_v40 = vrot.slane %v4099_v22, 4  ;;  %v4104_v48 = vrot.slane %v4102_v15, 5  ;;  %v4668_v22 = vrot.slane %v7082_v31, 5 }
 0x21b   : > { %5499 = vmatmul.msk.bf16.gmra.mxu2 %vm1515_vm12, %v5613_v24  ;;  %v7094_v24 = vld [vmem:[#allocation2 + $0x64] sm:$0xf] }
 0x21c   : > { %v3156_v52 = vpop.f32.mrf.mxu0  ;;  %v7080_v39 = vpop.f32.mrf.mxu1  ;;  %v4108_v55 = vshll.u32 %v7094_v24, 16 }
 0x21d   : > { %v7085_v51 = vadd.f32 %v3156_v52, %v2545_v29  ;;  %v3324_v29 = vrot.slane %v5754_v11, 5  ;;  %v1862_v49 = vadd.f32 %v7080_v39, %v6620_v18 }
 0x21e   : > { %v2500_v10 = vpop.f32.mrf.mxu3  ;;  %v2213_v54 = vpop.f32.mrf.mxu2  ;;  %v4110_v19 = vrot.slane %v4108_v55, 5  ;;  %v4118_v55 = vshll.u32 %v7117_v28, 16 }
 0x21f   : > { %5554 = vmatmul.msk.bf16.gmra.mxu0 %vm1515_vm12, %v4778_v0  ;;  %v2546_v37 = vadd.f32 %v2500_v10, %v2256_v38  ;;  %v2257_v27 = vadd.f32 %v2213_v54, %v1857_v2  ;;  %5416 = vmatmul.msk.bf16.gmra.mxu1 %vm1515_vm12, %v3429_v34  ;;  %v4082_v38 = vrot.slane %v4081_v13, 4  ;;  %v4112_v0 = vshrl.u32 %v7094_v24, 16  ;;  %v5614_v54 = vld [vmem:[#allocation2 + $0x54] sm:$0xff] }
 0x220   : > { %v5397_v10 = vrot.slane %v3219_v62, 9 }
 0x221   : > { %v4087_v3 = vsel %vm6152_vm11, %v4082_v38, %v7078_v4  ;;  %v4114_v11 = vrot.slane %v4112_v0, 4  ;;  %v4352_v38 = vunpack.c.l.b16 %v4097_v56 }
 0x222   : > { %v3322_v13 = vsel %vm6504_vm15, %v5397_v10, %v3321_v1  ;;  %v4351_v4 = vunpack.c.l.b16 %v4087_v3  ;;  %v5756_v3 = vld [vmem:[#allocation2 + $0x68] sm:$0x1] }
 0x223   : > { %5519 = vmatmul.msk.bf16.gmra.mxu3 %vm1515_vm12, %v4377_v8  ;;  %v3323_v8 = vrot.slane %v3321_v1, 4  ;;  %v3404_v7 = vunpack.c.l.b16 %v3322_v13  ;;  %v4667_v1 = vrot.slane %v4665_v16, 4  ;;  %v4115_v62 = vor.u32 %v4114_v11, %v4110_v19 }
 0x224   : > { %v3158_v57 = vpop.f32.mrf.mxu0  ;;  %v7099_v36 = vpop.f32.mrf.mxu1  ;;  %v3331_v56 = vrot.slane %v5756_v3, 5 }
 0x225   : > { %v7105_v34 = vadd.f32 %v3158_v57, %v2546_v37  ;;  %v3325_v37 = vsel %vm6504_vm15, %v3323_v8, %v3324_v29  ;;  %v4779_v57 = vpack.c.b16 %v4752_v46, %v4751_v43  ;;  %v5536_v29 = vrot.slane %v4569_v60, 9 }
 0x226   : > { %v2503_v52 = vpop.f32.mrf.mxu3  ;;  %v2215_v2 = vpop.f32.mrf.mxu2  ;;  %v4669_v39 = vsel %vm6504_vm15, %v4667_v1, %v4668_v22  ;;  %v4116_v8 = vrot.slane %v4115_v62, 4  ;;  %v5615_v62 = vld [vmem:[#allocation2 + $0x60] sm:$0xff] }
 0x227   : > { %v2547_v23 = vadd.f32 %v2503_v52, %v2257_v27  ;;  %v2258_v53 = vadd.f32 %v2215_v2, %v1859_v35  ;;  %v3405_v27 = vunpack.c.l.b16 %v3325_v37  ;;  %v4105_v35 = vor.u32 %v4104_v48, %v4101_v40  ;;  %v5757_v48 = vld [vmem:[#allocation2 + $0x64] sm:$0xf] }
 0x228   : > { %v4378_v2 = vpack.c.b16 %v4352_v38, %v4351_v4  ;;  %v4666_v18 = vsel %vm6504_vm15, %v5536_v29, %v4665_v16  ;;  %v4754_v37 = vunpack.c.l.b16 %v4669_v39  ;;  %v3328_v60 = vrot.slane %v5757_v48, 5  ;;  %v4570_v39 = vld [vmem:[#allocation2 + $0x60] sm:$0xe] }
 0x229   : > { %v3430_v21 = vpack.c.b16 %v3405_v27, %v3404_v7  ;;  %v4106_v31 = vrot.slane %v4105_v35, 4  ;;  %v7135_v7 = vld [vmem:[#allocation2 + $0x70] sm:$0xf]  ;;  %v1864_v16 = vadd.f32 %v7099_v36, %v6639_v45 }
 0x22a   : > { %v4132_v45 = vshll.u32 %v7135_v7, 16  ;;  %v4136_v36 = vshrl.u32 %v7135_v7, 16 }
 0x22b   : > { %5500 = vmatmul.msk.bf16.gmra.mxu2 %vm1515_vm12, %v5614_v54  ;;  %v4120_v54 = vrot.slane %v4118_v55, 5  ;;  %v4111_v27 = vsel %vm6152_vm11, %v4106_v31, %v4110_v19 }
 0x22c   : > { %v3161_v61 = vpop.f32.mrf.mxu0  ;;  %v1866_v15 = vpop.f32.mrf.mxu1  ;;  %v4138_v3 = vrot.slane %v4136_v36, 4 }
 0x22d   : > { %v7124_v0 = vadd.f32 %v3161_v61, %v2547_v23  ;;  %v3927_v23 = vld [vmem:[#allocation2 + $0x6c] sm:$0xf]  ;;  %v4121_v11 = vsel %vm6152_vm11, %v4116_v8, %v4120_v54 }
 0x22e   : > { %v2505_v43 = vpop.f32.mrf.mxu3  ;;  %v2218_v46 = vpop.f32.mrf.mxu2  ;;  %v4123_v29 = vshrl.u32 %v3927_v23, 16  ;;  %v4126_v1 = vshll.u32 %v3927_v23, 16  ;;  %v4134_v23 = vrot.slane %v4132_v45, 5 }
 0x22f   : > { %5555 = vmatmul.msk.bf16.gmra.mxu0 %vm1515_vm12, %v4779_v57  ;;  %v2548_v52 = vadd.f32 %v2505_v43, %v2258_v53  ;;  %v2259_v10 = vadd.f32 %v2218_v46, %v1862_v49  ;;  %5417 = vmatmul.msk.bf16.gmra.mxu1 %vm1515_vm12, %v3430_v21  ;;  %v4753_v53 = vunpack.c.l.b16 %v4666_v18  ;;  %v3220_v57 = vld [vmem:[#allocation2 + $0x60] sm:$0xe]  ;;  %v3330_v49 = vrot.slane %v3328_v60, 4 }
 0x230   : > { %v5398_v61 = vrot.slane %v3220_v57, 9  ;;  %v4672_v43 = vrot.slane %v7094_v24, 5  ;;  %v4354_v18 = vunpack.c.l.b16 %v4121_v11  ;;  %v4128_v31 = vrot.slane %v4126_v1, 5  ;;  %v3930_v1 = vld [vmem:[#allocation2 + $0x78] sm:$0xf] }
 0x231   : > { %v3332_v55 = vsel %vm6504_vm15, %v3330_v49, %v3331_v56  ;;  %v4780_v8 = vpack.c.b16 %v4754_v37, %v4753_v53  ;;  %v1867_v24 = vadd.f32 %v1866_v15, %v6656_v25  ;;  %v5537_v56 = vrot.slane %v4570_v39, 9 }
 0x232   : > { %v3329_v19 = vsel %vm6504_vm15, %v5398_v61, %v3328_v60  ;;  %v7155_v60 = vld [vmem:[#allocation2 + $0x74] sm:$0x1]  ;;  %v4674_v57 = vrot.slane %v4672_v43, 4  ;;  %v4675_v53 = vrot.slane %v7117_v28, 5  ;;  %v4139_v49 = vor.u32 %v4138_v3, %v4134_v23 }
 0x233   : > { %5520 = vmatmul.msk.bf16.gmra.mxu3 %vm1515_vm12, %v4378_v2  ;;  %v3406_v46 = vunpack.c.l.b16 %v3329_v19  ;;  %v4353_v2 = vunpack.c.l.b16 %v4111_v27  ;;  %v4673_v25 = vsel %vm6504_vm15, %v5537_v56, %v4672_v43  ;;  %v5758_v19 = vld [vmem:[#allocation2 + $0x70] sm:$0xf]  ;;  %v3221_v43 = vld [vmem:[#allocation2 + $0x6c] sm:$0xe]  ;;  %v4147_v39 = vshrl.u32 %v3930_v1, 16 }
 0x234   : > { %v3163_v13 = vpop.f32.mrf.mxu0  ;;  %v7133_v40 = vpop.f32.mrf.mxu1  ;;  %v4676_v15 = vsel %vm6504_vm15, %v4674_v57, %v4675_v53  ;;  %v4150_v56 = vshll.u32 %v3930_v1, 16  ;;  %v5616_v57 = vld [vmem:[#allocation2 + $0x6c] sm:$0xff] }
 0x235   : > { %v7143_v4 = vadd.f32 %v3163_v13, %v2548_v52  ;;  %v3407_v52 = vunpack.c.l.b16 %v3332_v55  ;;  %v4379_v11 = vpack.c.b16 %v4354_v18, %v4353_v2  ;;  %v3335_v55 = vrot.slane %v5758_v19, 5  ;;  %v7173_v18 = vld [vmem:[#allocation2 + $0x7c] sm:$0xf] }
 0x236   : > { %v2508_v38 = vpop.f32.mrf.mxu3  ;;  %v2220_v21 = vpop.f32.mrf.mxu2  ;;  %v4149_v1 = vrot.slane %v4147_v39, 4  ;;  %v7194_v39 = vld [vmem:[#allocation2 + $0x80] sm:$0x1] }
 0x237   : > { %v2549_v22 = vadd.f32 %v2508_v38, %v2259_v10  ;;  %v2260_v35 = vadd.f32 %v2220_v21, %v1864_v16  ;;  %v4125_v10 = vrot.slane %v4123_v29, 4  ;;  %v3431_v54 = vpack.c.b16 %v3407_v52, %v3406_v46  ;;  %v7603_v52 = vld [vmem:[#allocation10_spill] sm:$0xff] }
 0x238   : > { %v4142_v29 = vshll.u32 %v7155_v60, 16  ;;  %v4756_v46 = vunpack.c.l.b16 %v4676_v15  ;;  %v1869_v2 = vadd.f32 %v7133_v40, %v7603_v52  ;;  %v3337_v3 = vrot.slane %v3335_v55, 4 }
 0x239   : > { %v4129_v38 = vor.u32 %v4128_v31, %v4125_v10 }
 0x23b   : > { %5501 = vmatmul.msk.bf16.gmra.mxu2 %vm1515_vm12, %v5615_v62  ;;  %v4130_v28 = vrot.slane %v4129_v38, 4  ;;  %v4144_v62 = vrot.slane %v4142_v29, 5  ;;  %v4571_v29 = vld [vmem:[#allocation2 + $0x6c] sm:$0xe] }
 0x23c   : > { %v3166_v13 = vpop.f32.mrf.mxu0  ;;  %v7153_v48 = vpop.f32.mrf.mxu1 }
 0x23d   : > { %v7158_v16 = vadd.f32 %v3166_v13, %v2549_v22  ;;  %v4140_v22 = vrot.slane %v4139_v49, 4  ;;  %v5759_v13 = vld [vmem:[#allocation2 + $0x74] sm:$0x1]  ;;  %v4135_v53 = vsel %vm6152_vm11, %v4130_v28, %v4134_v23  ;;  %v4160_v49 = vshrl.u32 %v7173_v18, 16 }
 0x23e   : > { %v2510_v27 = vpop.f32.mrf.mxu3  ;;  %v2223_v37 = vpop.f32.mrf.mxu2  ;;  %v4152_v23 = vrot.slane %v4150_v56, 5 }
 0x23f   : > { %5556 = vmatmul.msk.bf16.gmra.mxu0 %vm1515_vm12, %v4780_v8  ;;  %v2550_v21 = vadd.f32 %v2510_v27, %v2260_v35  ;;  %v2261_v61 = vadd.f32 %v2223_v37, %v1867_v24  ;;  %5418 = vmatmul.msk.bf16.gmra.mxu1 %vm1515_vm12, %v3431_v54  ;;  %v4755_v35 = vunpack.c.l.b16 %v4673_v25  ;;  %v5399_v54 = vrot.slane %v3221_v43, 9 }
 0x240   : > { %v3338_v24 = vrot.slane %v5759_v13, 5  ;;  %v4145_v40 = vsel %vm6152_vm11, %v4140_v22, %v4144_v62  ;;  %v4355_v22 = vunpack.c.l.b16 %v4135_v53  ;;  %v4162_v43 = vrot.slane %v4160_v49, 4 }
 0x241   : > { %v3336_v37 = vsel %vm6504_vm15, %v5399_v54, %v3335_v55  ;;  %v4781_v28 = vpack.c.b16 %v4756_v46, %v4755_v35  ;;  %v4356_v62 = vunpack.c.l.b16 %v4145_v40  ;;  %v5538_v55 = vrot.slane %v4571_v29, 9 }
 0x242   : > { %v3339_v38 = vsel %vm6504_vm15, %v3337_v3, %v3338_v24  ;;  %v3408_v25 = vunpack.c.l.b16 %v3336_v37  ;;  %v4682_v54 = vrot.slane %v7155_v60, 5  ;;  %v4153_v13 = vor.u32 %v4152_v23, %v4149_v1  ;;  %v3933_v37 = vld [vmem:[#allocation2 + $0x84] sm:$0xf]  ;;  %v7605_v23 = vld [vmem:[#allocation12_spill] sm:$0xff] }
 0x243   : > { %5521 = vmatmul.msk.bf16.gmra.mxu3 %vm1515_vm12, %v4379_v11  ;;  %v3409_v15 = vunpack.c.l.b16 %v3339_v38  ;;  %v4380_v56 = vpack.c.b16 %v4356_v62, %v4355_v22  ;;  %v4166_v60 = vshll.u32 %v7194_v39, 16  ;;  %v3222_v22 = vld [vmem:[#allocation2 + $0x78] sm:$0xe]  ;;  %v4171_v62 = vshrl.u32 %v3933_v37, 16 }
 0x244   : > { %v3168_v45 = vpop.f32.mrf.mxu0  ;;  %v7169_v36 = vpop.f32.mrf.mxu1  ;;  %v4154_v40 = vrot.slane %v4153_v13, 4 }
 0x245   : > { %v7175_v10 = vadd.f32 %v3168_v45, %v2550_v21  ;;  %v4156_v21 = vshll.u32 %v7173_v18, 16  ;;  %v3432_v45 = vpack.c.b16 %v3409_v15, %v3408_v25  ;;  %v4168_v29 = vrot.slane %v4166_v60, 5  ;;  %v5760_v15 = vld [vmem:[#allocation2 + $0x7c] sm:$0xf] }
 0x246   : > { %v2513_v31 = vpop.f32.mrf.mxu3  ;;  %v2225_v8 = vpop.f32.mrf.mxu2  ;;  %v3342_v1 = vrot.slane %v5760_v15, 5 }
 0x247   : > { %v2551_v27 = vadd.f32 %v2513_v31, %v2261_v61  ;;  %v2262_v11 = vadd.f32 %v2225_v8, %v1869_v2  ;;  %v4679_v61 = vrot.slane %v7135_v7, 5  ;;  %v4158_v2 = vrot.slane %v4156_v21, 5  ;;  %v7604_v31 = vld [vmem:[#allocation11_spill] sm:$0xff] }
 0x248   : > { %v1872_v8 = vadd.f32 %v7153_v48, %v7604_v31 }
 0x249   : > { %v4681_v7 = vrot.slane %v4679_v61, 4  ;;  %v4680_v48 = vsel %vm6504_vm15, %v5538_v55, %v4679_v61  ;;  %v4163_v53 = vor.u32 %v4162_v43, %v4158_v2  ;;  %v7208_v61 = vld [vmem:[#allocation2 + $0x88] sm:$0xf]  ;;  %v4159_v31 = vsel %vm6152_vm11, %v4154_v40, %v4158_v2 }
 0x24a   : > { %v4757_v38 = vunpack.c.l.b16 %v4680_v48  ;;  %v4180_v48 = vshll.u32 %v7208_v61, 16 }
 0x24b   : > { %5502 = vmatmul.msk.bf16.gmra.mxu2 %vm1515_vm12, %v5616_v57  ;;  %v4164_v49 = vrot.slane %v4163_v53, 4  ;;  %v4686_v53 = vrot.slane %v7173_v18, 5 }
 0x24c   : > { %v3171_v19 = vpop.f32.mrf.mxu0  ;;  %v7189_v52 = vpop.f32.mrf.mxu1 }
 0x24d   : > { %v7196_v35 = vadd.f32 %v3171_v19, %v2551_v27  ;;  %v4683_v27 = vsel %vm6504_vm15, %v4681_v7, %v4682_v54  ;;  %v3344_v7 = vrot.slane %v3342_v1, 4  ;;  %v5761_v54 = vld [vmem:[#allocation2 + $0x80] sm:$0x1] }
 0x24e   : > { %v2515_v46 = vpop.f32.mrf.mxu3  ;;  %v2228_v3 = vpop.f32.mrf.mxu2 }
 0x24f   : > { %5557 = vmatmul.msk.bf16.gmra.mxu0 %vm1515_vm12, %v4781_v28  ;;  %v2552_v24 = vadd.f32 %v2515_v46, %v2262_v11  ;;  %v2263_v57 = vadd.f32 %v2228_v3, %v1872_v8  ;;  %5419 = vmatmul.msk.bf16.gmra.mxu1 %vm1515_vm12, %v3432_v45  ;;  %v4758_v11 = vunpack.c.l.b16 %v4683_v27  ;;  %v1874_v28 = vadd.f32 %v7169_v36, %v7605_v23  ;;  %v4572_v27 = vld [vmem:[#allocation2 + $0x78] sm:$0xe] }
 0x250   : > { %v4174_v45 = vshll.u32 %v3933_v37, 16  ;;  %v5400_v8 = vrot.slane %v3222_v22, 9  ;;  %v3345_v46 = vrot.slane %v5761_v54, 5  ;;  %v4184_v36 = vshrl.u32 %v7208_v61, 16 }
 0x251   : > { %v4173_v37 = vrot.slane %v4171_v62, 4  ;;  %v4782_v15 = vpack.c.b16 %v4758_v11, %v4757_v38  ;;  %v4357_v23 = vunpack.c.l.b16 %v4159_v31 }
 0x252   : > { %v3343_v60 = vsel %vm6504_vm15, %v5400_v8, %v3342_v1  ;;  %v3346_v2 = vsel %vm6504_vm15, %v3344_v7, %v3345_v46  ;;  %v7228_v1 = vld [vmem:[#allocation2 + $0x8c] sm:$0x1]  ;;  %v4688_v8 = vrot.slane %v4686_v53, 4  ;;  %v4689_v7 = vrot.slane %v7194_v39, 5 }
 0x253   : > { %5522 = vmatmul.msk.bf16.gmra.mxu3 %vm1515_vm12, %v4380_v56  ;;  %v5617_v56 = vld [vmem:[#allocation2 + $0x78] sm:$0xff]  ;;  %v3410_v40 = vunpack.c.l.b16 %v3343_v60  ;;  %v3936_v60 = vld [vmem:[#allocation2 + $0x90] sm:$0xf] }
 0x254   : > { %v3173_v21 = vpop.f32.mrf.mxu0  ;;  %v7206_v25 = vpop.f32.mrf.mxu1  ;;  %v4690_v39 = vsel %vm6504_vm15, %v4688_v8, %v4689_v7  ;;  %v4195_v7 = vshrl.u32 %v3936_v60, 16 }
 0x255   : > { %v7212_v19 = vadd.f32 %v3173_v21, %v2552_v24  ;;  %v4169_v24 = vsel %vm6152_vm11, %v4164_v49, %v4168_v29  ;;  %v4176_v21 = vrot.slane %v4174_v45, 5  ;;  %v4182_v49 = vrot.slane %v4180_v48, 5 }
 0x256   : > { %v2518_v55 = vpop.f32.mrf.mxu3  ;;  %v2230_v43 = vpop.f32.mrf.mxu2  ;;  %v4186_v29 = vrot.slane %v4184_v36, 4  ;;  %v3583_v36 = vadd.f32 %v7189_v52, %v6718_v14  ;;  %v3223_v52 = vld [vmem:[#allocation2 + $0x84] sm:$0xe] }
 0x257   : > { %v2553_v3 = vadd.f32 %v2518_v55, %v2263_v57  ;;  %v2264_v13 = vadd.f32 %v2230_v43, %v1874_v28  ;;  %v3411_v57 = vunpack.c.l.b16 %v3346_v2  ;;  %v4358_v28 = vunpack.c.l.b16 %v4169_v24 }
 0x258   : > { %v5539_v55 = vrot.slane %v4572_v27, 9  ;;  %v4177_v62 = vor.u32 %v4176_v21, %v4173_v37  ;;  %v4187_v46 = vor.u32 %v4186_v29, %v4182_v49  ;;  %v7246_v21 = vld [vmem:[#allocation2 + $0x94] sm:$0xf]  ;;  %v5401_v29 = vrot.slane %v3223_v52, 9 }
 0x259   : > { %v3433_v22 = vpack.c.b16 %v3411_v57, %v3410_v40  ;;  %v4381_v54 = vpack.c.b16 %v4358_v28, %v4357_v23  ;;  %v4760_v40 = vunpack.c.l.b16 %v4690_v39  ;;  %v3584_v39 = vadd.f32 %v7206_v25, %v6736_v63  ;;  %v7279_v25 = vld [vmem:[#allocation2 + $0x98] sm:$0x1] }
 0x25a   : > { %v4687_v48 = vsel %vm6504_vm15, %v5539_v55, %v4686_v53  ;;  %v5762_v53 = vld [vmem:[#allocation2 + $0x88] sm:$0xf]  ;;  %v5763_v55 = vld [vmem:[#allocation2 + $0x8c] sm:$0x1] }
 0x25b   : > { %5503 = vmatmul.msk.bf16.gmra.mxu2 %vm1515_vm12, %v5617_v56  ;;  %v4190_v56 = vshll.u32 %v7228_v1, 16  ;;  %v4759_v27 = vunpack.c.l.b16 %v4687_v48  ;;  %v3349_v37 = vrot.slane %v5762_v53, 5  ;;  %v3352_v8 = vrot.slane %v5763_v55, 5 }
 0x25c   : > { %v3176_v18 = vpop.f32.mrf.mxu0  ;;  %v7226_v43 = vpop.f32.mrf.mxu1  ;;  %v4696_v55 = vrot.slane %v7228_v1, 5 }
 0x25d   : > { %v7231_v45 = vadd.f32 %v3176_v18, %v2553_v3  ;;  %v4178_v3 = vrot.slane %v4177_v62, 4  ;;  %v4192_v24 = vrot.slane %v4190_v56, 5  ;;  %v3351_v18 = vrot.slane %v3349_v37, 4  ;;  %v5618_v62 = vld [vmem:[#allocation2 + $0x84] sm:$0xff] }
 0x25e   : > { %v2520_v38 = vpop.f32.mrf.mxu3  ;;  %v3794_v11 = vpop.f32.mrf.mxu2 }
 0x25f   : > { %5558 = vmatmul.msk.bf16.gmra.mxu0 %vm1515_vm12, %v4782_v15  ;;  %v2554_v31 = vadd.f32 %v2520_v38, %v2264_v13  ;;  %5420 = vmatmul.msk.bf16.gmra.mxu1 %vm1515_vm12, %v3433_v22  ;;  %v4188_v13 = vrot.slane %v4187_v46, 4  ;;  %v3874_v15 = vadd.f32 %v3794_v11, %v3583_v36  ;;  %v4183_v14 = vsel %vm6152_vm11, %v4178_v3, %v4182_v49 }
 0x260   : > { %v4198_v11 = vshll.u32 %v3936_v60, 16  ;;  %v4208_v49 = vshrl.u32 %v7246_v21, 16  ;;  %v4783_v46 = vpack.c.b16 %v4760_v40, %v4759_v27  ;;  %v3353_v56 = vsel %vm6504_vm15, %v3351_v18, %v3352_v8  ;;  %v4573_v27 = vld [vmem:[#allocation2 + $0x84] sm:$0xe] }
 0x261   : > { %v4193_v38 = vsel %vm6152_vm11, %v4188_v13, %v4192_v24  ;;  %v3413_v36 = vunpack.c.l.b16 %v3353_v56  ;;  %v4359_v13 = vunpack.c.l.b16 %v4183_v14  ;;  %v4693_v60 = vrot.slane %v7208_v61, 5 }
 0x262   : > { %v4360_v24 = vunpack.c.l.b16 %v4193_v38  ;;  %v4200_v53 = vrot.slane %v4198_v11, 5  ;;  %v4210_v52 = vrot.slane %v4208_v49, 4  ;;  %v5540_v18 = vrot.slane %v4573_v27, 9  ;;  %v3224_v27 = vld [vmem:[#allocation2 + $0x90] sm:$0xe] }
 0x263   : > { %5523 = vmatmul.msk.bf16.gmra.mxu3 %vm1515_vm12, %v4381_v54  ;;  %v4204_v54 = vshll.u32 %v7246_v21, 16  ;;  %v4214_v11 = vshll.u32 %v7279_v25, 16  ;;  %v3585_v49 = vadd.f32 %v7226_v43, %v6742_v9 }
 0x264   : > { %v3178_v2 = vpop.f32.mrf.mxu0  ;;  %v7244_v57 = vpop.f32.mrf.mxu1  ;;  %v4694_v1 = vsel %vm6504_vm15, %v5540_v18, %v4693_v60  ;;  %v5619_v18 = vld [vmem:[#allocation2 + $0x90] sm:$0xff] }
 0x265   : > { %v7255_v23 = vadd.f32 %v3178_v2, %v2554_v31  ;;  %v3350_v31 = vsel %vm6504_vm15, %v5401_v29, %v3349_v37  ;;  %v4197_v2 = vrot.slane %v4195_v7, 4  ;;  %v7270_v37 = vrot.slane %v4204_v54, 5 }
 0x266   : > { %v4452_v28 = vpop.f32.mrf.mxu3  ;;  %v3796_v22 = vpop.f32.mrf.mxu2  ;;  %v3412_v3 = vunpack.c.l.b16 %v3350_v31  ;;  %v4695_v7 = vrot.slane %v4693_v60, 4 }
 0x267   : > { %v4532_v48 = vadd.f32 %v4452_v28, %v3874_v15  ;;  %v3875_v15 = vadd.f32 %v3796_v22, %v3584_v39  ;;  %v4382_v28 = vpack.c.b16 %v4360_v24, %v4359_v13  ;;  %v4211_v38 = vor.u32 %v4210_v52, %v7270_v37  ;;  %v3939_v22 = vld [vmem:[#allocation2 + $0x9c] sm:$0xf]  ;;  %v7297_v24 = vld [vmem:[#allocation2 + $0xa0] sm:$0xf] }
 0x268   : > { %v3434_v40 = vpack.c.b16 %v3413_v36, %v3412_v3  ;;  %v5764_v36 = vld [vmem:[#allocation2 + $0x94] sm:$0xf]  ;;  %v4219_v9 = vshrl.u32 %v3939_v22, 16 }
 0x269   : > { %v4212_v56 = vrot.slane %v4211_v38, 4  ;;  %v3356_v13 = vrot.slane %v5764_v36, 5  ;;  %v4700_v38 = vrot.slane %v7246_v21, 5 }
 0x26b   : > { %5504 = vmatmul.msk.bf16.gmra.mxu2 %vm1515_vm12, %v5618_v62  ;;  %v4201_v62 = vor.u32 %v4200_v53, %v4197_v2  ;;  %v4761_v2 = vunpack.c.l.b16 %v4694_v1  ;;  %v4574_v1 = vld [vmem:[#allocation2 + $0x90] sm:$0xe] }
 0x26c   : > { %v4854_v29 = vpop.f32.mrf.mxu0  ;;  %v7277_v63 = vpop.f32.mrf.mxu1 }
 0x26d   : > { %v4934_v61 = vadd.f32 %v4854_v29, %v4532_v48  ;;  %v4202_v31 = vrot.slane %v4201_v62, 4  ;;  %v4216_v48 = vrot.slane %v4214_v11, 5  ;;  %v4232_v62 = vshrl.u32 %v7297_v24, 16 }
 0x26e   : > { %v4454_v14 = vpop.f32.mrf.mxu3  ;;  %v3799_v8 = vpop.f32.mrf.mxu2 }
 0x26f   : > { %5559 = vmatmul.msk.bf16.gmra.mxu0 %vm1515_vm12, %v4783_v46  ;;  %4967 = vst.msk [vmem:[%s7275_s30] sm:$0xff] %vm4966_vm0, %v4934_v61  ;;  %5421 = vmatmul.msk.bf16.gmra.mxu1 %vm1515_vm12, %v3434_v40  ;;  %v4533_v54 = vadd.f32 %v4454_v14, %v3875_v15  ;;  %v4697_v46 = vsel %vm6504_vm15, %v4695_v7, %v4696_v55  ;;  %v4222_v40 = vshll.u32 %v3939_v22, 16  ;;  %v5402_v61 = vrot.slane %v3224_v27, 9  ;;  %v5765_v14 = vld [vmem:[#allocation2 + $0x98] sm:$0x1] }
 0x270   : > { %v3876_v60 = vadd.f32 %v3799_v8, %v3585_v49  ;;  %v4762_v53 = vunpack.c.l.b16 %v4697_v46  ;;  %v3358_v15 = vrot.slane %v3356_v13, 4  ;;  %v4207_v55 = vsel %vm6152_vm11, %v4202_v31, %v7270_v37 }
 0x271   : > { %v4217_v7 = vsel %vm6152_vm11, %v4212_v56, %v4216_v48  ;;  %v4228_v8 = vshll.u32 %v7297_v24, 16  ;;  %v3357_v11 = vsel %vm6504_vm15, %v5402_v61, %v3356_v13  ;;  %v4221_v22 = vrot.slane %v4219_v9, 4  ;;  %v7606_v56 = vld [vmem:[#allocation13_spill] sm:$0xff] }
 0x272   : > { %v3414_v46 = vunpack.c.l.b16 %v3357_v11  ;;  %v4224_v31 = vrot.slane %v4222_v40, 5  ;;  %v3586_v48 = vadd.f32 %v7244_v57, %v7606_v56  ;;  %v4361_v36 = vunpack.c.l.b16 %v4207_v55  ;;  %v7607_v11 = vld [vmem:[#allocation14_spill] sm:$0xff] }
 0x273   : > { %5524 = vmatmul.msk.bf16.gmra.mxu3 %vm1515_vm12, %v4382_v28  ;;  %v3359_v28 = vrot.slane %v5765_v14, 5  ;;  %v4362_v21 = vunpack.c.l.b16 %v4217_v7  ;;  %v4230_v13 = vrot.slane %v4228_v8, 5  ;;  %v4234_v27 = vrot.slane %v4232_v62, 4  ;;  %v5766_v56 = vld [vmem:[#allocation2 + $0xa0] sm:$0xf] }
 0x274   : > { %v4856_v39 = vpop.f32.mrf.mxu0  ;;  %v7295_v3 = vpop.f32.mrf.mxu1  ;;  %v4703_v9 = vrot.slane %v7279_v25, 5  ;;  %v4225_v57 = vor.u32 %v4224_v31, %v4221_v22 }
 0x275   : > { %v4935_v43 = vadd.f32 %v4856_v39, %v4533_v54  ;;  %v3360_v54 = vsel %vm6504_vm15, %v3358_v15, %v3359_v28  ;;  %v4784_v39 = vpack.c.b16 %v4762_v53, %v4761_v2  ;;  %v5541_v15 = vrot.slane %v4574_v1, 9  ;;  %v3942_v1 = vld [vmem:[#allocation2 + $0xa8] sm:$0xf] }
 0x276   : > { %v4457_v52 = vpop.f32.mrf.mxu3  ;;  %v3801_v29 = vpop.f32.mrf.mxu2  ;;  %v3415_v37 = vunpack.c.l.b16 %v3360_v54  ;;  %v4702_v53 = vrot.slane %v4700_v38, 4  ;;  %v4235_v55 = vor.u32 %v4234_v27, %v4230_v13  ;;  %v4226_v62 = vrot.slane %v4225_v57, 4  ;;  %v5620_v57 = vld [vmem:[#allocation2 + $0x9c] sm:$0xff] }
 0x277   : > { %4968 = vst.msk [vmem:[%s7275_s30 + $0x8] sm:$0xff] %vm4966_vm0, %v4935_v43  ;;  %v4534_v49 = vadd.f32 %v4457_v52, %v3876_v60  ;;  %v7319_v52 = vld [vmem:[#allocation2 + $0xa4] sm:$0x1]  ;;  %v3877_v40 = vadd.f32 %v3801_v29, %v3586_v48  ;;  %v4701_v8 = vsel %vm6504_vm15, %v5541_v15, %v4700_v38  ;;  %v3587_v54 = vadd.f32 %v7277_v63, %v7607_v11  ;;  %v7335_v48 = vld [vmem:[#allocation2 + $0xac] sm:$0xf] }
 0x278   : > { %v3435_v43 = vpack.c.b16 %v3415_v37, %v3414_v46  ;;  %v4238_v25 = vshll.u32 %v7319_v52, 16  ;;  %v4704_v29 = vsel %vm6504_vm15, %v4702_v53, %v4703_v9  ;;  %v4236_v22 = vrot.slane %v4235_v55, 4 }
 0x279   : > { %v4763_v37 = vunpack.c.l.b16 %v4701_v8  ;;  %v4764_v31 = vunpack.c.l.b16 %v4704_v29  ;;  %v3363_v38 = vrot.slane %v5766_v56, 5  ;;  %v4231_v63 = vsel %vm6152_vm11, %v4226_v62, %v4230_v13  ;;  %v7608_v29 = vld [vmem:[#allocation15_spill] sm:$0xff] }
 0x27a   : > { %v4243_v53 = vshrl.u32 %v3942_v1, 16  ;;  %v4256_v55 = vshrl.u32 %v7335_v48, 16  ;;  %v3588_v62 = vadd.f32 %v7295_v3, %v7608_v29  ;;  %v7357_v3 = vld [vmem:[#allocation2 + $0xb0] sm:$0x1] }
 0x27b   : > { %5505 = vmatmul.msk.bf16.gmra.mxu2 %vm1515_vm12, %v5619_v18  ;;  %v4383_v18 = vpack.c.b16 %v4362_v21, %v4361_v36  ;;  %v3365_v9 = vrot.slane %v3363_v38, 4  ;;  %v4785_v13 = vpack.c.b16 %v4764_v31, %v4763_v37  ;;  %v4575_v37 = vld [vmem:[#allocation2 + $0x9c] sm:$0xe] }
 0x27c   : > { %v4859_v61 = vpop.f32.mrf.mxu0  ;;  %v7317_v60 = vpop.f32.mrf.mxu1 }
 0x27d   : > { %v4936_v2 = vadd.f32 %v4859_v61, %v4534_v49  ;;  %v4240_v49 = vrot.slane %v4238_v25, 5 }
 0x27e   : > { %v4459_v14 = vpop.f32.mrf.mxu3  ;;  %v3804_v28 = vpop.f32.mrf.mxu2 }
 0x27f   : > { %5560 = vmatmul.msk.bf16.gmra.mxu0 %vm1515_vm12, %v4784_v39  ;;  %4969 = vst.msk [vmem:[%s7275_s30 + $0x10] sm:$0xff] %vm4966_vm0, %v4936_v2  ;;  %5422 = vmatmul.msk.bf16.gmra.mxu1 %vm1515_vm12, %v3435_v43  ;;  %v4535_v7 = vadd.f32 %v4459_v14, %v3877_v40  ;;  %v3878_v21 = vadd.f32 %v3804_v28, %v3587_v54  ;;  %v3225_v43 = vld [vmem:[#allocation2 + $0x9c] sm:$0xe]  ;;  %v5767_v2 = vld [vmem:[#allocation2 + $0xa4] sm:$0x1]  ;;  %v4252_v28 = vshll.u32 %v7335_v48, 16 }
 0x280   : > { %v5403_v15 = vrot.slane %v3225_v43, 9  ;;  %v3366_v40 = vrot.slane %v5767_v2, 5  ;;  %v4241_v14 = vsel %vm6152_vm11, %v4236_v22, %v4240_v49  ;;  %v4707_v49 = vrot.slane %v7297_v24, 5 }
 0x281   : > { %v4364_v22 = vunpack.c.l.b16 %v4241_v14  ;;  %v5542_v24 = vrot.slane %v4575_v37, 9  ;;  %v4710_v2 = vrot.slane %v7319_v52, 5 }
 0x282   : > { %v3364_v25 = vsel %vm6504_vm15, %v5403_v15, %v3363_v38  ;;  %v7353_v38 = vrot.slane %v4252_v28, 5 }
 0x283   : > { %5525 = vmatmul.msk.bf16.gmra.mxu3 %vm1515_vm12, %v4383_v18  ;;  %v4246_v18 = vshll.u32 %v3942_v1, 16  ;;  %v3416_v11 = vunpack.c.l.b16 %v3364_v25  ;;  %v4245_v1 = vrot.slane %v4243_v53, 4  ;;  %v4709_v53 = vrot.slane %v4707_v49, 4 }
 0x284   : > { %v4861_v46 = vpop.f32.mrf.mxu0  ;;  %v7333_v39 = vpop.f32.mrf.mxu1  ;;  %v4708_v52 = vsel %vm6504_vm15, %v5542_v24, %v4707_v49 }
 0x285   : > { %v4937_v36 = vadd.f32 %v4861_v46, %v4535_v7  ;;  %v3367_v7 = vsel %vm6504_vm15, %v3365_v9, %v3366_v40  ;;  %v4363_v46 = vunpack.c.l.b16 %v4231_v63  ;;  %v4248_v56 = vrot.slane %v4246_v18, 5 }
 0x286   : > { %v4462_v27 = vpop.f32.mrf.mxu3  ;;  %v3806_v61 = vpop.f32.mrf.mxu2  ;;  %v3417_v54 = vunpack.c.l.b16 %v3367_v7  ;;  %v4262_v18 = vshll.u32 %v7357_v3, 16  ;;  %v4765_v37 = vunpack.c.l.b16 %v4708_v52  ;;  %v4576_v52 = vld [vmem:[#allocation2 + $0xa8] sm:$0xe] }
 0x287   : > { %4970 = vst.msk [vmem:[%s7275_s30 + $0x18] sm:$0xff] %vm4966_vm0, %v4937_v36  ;;  %v4536_v8 = vadd.f32 %v4462_v27, %v3878_v21  ;;  %v4258_v36 = vrot.slane %v4256_v55, 4  ;;  %v3879_v63 = vadd.f32 %v3806_v61, %v3588_v62  ;;  %v4384_v9 = vpack.c.b16 %v4364_v22, %v4363_v46  ;;  %v3945_v61 = vld [vmem:[#allocation2 + $0xb4] sm:$0xf]  ;;  %v7375_v22 = vld [vmem:[#allocation2 + $0xb8] sm:$0xf] }
 0x288   : > { %v3436_v31 = vpack.c.b16 %v3417_v54, %v3416_v11  ;;  %v7609_v55 = vld [vmem:[#allocation16_spill] sm:$0xff]  ;;  %v4264_v29 = vrot.slane %v4262_v18, 5  ;;  %v5768_v54 = vld [vmem:[#allocation2 + $0xac] sm:$0xf]  ;;  %v4714_v18 = vrot.slane %v7335_v48, 5 }
 0x289   : > { %v4259_v14 = vor.u32 %v4258_v36, %v7353_v38  ;;  %v3589_v25 = vadd.f32 %v7317_v60, %v7609_v55  ;;  %v3370_v46 = vrot.slane %v5768_v54, 5  ;;  %v4267_v60 = vshrl.u32 %v3945_v61, 16 }
 0x28b   : > { %5506 = vmatmul.msk.bf16.gmra.mxu2 %vm1515_vm12, %v5620_v57  ;;  %v4249_v57 = vor.u32 %v4248_v56, %v4245_v1  ;;  %v4270_v56 = vshll.u32 %v3945_v61, 16  ;;  %v4269_v55 = vrot.slane %v4267_v60, 4  ;;  %v4717_v60 = vrot.slane %v7357_v3, 5 }
 0x28c   : > { %v4864_v21 = vpop.f32.mrf.mxu0  ;;  %v7355_v43 = vpop.f32.mrf.mxu1 }
 0x28d   : > { %v4938_v27 = vadd.f32 %v4864_v21, %v4536_v8  ;;  %v4250_v7 = vrot.slane %v4249_v57, 4  ;;  %v4260_v8 = vrot.slane %v4259_v14, 4  ;;  %v4280_v14 = vshrl.u32 %v7375_v22, 16 }
 0x28e   : > { %v4464_v15 = vpop.f32.mrf.mxu3  ;;  %v3809_v40 = vpop.f32.mrf.mxu2 }
 0x28f   : > { %5561 = vmatmul.msk.bf16.gmra.mxu0 %vm1515_vm12, %v4785_v13  ;;  %4971 = vst.msk [vmem:[%s7275_s30 + $0x20] sm:$0xff] %vm4966_vm0, %v4938_v27  ;;  %5423 = vmatmul.msk.bf16.gmra.mxu1 %vm1515_vm12, %v3436_v31  ;;  %v4537_v28 = vadd.f32 %v4464_v15, %v3879_v63  ;;  %v4711_v13 = vsel %vm6504_vm15, %v4709_v53, %v4710_v2  ;;  %v3226_v31 = vld [vmem:[#allocation2 + $0xa8] sm:$0xe]  ;;  %v3372_v15 = vrot.slane %v3370_v46, 4 }
 0x290   : > { %v3880_v49 = vadd.f32 %v3809_v40, %v3589_v25  ;;  %v4766_v36 = vunpack.c.l.b16 %v4711_v13  ;;  %v5404_v63 = vrot.slane %v3226_v31, 9  ;;  %v5621_v2 = vld [vmem:[#allocation2 + $0xa8] sm:$0xff]  ;;  %v4255_v53 = vsel %vm6152_vm11, %v4250_v7, %v7353_v38 }
 0x291   : > { %v4265_v57 = vsel %vm6152_vm11, %v4260_v8, %v4264_v29  ;;  %v4276_v40 = vshll.u32 %v7375_v22, 16  ;;  %v4272_v7 = vrot.slane %v4270_v56, 5  ;;  %v7610_v8 = vld [vmem:[#allocation17_spill] sm:$0xff]  ;;  %v4365_v54 = vunpack.c.l.b16 %v4255_v53 }
 0x292   : > { %v3590_v29 = vadd.f32 %v7333_v39, %v7610_v8  ;;  %v4366_v48 = vunpack.c.l.b16 %v4265_v57  ;;  %v4282_v31 = vrot.slane %v4280_v14, 4  ;;  %v7413_v8 = vld [vmem:[#allocation2 + $0xc4] sm:$0xf] }
 0x293   : > { %5526 = vmatmul.msk.bf16.gmra.mxu3 %vm1515_vm12, %v4384_v9  ;;  %v5769_v9 = vld [vmem:[#allocation2 + $0xb0] sm:$0x1]  ;;  %v4273_v39 = vor.u32 %v4272_v7, %v4269_v55 }
 0x294   : > { %v4866_v62 = vpop.f32.mrf.mxu0  ;;  %v7373_v11 = vpop.f32.mrf.mxu1  ;;  %v3373_v24 = vrot.slane %v5769_v9, 5 }
 0x295   : > { %v4939_v1 = vadd.f32 %v4866_v62, %v4537_v28  ;;  %v3371_v28 = vsel %vm6504_vm15, %v5404_v63, %v3370_v46  ;;  %v4786_v62 = vpack.c.b16 %v4766_v36, %v4765_v37  ;;  %v4278_v46 = vrot.slane %v4276_v40, 5 }
 0x296   : > { %v4467_v21 = vpop.f32.mrf.mxu3  ;;  %v3811_v27 = vpop.f32.mrf.mxu2  ;;  %v3374_v61 = vsel %vm6504_vm15, %v3372_v15, %v3373_v24  ;;  %v3418_v13 = vunpack.c.l.b16 %v3371_v28  ;;  %v5543_v15 = vrot.slane %v4576_v52, 9  ;;  %v4716_v36 = vrot.slane %v4714_v18, 4 }
 0x297   : > { %4972 = vst.msk [vmem:[%s7275_s30 + $0x28] sm:$0xff] %vm4966_vm0, %v4939_v1  ;;  %v4538_v25 = vadd.f32 %v4467_v21, %v3880_v49  ;;  %v3419_v38 = vunpack.c.l.b16 %v3374_v61  ;;  %v7397_v21 = vld [vmem:[#allocation2 + $0xbc] sm:$0x1]  ;;  %v3881_v56 = vadd.f32 %v3811_v27, %v3590_v29  ;;  %v4283_v53 = vor.u32 %v4282_v31, %v4278_v46 }
 0x298   : > { %v4286_v3 = vshll.u32 %v7397_v21, 16  ;;  %v4715_v40 = vsel %vm6504_vm15, %v5543_v15, %v4714_v18  ;;  %v4718_v27 = vsel %vm6504_vm15, %v4716_v36, %v4717_v60  ;;  %v4274_v14 = vrot.slane %v4273_v39, 4  ;;  %v5771_v15 = vld [vmem:[#allocation2 + $0xbc] sm:$0x1] }
 0x299   : > { %v3437_v1 = vpack.c.b16 %v3419_v38, %v3418_v13  ;;  %v3591_v28 = vadd.f32 %v7355_v43, %v6828_v26  ;;  %v4284_v61 = vrot.slane %v4283_v53, 4  ;;  %v4767_v13 = vunpack.c.l.b16 %v4715_v40  ;;  %v3227_v43 = vld [vmem:[#allocation2 + $0xb4] sm:$0xe] }
 0x29a   : > { %v4288_v55 = vrot.slane %v4286_v3, 5  ;;  %v4768_v38 = vunpack.c.l.b16 %v4718_v27  ;;  %v4279_v26 = vsel %vm6152_vm11, %v4274_v14, %v4278_v46  ;;  %v5405_v31 = vrot.slane %v3227_v43, 9 }
 0x29b   : > { %5507 = vmatmul.msk.bf16.gmra.mxu2 %vm1515_vm12, %v5621_v2  ;;  %v4385_v2 = vpack.c.b16 %v4366_v48, %v4365_v54  ;;  %v3380_v60 = vrot.slane %v5771_v15, 5  ;;  %v4367_v14 = vunpack.c.l.b16 %v4279_v26 }
 0x29c   : > { %v4869_v63 = vpop.f32.mrf.mxu0  ;;  %v7395_v49 = vpop.f32.mrf.mxu1  ;;  %v4289_v36 = vsel %vm6152_vm11, %v4284_v61, %v4288_v55  ;;  %v4787_v46 = vpack.c.b16 %v4768_v38, %v4767_v13  ;;  %v4721_v61 = vrot.slane %v7375_v22, 5  ;;  %v4724_v22 = vrot.slane %v7397_v21, 5 }
 0x29d   : > { %v4940_v37 = vadd.f32 %v4869_v63, %v4538_v25  ;;  %v3948_v25 = vld [vmem:[#allocation2 + $0xc0] sm:$0xf] }
 0x29e   : > { %v4469_v9 = vpop.f32.mrf.mxu3  ;;  %v3814_v24 = vpop.f32.mrf.mxu2  ;;  %v4294_v39 = vshll.u32 %v3948_v25, 16 }
 0x29f   : > { %5562 = vmatmul.msk.bf16.gmra.mxu0 %vm1515_vm12, %v4786_v62  ;;  %4973 = vst.msk [vmem:[%s7275_s30 + $0x30] sm:$0xff] %vm4966_vm0, %v4940_v37  ;;  %5424 = vmatmul.msk.bf16.gmra.mxu1 %vm1515_vm12, %v3437_v1  ;;  %v4539_v57 = vadd.f32 %v4469_v9, %v3881_v56  ;;  %v5770_v62 = vld [vmem:[#allocation2 + $0xb8] sm:$0xf]  ;;  %v3882_v54 = vadd.f32 %v3814_v24, %v3591_v28  ;;  %v4291_v37 = vshrl.u32 %v3948_v25, 16  ;;  %v4300_v9 = vshll.u32 %v7413_v8, 16 }
 0x2a0   : > { %v3377_v18 = vrot.slane %v5770_v62, 5  ;;  %v5622_v56 = vld [vmem:[#allocation2 + $0xb4] sm:$0xff]  ;;  %v4304_v24 = vshrl.u32 %v7413_v8, 16  ;;  %v4368_v28 = vunpack.c.l.b16 %v4289_v36  ;;  %v4296_v13 = vrot.slane %v4294_v39, 5 }
 0x2a1   : > { %v4293_v55 = vrot.slane %v4291_v37, 4  ;;  %v4577_v25 = vld [vmem:[#allocation2 + $0xb4] sm:$0xe]  ;;  %v4302_v38 = vrot.slane %v4300_v9, 5 }
 0x2a2   : > { %v3379_v63 = vrot.slane %v3377_v18, 4  ;;  %v4306_v62 = vrot.slane %v4304_v24, 4  ;;  %v4386_v43 = vpack.c.b16 %v4368_v28, %v4367_v14  ;;  %v7450_v14 = vld [vmem:[#allocation2 + $0xd0] sm:$0xf] }
 0x2a3   : > { %5527 = vmatmul.msk.bf16.gmra.mxu3 %vm1515_vm12, %v4385_v2  ;;  %v3378_v2 = vsel %vm6504_vm15, %v5405_v31, %v3377_v18  ;;  %v4297_v15 = vor.u32 %v4296_v13, %v4293_v55  ;;  %v5773_v13 = vld [vmem:[#allocation2 + $0xc8] sm:$0x1] }
 0x2a4   : > { %v4871_v52 = vpop.f32.mrf.mxu0  ;;  %v7411_v7 = vpop.f32.mrf.mxu1  ;;  %v3381_v53 = vsel %vm6504_vm15, %v3379_v63, %v3380_v60  ;;  %v3420_v40 = vunpack.c.l.b16 %v3378_v2  ;;  %v4723_v63 = vrot.slane %v4721_v61, 4  ;;  %v4307_v60 = vor.u32 %v4306_v62, %v4302_v38 }
 0x2a5   : > { %v4941_v29 = vadd.f32 %v4871_v52, %v4539_v57  ;;  %v3592_v57 = vadd.f32 %v7373_v11, %v6853_v41  ;;  %v3421_v27 = vunpack.c.l.b16 %v3381_v53  ;;  %v4298_v39 = vrot.slane %v4297_v15, 4  ;;  %v5772_v53 = vld [vmem:[#allocation2 + $0xc4] sm:$0xf] }
 0x2a6   : > { %v4472_v48 = vpop.f32.mrf.mxu3  ;;  %v3816_v1 = vpop.f32.mrf.mxu2  ;;  %v4725_v21 = vsel %vm6504_vm15, %v4723_v63, %v4724_v22  ;;  %v4308_v9 = vrot.slane %v4307_v60, 4  ;;  %v3387_v62 = vrot.slane %v5773_v13, 5  ;;  %v4328_v63 = vshrl.u32 %v7450_v14, 16 }
 0x2a7   : > { %4974 = vst.msk [vmem:[%s7275_s30 + $0x38] sm:$0xff] %vm4966_vm0, %v4941_v29  ;;  %v4540_v3 = vadd.f32 %v4472_v48, %v3882_v54  ;;  %v3438_v52 = vpack.c.b16 %v3421_v27, %v3420_v40  ;;  %v7433_v54 = vld [vmem:[#allocation2 + $0xc8] sm:$0x1]  ;;  %v3883_v11 = vadd.f32 %v3816_v1, %v3592_v57  ;;  %v5544_v48 = vrot.slane %v4577_v25, 9  ;;  %v3951_v57 = vld [vmem:[#allocation2 + $0xcc] sm:$0xf] }
 0x2a8   : > { %v4310_v37 = vshll.u32 %v7433_v54, 16  ;;  %v3593_v1 = vadd.f32 %v7395_v49, %v6861_v6  ;;  %v3228_v27 = vld [vmem:[#allocation2 + $0xc0] sm:$0xe]  ;;  %v4770_v28 = vunpack.c.l.b16 %v4725_v21  ;;  %v4728_v21 = vrot.slane %v7413_v8, 5 }
 0x2a9   : > { %v4722_v36 = vsel %vm6504_vm15, %v5544_v48, %v4721_v61  ;;  %v5406_v25 = vrot.slane %v3228_v27, 9  ;;  %v3953_v27 = vld [vmem:[#allocation2 + $0xd4] sm:$0x1]  ;;  %v4731_v8 = vrot.slane %v7433_v54, 5 }
 0x2aa   : > { %v4312_v24 = vrot.slane %v4310_v37, 5  ;;  %v4769_v6 = vunpack.c.l.b16 %v4722_v36 }
 0x2ab   : > { %5508 = vmatmul.msk.bf16.gmra.mxu2 %vm1515_vm12, %v5622_v56 }
 0x2ac   : > { %v4874_v18 = vpop.f32.mrf.mxu0  ;;  %v7431_v29 = vpop.f32.mrf.mxu1 }
 0x2ad   : > { %v4942_v41 = vadd.f32 %v4874_v18, %v4540_v3  ;;  %v3384_v3 = vrot.slane %v5772_v53, 5  ;;  %v5623_v18 = vld [vmem:[#allocation2 + $0xc0] sm:$0xff] }
 0x2ae   : > { %v4474_v26 = vpop.f32.mrf.mxu3  ;;  %v3819_v31 = vpop.f32.mrf.mxu2 }
 0x2af   : > { %5563 = vmatmul.msk.bf16.gmra.mxu0 %vm1515_vm12, %v4787_v46  ;;  %4975 = vst.msk [vmem:[%s7275_s30 + $0x40] sm:$0xff] %vm4966_vm0, %v4942_v41  ;;  %5425 = vmatmul.msk.bf16.gmra.mxu1 %vm1515_vm12, %v3438_v52  ;;  %v4541_v56 = vadd.f32 %v4474_v26, %v3883_v11  ;;  %v3884_v49 = vadd.f32 %v3819_v31, %v3593_v1  ;;  %v3386_v52 = vrot.slane %v3384_v3, 4  ;;  %v4315_v26 = vshrl.u32 %v3951_v57, 16 }
 0x2b0   : > { %v4303_v41 = vsel %vm6152_vm11, %v4298_v39, %v4302_v38  ;;  %v4313_v11 = vsel %vm6152_vm11, %v4308_v9, %v4312_v24  ;;  %v3385_v48 = vsel %vm6504_vm15, %v5406_v25, %v3384_v3  ;;  %v4324_v31 = vshll.u32 %v7450_v14, 16  ;;  %v4578_v24 = vld [vmem:[#allocation2 + $0xc0] sm:$0xe] }
 0x2b1   : > { %v3388_v22 = vsel %vm6504_vm15, %v3386_v52, %v3387_v62  ;;  %v3422_v60 = vunpack.c.l.b16 %v3385_v48  ;;  %v3594_v38 = vadd.f32 %v7411_v7, %v6885_v5  ;;  %v4369_v1 = vunpack.c.l.b16 %v4303_v41 }
 0x2b2   : > { %v3423_v37 = vunpack.c.l.b16 %v3388_v22  ;;  %v4370_v36 = vunpack.c.l.b16 %v4313_v11  ;;  %v4317_v53 = vrot.slane %v4315_v26, 4  ;;  %v4730_v25 = vrot.slane %v4728_v21, 4 }
 0x2b3   : > { %5528 = vmatmul.msk.bf16.gmra.mxu3 %vm1515_vm12, %v4386_v43  ;;  %v4318_v43 = vshll.u32 %v3951_v57, 16  ;;  %v4326_v57 = vrot.slane %v4324_v31, 5  ;;  %v4334_v62 = vshll.u32 %v3953_v27, 16 }
 0x2b4   : > { %v4876_v46 = vpop.f32.mrf.mxu0  ;;  %v7448_v2 = vpop.f32.mrf.mxu1  ;;  %v3439_v39 = vpack.c.b16 %v3423_v37, %v3422_v60  ;;  %v4387_v7 = vpack.c.b16 %v4370_v36, %v4369_v1  ;;  %v4732_v54 = vsel %vm6504_vm15, %v4730_v25, %v4731_v8  ;;  %v5624_v37 = vld [vmem:[#allocation2 + $0xcc] sm:$0xff] }
 0x2b5   : > { %v4943_v40 = vadd.f32 %v4876_v46, %v4541_v56  ;;  %v4788_v56 = vpack.c.b16 %v4770_v28, %v4769_v6  ;;  %v4320_v3 = vrot.slane %v4318_v43, 5  ;;  %v4336_v48 = vrot.slane %v4334_v62, 5 }
 0x2b6   : > { %v4477_v61 = vpop.f32.mrf.mxu3  ;;  %v3821_v55 = vpop.f32.mrf.mxu2 }
 0x2b7   : > { %4976 = vst.msk [vmem:[%s7275_s30 + $0x48] sm:$0xff] %vm4966_vm0, %v4943_v40  ;;  %v4542_v15 = vadd.f32 %v4477_v61, %v3884_v49  ;;  %v4330_v40 = vrot.slane %v4328_v63, 4  ;;  %v3885_v6 = vadd.f32 %v3821_v55, %v3594_v38  ;;  %v5545_v61 = vrot.slane %v4578_v24, 9 }
 0x2b8   : > { %v4321_v52 = vor.u32 %v4320_v3, %v4317_v53  ;;  %v3595_v55 = vadd.f32 %v7431_v29, %v6898_v44  ;;  %v4772_v29 = vunpack.c.l.b16 %v4732_v54  ;;  %v4735_v53 = vrot.slane %v7450_v14, 5 }
 0x2b9   : > { %v4331_v13 = vor.u32 %v4330_v40, %v4326_v57  ;;  %v4729_v41 = vsel %vm6504_vm15, %v5545_v61, %v4728_v21  ;;  %v3596_v21 = vadd.f32 %v7448_v2, %v6918_v50 }
 0x2ba   : > { %v4322_v26 = vrot.slane %v4321_v52, 4  ;;  %v4771_v44 = vunpack.c.l.b16 %v4729_v41  ;;  %v4737_v2 = vrot.slane %v4735_v53, 4 }
 0x2bb   : > { %5509 = vmatmul.msk.bf16.gmra.mxu2 %vm1515_vm12, %v5623_v18  ;;  %v4332_v43 = vrot.slane %v4331_v13, 4 }
 0x2bc   : > { %v4879_v9 = vpop.f32.mrf.mxu0  ;;  %v3538_v46 = vpop.f32.mrf.mxu1  ;;  %v4789_v36 = vpack.c.b16 %v4772_v29, %v4771_v44 }
 0x2bd   : > { %v4944_v49 = vadd.f32 %v4879_v9, %v4542_v15  ;;  %v4337_v38 = vsel %vm6152_vm11, %v4332_v43, %v4336_v48  ;;  %v3597_v61 = vadd.f32 %v3538_v46, %v6935_v42 }
 0x2be   : > { %v4479_v28 = vpop.f32.mrf.mxu3  ;;  %v3824_v5 = vpop.f32.mrf.mxu2  ;;  %v4372_v9 = vunpack.c.l.b16 %v4337_v38 }
 0x2bf   : > { %5564 = vmatmul.msk.bf16.gmra.mxu0 %vm1515_vm12, %v4788_v56  ;;  %4977 = vst.msk [vmem:[%s7275_s30 + $0x50] sm:$0xff] %vm4966_vm0, %v4944_v49  ;;  %5426 = vmatmul.msk.bf16.gmra.mxu1 %vm1515_vm12, %v3439_v39  ;;  %v4543_v18 = vadd.f32 %v4479_v28, %v3885_v6  ;;  %v3886_v63 = vadd.f32 %v3824_v5, %v3595_v55  ;;  %v4738_v5 = vrot.slane %v3953_v27, 5 }
 0x2c0   : > { %v4327_v56 = vsel %vm6152_vm11, %v4322_v26, %v4326_v57  ;;  %v4579_v57 = vld [vmem:[#allocation2 + $0xcc] sm:$0xe] }
 0x2c1   : > { %v4371_v39 = vunpack.c.l.b16 %v4327_v56  ;;  %v5546_v50 = vrot.slane %v4579_v57, 9  ;;  %v4739_v25 = vsel %vm6504_vm15, %v4737_v2, %v4738_v5 }
 0x2c2   : > { %v4774_v41 = vunpack.c.l.b16 %v4739_v25 }
 0x2c3   : > { %5529 = vmatmul.msk.bf16.gmra.mxu3 %vm1515_vm12, %v4387_v7  ;;  %v4388_v28 = vpack.c.b16 %v4372_v9, %v4371_v39  ;;  %v4736_v8 = vsel %vm6504_vm15, %v5546_v50, %v4735_v53 }
 0x2c4   : > { %v4881_v11 = vpop.f32.mrf.mxu0  ;;  %v3540_v22 = vpop.f32.mrf.mxu1  ;;  %v4773_v27 = vunpack.c.l.b16 %v4736_v8 }
 0x2c5   : > { %v4945_v31 = vadd.f32 %v4881_v11, %v4543_v18  ;;  %v3598_v11 = vadd.f32 %v3540_v22, %v6955_v20 }
 0x2c6   : > { %v4482_v15 = vpop.f32.mrf.mxu3  ;;  %v3826_v60 = vpop.f32.mrf.mxu2  ;;  %v4790_v46 = vpack.c.b16 %v4774_v41, %v4773_v27 }
 0x2c7   : > { %4978 = vst.msk [vmem:[%s7275_s30 + $0x58] sm:$0xff] %vm4966_vm0, %v4945_v31  ;;  %v4544_v1 = vadd.f32 %v4482_v15, %v3886_v63  ;;  %v3887_v49 = vadd.f32 %v3826_v60, %v3596_v21 }
 0x2cb   : > { %5510 = vmatmul.msk.bf16.gmra.mxu2 %vm1515_vm12, %v5624_v37 }
 0x2cc   : > { %v4884_v24 = vpop.f32.mrf.mxu0  ;;  %v3543_v3 = vpop.f32.mrf.mxu1 }
 0x2cd   : > { %v4946_v40 = vadd.f32 %v4884_v24, %v4544_v1  ;;  %v3599_v15 = vadd.f32 %v3543_v3, %v6974_v47 }
 0x2ce   : > { %v4484_v6 = vpop.f32.mrf.mxu3  ;;  %v3829_v58 = vpop.f32.mrf.mxu2 }
 0x2cf   : > { %5565 = vmatmul.msk.bf16.gmra.mxu0 %vm1515_vm12, %v4789_v36  ;;  %4979 = vst.msk [vmem:[%s7275_s30 + $0x60] sm:$0xff] %vm4966_vm0, %v4946_v40  ;;  %v4545_v7 = vadd.f32 %v4484_v6, %v3887_v49  ;;  %v3888_v62 = vadd.f32 %v3829_v58, %v3597_v61 }
 0x2d3   : > { %5530 = vmatmul.msk.bf16.gmra.mxu3 %vm1515_vm12, %v4388_v28 }
 0x2d4   : > { %v4886_v14 = vpop.f32.mrf.mxu0  ;;  %v3545_v52 = vpop.f32.mrf.mxu1 }
 0x2d5   : > { %v4947_v13 = vadd.f32 %v4886_v14, %v4545_v7  ;;  %v3600_v38 = vadd.f32 %v3545_v52, %v6993_v33 }
 0x2d6   : > { %v4487_v18 = vpop.f32.mrf.mxu3  ;;  %v3831_v55 = vpop.f32.mrf.mxu2 }
 0x2d7   : > { %4980 = vst.msk [vmem:[%s7275_s30 + $0x68] sm:$0xff] %vm4966_vm0, %v4947_v13  ;;  %v4546_v42 = vadd.f32 %v4487_v18, %v3888_v62  ;;  %v3889_v59 = vadd.f32 %v3831_v55, %v3598_v11 }
 0x2dc   : > { %v4889_v54 = vpop.f32.mrf.mxu0  ;;  %v3548_v26 = vpop.f32.mrf.mxu1 }
 0x2dd   : > { %v4948_v43 = vadd.f32 %v4889_v54, %v4546_v42  ;;  %v3601_v53 = vadd.f32 %v3548_v26, %v7010_v17 }
 0x2de   : > { %v4489_v48 = vpop.f32.mrf.mxu3  ;;  %v3834_v31 = vpop.f32.mrf.mxu2 }
 0x2df   : > { %5566 = vmatmul.msk.bf16.gmra.mxu0 %vm1515_vm12, %v4790_v46  ;;  %4981 = vst.msk [vmem:[%s7275_s30 + $0x70] sm:$0xff] %vm4966_vm0, %v4948_v43  ;;  %v4547_v63 = vadd.f32 %v4489_v48, %v3889_v59  ;;  %v3890_v37 = vadd.f32 %v3834_v31, %v3599_v15 }
 0x2e4   : > { %v4891_v60 = vpop.f32.mrf.mxu0  ;;  %v3550_v44 = vpop.f32.mrf.mxu1 }
 0x2e5   : > { %v4949_v29 = vadd.f32 %v4891_v60, %v4547_v63  ;;  %v3602_v28 = vadd.f32 %v3550_v44, %v7030_v30 }
 0x2e6   : > { %v4492_v20 = vpop.f32.mrf.mxu3  ;;  %v3836_v22 = vpop.f32.mrf.mxu2 }
 0x2e7   : > { %4982 = vst.msk [vmem:[%s7275_s30 + $0x78] sm:$0xff] %vm4966_vm0, %v4949_v29  ;;  %v4548_v56 = vadd.f32 %v4492_v20, %v3890_v37  ;;  %v3891_v39 = vadd.f32 %v3836_v22, %v3600_v38 }
 0x2ec   : > { %v4894_v1 = vpop.f32.mrf.mxu0  ;;  %v3553_v36 = vpop.f32.mrf.mxu1 }
 0x2ed   : > { %v4950_v21 = vadd.f32 %v4894_v1, %v4548_v56  ;;  %v3603_v8 = vadd.f32 %v3553_v36, %v7049_v32 }
 0x2ee   : > { %v4494_v9 = vpop.f32.mrf.mxu3  ;;  %v3839_v24 = vpop.f32.mrf.mxu2 }
 0x2ef   : > { %4983 = vst.msk [vmem:[%s7275_s30 + $0x80] sm:$0xff] %vm4966_vm0, %v4950_v21  ;;  %v4549_v47 = vadd.f32 %v4494_v9, %v3891_v39  ;;  %v3892_v57 = vadd.f32 %v3839_v24, %v3601_v53 }
 0x2f4   : > { %v4896_v3 = vpop.f32.mrf.mxu0  ;;  %v3555_v40 = vpop.f32.mrf.mxu1 }
 0x2f5   : > { %v4951_v49 = vadd.f32 %v4896_v3, %v4549_v47  ;;  %v3604_v27 = vadd.f32 %v3555_v40, %v7068_v12 }
 0x2f6   : > { %v4497_v6 = vpop.f32.mrf.mxu3  ;;  %v3841_v58 = vpop.f32.mrf.mxu2 }
 0x2f7   : > { %4984 = vst.msk [vmem:[%s7275_s30 + $0x88] sm:$0xff] %vm4966_vm0, %v4951_v49  ;;  %v4550_v33 = vadd.f32 %v4497_v6, %v3892_v57  ;;  %v3893_v5 = vadd.f32 %v3841_v58, %v3602_v28 }
 0x2fc   : > { %v4899_v50 = vpop.f32.mrf.mxu0  ;;  %v3558_v7 = vpop.f32.mrf.mxu1 }
 0x2fd   : > { %v4952_v2 = vadd.f32 %v4899_v50, %v4550_v33  ;;  %v3605_v43 = vadd.f32 %v3558_v7, %v7085_v51 }
 0x2fe   : > { %v4499_v61 = vpop.f32.mrf.mxu3  ;;  %v3844_v14 = vpop.f32.mrf.mxu2 }
 0x2ff   : > { %4985 = vst.msk [vmem:[%s7275_s30 + $0x90] sm:$0xff] %vm4966_vm0, %v4952_v2  ;;  %v4551_v17 = vadd.f32 %v4499_v61, %v3893_v5  ;;  %v3894_v13 = vadd.f32 %v3844_v14, %v3603_v8 }
 0x304   : > { %v4901_v25 = vpop.f32.mrf.mxu0  ;;  %v3560_v30 = vpop.f32.mrf.mxu1 }
 0x305   : > { %v4953_v52 = vadd.f32 %v4901_v25, %v4551_v17  ;;  %v3606_v60 = vadd.f32 %v3560_v30, %v7105_v34 }
 0x306   : > { %v4502_v62 = vpop.f32.mrf.mxu3  ;;  %v3846_v18 = vpop.f32.mrf.mxu2 }
 0x307   : > { %4986 = vst.msk [vmem:[%s7275_s30 + $0x98] sm:$0xff] %vm4966_vm0, %v4953_v52  ;;  %v4552_v55 = vadd.f32 %v4502_v62, %v3894_v13  ;;  %v3895_v46 = vadd.f32 %v3846_v18, %v3604_v27 }
 0x30c   : > { %v4904_v41 = vpop.f32.mrf.mxu0  ;;  %v3563_v26 = vpop.f32.mrf.mxu1 }
 0x30d   : > { %v4954_v42 = vadd.f32 %v4904_v41, %v4552_v55  ;;  %v3607_v38 = vadd.f32 %v3563_v26, %v7124_v0 }
 0x30e   : > { %v4504_v11 = vpop.f32.mrf.mxu3  ;;  %v3849_v54 = vpop.f32.mrf.mxu2 }
 0x30f   : > { %4987 = vst.msk [vmem:[%s7275_s30 + $0xa0] sm:$0xff] %vm4966_vm0, %v4954_v42  ;;  %v4553_v32 = vadd.f32 %v4504_v11, %v3895_v46  ;;  %v3896_v31 = vadd.f32 %v3849_v54, %v3605_v43 }
 0x314   : > { %v4906_v59 = vpop.f32.mrf.mxu0  ;;  %v3565_v44 = vpop.f32.mrf.mxu1 }
 0x315   : > { %v4955_v48 = vadd.f32 %v4906_v59, %v4553_v32  ;;  %v3608_v47 = vadd.f32 %v3565_v44, %v7143_v4 }
 0x316   : > { %v4507_v63 = vpop.f32.mrf.mxu3  ;;  %v3851_v15 = vpop.f32.mrf.mxu2 }
 0x317   : > { %4988 = vst.msk [vmem:[%s7275_s30 + $0xa8] sm:$0xff] %vm4966_vm0, %v4955_v48  ;;  %v4554_v12 = vadd.f32 %v4507_v63, %v3896_v31  ;;  %v3897_v20 = vadd.f32 %v3851_v15, %v3606_v60 }
 0x31c   : > { %v4909_v29 = vpop.f32.mrf.mxu0  ;;  %v3568_v39 = vpop.f32.mrf.mxu1 }
 0x31d   : > { %v4956_v37 = vadd.f32 %v4909_v29, %v4554_v12  ;;  %v3609_v58 = vadd.f32 %v3568_v39, %v7158_v16 }
 0x31e   : > { %v4509_v22 = vpop.f32.mrf.mxu3  ;;  %v3854_v56 = vpop.f32.mrf.mxu2 }
 0x31f   : > { %4989 = vst.msk [vmem:[%s7275_s30 + $0xb0] sm:$0xff] %vm4966_vm0, %v4956_v37  ;;  %v4555_v51 = vadd.f32 %v4509_v22, %v3897_v20  ;;  %v3898_v21 = vadd.f32 %v3854_v56, %v3607_v38 }
 0x324   : > { %v4911_v1 = vpop.f32.mrf.mxu0  ;;  %v3570_v0 = vpop.f32.mrf.mxu1 }
 0x325   : > { %v4957_v36 = vadd.f32 %v4911_v1, %v4555_v51  ;;  %v3610_v61 = vadd.f32 %v3570_v0, %v7175_v10 }
 0x326   : > { %v4512_v9 = vpop.f32.mrf.mxu3  ;;  %v3856_v24 = vpop.f32.mrf.mxu2 }
 0x327   : > { %4990 = vst.msk [vmem:[%s7275_s30 + $0xb8] sm:$0xff] %vm4966_vm0, %v4957_v36  ;;  %v4556_v34 = vadd.f32 %v4512_v9, %v3898_v21  ;;  %v3899_v40 = vadd.f32 %v3856_v24, %v3608_v47 }
 0x32c   : > { %v4914_v53 = vpop.f32.mrf.mxu0  ;;  %v3573_v7 = vpop.f32.mrf.mxu1 }
 0x32d   : > { %v4958_v3 = vadd.f32 %v4914_v53, %v4556_v34  ;;  %v3611_v13 = vadd.f32 %v3573_v7, %v7196_v35 }
 0x32e   : > { %v4514_v49 = vpop.f32.mrf.mxu3  ;;  %v3859_v57 = vpop.f32.mrf.mxu2 }
 0x32f   : > { %4991 = vst.msk [vmem:[%s7275_s30 + $0xc0] sm:$0xff] %vm4966_vm0, %v4958_v3  ;;  %v4557_v6 = vadd.f32 %v4514_v49, %v3899_v40  ;;  %v3900_v50 = vadd.f32 %v3859_v57, %v3609_v58 }
 0x334   : > { %v4916_v33 = vpop.f32.mrf.mxu0  ;;  %v3575_v18 = vpop.f32.mrf.mxu1 }
 0x335   : > { %v4959_v28 = vadd.f32 %v4916_v33, %v4557_v6  ;;  %v3612_v42 = vadd.f32 %v3575_v18, %v7212_v19 }
 0x336   : > { %v4517_v2 = vpop.f32.mrf.mxu3  ;;  %v3861_v5 = vpop.f32.mrf.mxu2 }
 0x337   : > { %4992 = vst.msk [vmem:[%s7275_s30 + $0xc8] sm:$0xff] %vm4966_vm0, %v4959_v28  ;;  %v4558_v4 = vadd.f32 %v4517_v2, %v3900_v50  ;;  %v3901_v8 = vadd.f32 %v3861_v5, %v3610_v61 }
 0x33c   : > { %v4919_v14 = vpop.f32.mrf.mxu0  ;;  %v3578_v26 = vpop.f32.mrf.mxu1 }
 0x33d   : > { %v4960_v17 = vadd.f32 %v4919_v14, %v4558_v4  ;;  %v3613_v59 = vadd.f32 %v3578_v26, %v7231_v45 }
 0x33e   : > { %v4519_v25 = vpop.f32.mrf.mxu3  ;;  %v3864_v52 = vpop.f32.mrf.mxu2 }
 0x33f   : > { %4993 = vst.msk [vmem:[%s7275_s30 + $0xd0] sm:$0xff] %vm4966_vm0, %v4960_v17  ;;  %v4559_v16 = vadd.f32 %v4519_v25, %v3901_v8  ;;  %v3902_v55 = vadd.f32 %v3864_v52, %v3611_v13 }
 0x344   : > { %v4921_v62 = vpop.f32.mrf.mxu0  ;;  %v3580_v19 = vpop.f32.mrf.mxu1 }
 0x345   : > { %v4961_v30 = vadd.f32 %v4921_v62, %v4559_v16  ;;  %v3614_v44 = vadd.f32 %v3580_v19, %v7255_v23 }
 0x346   : > { %v4522_v27 = vpop.f32.mrf.mxu3  ;;  %v3866_v41 = vpop.f32.mrf.mxu2 }
 0x347   : > { %4994 = vst.msk [vmem:[%s7275_s30 + $0xd8] sm:$0xff] %vm4966_vm0, %v4961_v30  ;;  %v4560_v10 = vadd.f32 %v4522_v27, %v3902_v55  ;;  %v3903_v54 = vadd.f32 %v3866_v41, %v3612_v42 }
 0x34c   : > { %v4924_v46 = vpop.f32.mrf.mxu0 }
 0x34d   : > { %v4962_v11 = vadd.f32 %v4924_v46, %v4560_v10 }
 0x34e   : > { %v4524_v32 = vpop.f32.mrf.mxu3  ;;  %v3869_v35 = vpop.f32.mrf.mxu2 }
 0x34f   : > { %4995 = vst.msk [vmem:[%s7275_s30 + $0xe0] sm:$0xff] %vm4966_vm0, %v4962_v11  ;;  %v4561_v43 = vadd.f32 %v4524_v32, %v3903_v54  ;;  %v3904_v63 = vadd.f32 %v3869_v35, %v3613_v59 }
 0x354   : > { %v4926_v48 = vpop.f32.mrf.mxu0 }
 0x355   : > { %v4963_v31 = vadd.f32 %v4926_v48, %v4561_v43 }
 0x356   : > { %v4527_v15 = vpop.f32.mrf.mxu3  ;;  %v3871_v60 = vpop.f32.mrf.mxu2 }
 0x357   : > { %4996 = vst.msk [vmem:[%s7275_s30 + $0xe8] sm:$0xff] %vm4966_vm0, %v4963_v31  ;;  %v4562_v12 = vadd.f32 %v4527_v15, %v3904_v63  ;;  %v3905_v20 = vadd.f32 %v3871_v60, %v3614_v44 }
 0x35c   : > { %v4929_v29 = vpop.f32.mrf.mxu0 }
 0x35d   : > { %v4964_v37 = vadd.f32 %v4929_v29, %v4562_v12 }
 0x35e   : > { %v4529_v22 = vpop.f32.mrf.mxu3 }
 0x35f   : > { %4997 = vst.msk [vmem:[%s7275_s30 + $0xf0] sm:$0xff] %vm4966_vm0, %v4964_v37  ;;  %v4563_v56 = vadd.f32 %v4529_v22, %v3905_v20 }
 0x364   : > { %v4931_v45 = vpop.f32.mrf.mxu0 }
 0x365   : > { %v4965_v51 = vadd.f32 %v4931_v45, %v4563_v56 }
 0x367   : > { %4998 = vst.msk [vmem:[%s7275_s30 + $0xf8] sm:$0xff] %vm4966_vm0, %v4965_v51 }
 0x368 PF: > { %s18_s20 = sadd.s32 1, %s5918_s20   ;;  %s7611_s5 = smov %s7618_s15 }
 0x369   : > { %p15_p2 = scmp.ge.s32.totalorder %s18_s20, 4   ;;  %s7612_s15 = smov %s5902_s16 }
 0x36a   : > { %s7613_s16 = smov %s5906_s17  ;;  %s7614_s17 = smov %s6036_s8 }
 0x36b   : > { %s7615_s18 = smov %s5914_s19  ;;  %s7616_s19 = smov %s7611_s5 }
 0x36c   :  { %17 = sbr.rel (!%p15_p2) target bundleno = 5 (0x5), region = 100 }
 0x371   :  { %5028 = vsyncpa [#allocation4], 1 }
 0x372   :  { %5030 = vsyncpa [#allocation4 + $0x1], 1 }
 0x373   :  { %5031 = vsyncpa [#allocation6], 1 }

</bundles_post_ra>
